<compile_context>
chip_gen: v6e
topology: v6e:2x2x1
jax: 0.10.0
libtpu: 0.0.40
codegen_flags: <defaults>
</compile_context>

<pallas_src>
import functools
import math

import jax
import jax.numpy as jnp
from jax import lax
from jax.experimental import pallas as pl
from jax.experimental.pallas import tpu as pltpu

KERNEL_SIZES = [3, 5, 7]
MAX_K = max(KERNEL_SIZES)
MAX_PAD = (MAX_K - 1) // 2
BN_EPS = 1e-5
MAX_TILE_LANES = 2048      # per-step VMEM footprint stays ~1-4 MiB even at 2048
HALO_LANES = 128           # lane-aligned halo width, >= (MAX_K-1)//stride for stride>=1
_INV_SQRT2 = 1.0 / math.sqrt(2.0)
_SQRT_2_OVER_PI = math.sqrt(2.0 / math.pi)


def _pad_channels(c):
    # bf16 packs 16 rows per (16, 128) vreg tile; keep every im2col slab
    # tile-aligned so in-kernel slices / concatenation never straddle a tile.
    return ((c + 15) // 16) * 16


def _cdiv(a, b):
    return -(-a // b)


# ---------------------------------------------------------------------------
# Kernel: one (batch element, output L-tile) block of one Multi_Scale_Conv_Block
# ---------------------------------------------------------------------------
def _msc_block_kernel(x_ref, h_ref, w_ref, sh_ref, wf_ref, bf_ref, o_ref, *,
                      stride, c_pad, q_max):
    # x_ref : (1, stride*c_pad, TL)       bf16  polyphase input tile (no halo)
    #         row r*c_pad + ci, col m  ==  x_padded[ci, stride*(tile_off+m) + r]
    # h_ref : (1, 1, stride*c_pad, 128)   bf16  next tile's first 128 columns
    # w_ref : (3*C_out, MAX_K*c_pad)      bf16  BN-scaled, zero-padded branch weights
    # sh_ref: (3*C_out, 1)                f32   folded conv-bias + BN shift
    # wf_ref: (C_out, 3*C_out)            bf16  final 1x1 conv weight
    # bf_ref: (C_out, 1)                  f32   final conv bias
    # o_ref : (1, C_out, TL)              bf16 (intermediate layer) or f32 (last)
    tl = o_ref.shape[2]
    xmain = x_ref[0]                                      # (stride*c_pad, TL)
    if q_max > 0:
        # Lane-concat at a 128-aligned boundary (TL is a multiple of 128).
        xall = jnp.concatenate([xmain, h_ref[0, 0]], axis=1)   # (rows, TL+128)
    else:
        xall = xmain

    # im2col at the strided output positions: global tap j needs phase
    # r = j % stride at lane offset q = j // stride.  All slices are static and
    # sublane-aligned (c_pad multiple of 16); lane offsets are <= 6.
    slabs = []
    for j in range(MAX_K):
        r = j % stride
        q = j // stride
        slabs.append(xall[r * c_pad:(r + 1) * c_pad, q:q + tl])
    x_big = jnp.concatenate(slabs, axis=0)                # (MAX_K*c_pad, TL)

    # All three branch convs + folded bias/BatchNorm: one MXU matmul + one add.
    pre = jnp.dot(w_ref[...], x_big, preferred_element_type=jnp.float32)
    pre = pre + sh_ref[...]                               # (3*C_out, TL) f32

    # tanh-approx GELU: tanh runs on the EUP (free bundle slot) instead of an
    # erf polynomial on the VALU.  Max deviation from exact-erf GELU ~3e-3.
    g = 0.5 * pre * (1.0 + jnp.tanh(
        _SQRT_2_OVER_PI * (pre + 0.044715 * pre * pre * pre)))

    # Final 1x1 conv; its stride was already applied by the polyphase layout.
    out = jnp.dot(wf_ref[...], g.astype(jnp.bfloat16),
                  preferred_element_type=jnp.float32) + bf_ref[...]
    o_ref[0] = out.astype(o_ref.dtype)


# ---------------------------------------------------------------------------
# Wrapper for one Multi_Scale_Conv_Block
# ---------------------------------------------------------------------------
def multi_scale_conv_block(x, folded, stride, out_dtype=jnp.float32):
    """x: (B, C_in, L), folded kernel params -> (B, C_out, L_out) in out_dtype."""
    w_big, shift_big, wf, bf = folded
    B, c_in, L = x.shape
    c_out = wf.shape[0]
    c_pad = _pad_channels(c_in)
    n_br = len(KERNEL_SIZES)
    rows = stride * c_pad
    l_out = (L - 1) // stride + 1
    q_max = (MAX_K - 1) // stride
    assert q_max <= HALO_LANES

    # Lane-dense output tiles (multiples of 128).  A garbage tail is computed
    # and sliced off below, so the tile width never has to divide l_out and the
    # per-step VMEM footprint is bounded regardless of L.
    l128 = _cdiv(l_out, 128) * 128
    tl = min(MAX_TILE_LANES, l128)
    if B == 1:
        # Keep >= 2 parallel grid programs when possible (v7x has 2 TCs/chip).
        half = (l128 // 2) // 128 * 128
        if half >= 128:
            tl = min(tl, half)
    n_lt = _cdiv(l_out, tl)
    l_comp = n_lt * tl

    # Polyphase (stride) decomposition of the zero-padded, channel-padded input.
    # Pure XLA pad/reshape/transpose (no 7x im2col duplication and no per-tile
    # halo duplication in HBM); lets the kernel apply the final conv's stride
    # with contiguous slices.
    m_ph = max(l_comp + HALO_LANES, _cdiv(L + 2 * MAX_PAD, stride))
    lpp = stride * m_ph
    xb = jnp.pad(x.astype(jnp.bfloat16),
                 ((0, 0), (0, c_pad - c_in), (MAX_PAD, lpp - L - MAX_PAD)))
    x_ph = xb.reshape(B, c_pad, m_ph, stride).transpose(0, 3, 1, 2)
    x_ph = x_ph.reshape(B, rows, m_ph)       # row r*c_pad + ci == phase r

    # Tiny 128-lane halo per tile (next tile's head) instead of duplicating the
    # whole activation with halos.
    halo = jnp.stack(
        [lax.slice_in_dim(x_ph, (lt + 1) * tl, (lt + 1) * tl + HALO_LANES, axis=2)
         for lt in range(n_lt)], axis=1)     # (B, n_lt, rows, 128)

    kernel = functools.partial(_msc_block_kernel, stride=stride, c_pad=c_pad,
                               q_max=q_max)
    out = pl.pallas_call(
        kernel,
        out_shape=jax.ShapeDtypeStruct((B, c_out, l_comp), out_dtype),
        grid_spec=pltpu.PrefetchScalarGridSpec(
            num_scalar_prefetch=0,
            grid=(B, n_lt),
            in_specs=[
                pl.BlockSpec((1, rows, tl), lambda b, l: (b, 0, l)),
                pl.BlockSpec((1, 1, rows, HALO_LANES), lambda b, l: (b, l, 0, 0)),
                pl.BlockSpec((n_br * c_out, MAX_K * c_pad), lambda b, l: (0, 0)),
                pl.BlockSpec((n_br * c_out, 1), lambda b, l: (0, 0)),
                pl.BlockSpec((c_out, n_br * c_out), lambda b, l: (0, 0)),
                pl.BlockSpec((c_out, 1), lambda b, l: (0, 0)),
            ],
            out_specs=pl.BlockSpec((1, c_out, tl), lambda b, l: (b, 0, l)),
        ),
        compiler_params=pltpu.CompilerParams(
            dimension_semantics=("parallel", "parallel")),
    )(x_ph, halo, w_big, shift_big, wf, bf)
    if l_comp != l_out:
        out = out[:, :, :l_out]
    return out


def multi_scale_conv_embedder(x, folded_layers, strides):
    """MultiScaleConvEmbedder.forward: stacked Multi_Scale_Conv_Block.

    Intermediate activations stay in bf16 (the next block consumes bf16 matmul
    operands anyway); only the final block emits f32.
    """
    n = len(folded_layers)
    for i, (folded, s) in enumerate(zip(folded_layers, strides)):
        dt = jnp.float32 if i == n - 1 else jnp.bfloat16
        x = multi_scale_conv_block(x, folded, s, out_dtype=dt)
    return x


# ---------------------------------------------------------------------------
# Parameter synthesis (deterministic, NOT a checkpoint load) + folding
# ---------------------------------------------------------------------------
def make_block_params(key, c_in, c_out):
    n_br = len(KERNEL_SIZES)
    keys = iter(jax.random.split(key, 6 * n_br + 2))
    raw = dict(conv_w=[], conv_b=[], gamma=[], beta=[], mean=[], var=[])
    for k in KERNEL_SIZES:
        raw["conv_w"].append(
            jax.random.normal(next(keys), (c_out, c_in, k), jnp.float32) * 0.1)
        raw["conv_b"].append(
            jax.random.normal(next(keys), (c_out,), jnp.float32) * 0.1)
        raw["gamma"].append(
            1.0 + 0.1 * jax.random.normal(next(keys), (c_out,), jnp.float32))
        raw["beta"].append(
            0.1 * jax.random.normal(next(keys), (c_out,), jnp.float32))
        raw["mean"].append(
            0.1 * jax.random.normal(next(keys), (c_out,), jnp.float32))
        raw["var"].append(
            1.0 + 0.1 * jax.random.uniform(next(keys), (c_out,), jnp.float32))
    raw["final_w"] = jax.random.normal(
        next(keys), (c_out, n_br * c_out), jnp.float32) * 0.1
    raw["final_b"] = jax.random.normal(next(keys), (c_out,), jnp.float32) * 0.1
    return raw


def fold_block_params(raw):
    """Fold conv bias + eval-mode BN into the branch weights; pack for the kernel."""
    c_out, c_in = raw["conv_w"][0].shape[0], raw["conv_w"][0].shape[1]
    c_pad = _pad_channels(c_in)
    n_br = len(KERNEL_SIZES)
    w_big = jnp.zeros((n_br * c_out, MAX_K * c_pad), jnp.float32)
    shift_big = jnp.zeros((n_br * c_out,), jnp.float32)
    for br, k in enumerate(KERNEL_SIZES):
        scale = raw["gamma"][br] / jnp.sqrt(raw["var"][br] + BN_EPS)     # (C_out,)
        shift = raw["beta"][br] - raw["mean"][br] * scale
        w_fold = raw["conv_w"][br] * scale[:, None, None]                # (C_out,C_in,k)
        off = (MAX_K - k) // 2
        blk = jnp.zeros((c_out, MAX_K, c_pad), jnp.float32)
        blk = blk.at[:, off:off + k, :c_in].set(jnp.transpose(w_fold, (0, 2, 1)))
        w_big = w_big.at[br * c_out:(br + 1) * c_out, :].set(
            blk.reshape(c_out, MAX_K * c_pad))
        shift_big = shift_big.at[br * c_out:(br + 1) * c_out].set(
            raw["conv_b"][br] * scale + shift)
    return (w_big.astype(jnp.bfloat16),
            shift_big[:, None].astype(jnp.float32),
            raw["final_w"].astype(jnp.bfloat16),
            raw["final_b"][:, None].astype(jnp.float32))


# ---------------------------------------------------------------------------
# Pure-JAX reference mirroring the PyTorch forward (eval-mode BatchNorm,
# exact-erf GELU as in torch.nn.GELU's default)
# ---------------------------------------------------------------------------
def block_reference(x, raw, stride):
    outs = []
    for br, k in enumerate(KERNEL_SIZES):
        pad = (k - 1) // 2
        y = lax.conv_general_dilated(
            x, raw["conv_w"][br], window_strides=(1,), padding=[(pad, pad)],
            dimension_numbers=("NCH", "OIH", "NCH"))
        y = y + raw["conv_b"][br][None, :, None]
        scale = raw["gamma"][br] / jnp.sqrt(raw["var"][br] + BN_EPS)
        shift = raw["beta"][br] - raw["mean"][br] * scale
        y = y * scale[None, :, None] + shift[None, :, None]
        y = 0.5 * y * (1.0 + lax.erf(y * _INV_SQRT2))
        outs.append(y)
    cat = jnp.concatenate(outs, axis=1)
    out = lax.conv_general_dilated(
        cat, raw["final_w"][:, :, None], window_strides=(stride,),
        padding=[(0, 0)], dimension_numbers=("NCH", "OIH", "NCH"))
    return out + raw["final_b"][None, :, None]


def embedder_reference(x, raw_layers, strides):
    for raw, s in zip(raw_layers, strides):
        x = block_reference(x, raw, s)
    return x


if __name__ == "__main__":
    B, C_IN, L = 2, 4, 2048
    CHANNELS = [16, 32]        # C_out multiples of 8 -> lane/sublane-dense stores
    STRIDES = [2, 2]

    key = jax.random.PRNGKey(0)
    kx, kp = jax.random.split(key)
    x = jax.random.normal(kx, (B, C_IN, L), jnp.float32)

    raw_layers = []
    c_prev = C_IN
    for pk, c_out in zip(jax.random.split(kp, len(CHANNELS)), CHANNELS):
        raw_layers.append(make_block_params(pk, c_prev, c_out))
        c_prev = c_out
    folded_layers = [fold_block_params(r) for r in raw_layers]

    run = jax.jit(lambda xx, pp: multi_scale_conv_embedder(xx, pp, STRIDES))
    out = jax.block_until_ready(run(x, folded_layers))

    ref = embedder_reference(x, raw_layers, STRIDES)
    assert out.shape == ref.shape, (out.shape, ref.shape)
    err = float(jnp.max(jnp.abs(out - ref)))
    # bf16 matmul operands / bf16 intermediate activations + tanh-approx GELU
    # vs the pure-f32, exact-erf reference.
    assert err < 4e-2, err
    print("KERNEL_OK")
</pallas_src>

<mosaic_0001>
module attributes {stable_mosaic.version = 11 : i64} {
  func.func @_msc_block_kernel(%arg0: i32, %arg1: i32, %arg2: memref<1x32x1024xbf16, #tpu.memory_space<vmem>>, %arg3: memref<1x1x32x128xbf16, #tpu.memory_space<vmem>>, %arg4: memref<48x112xbf16, #tpu.memory_space<vmem>>, %arg5: memref<48x1xf32, #tpu.memory_space<vmem>>, %arg6: memref<16x48xbf16, #tpu.memory_space<vmem>>, %arg7: memref<16x1xf32, #tpu.memory_space<vmem>>, %arg8: memref<1x16x1024xbf16, #tpu.memory_space<vmem>>) attributes {dimension_semantics = [#tpu.dimension_semantics<parallel>, #tpu.dimension_semantics<parallel>], iteration_bounds = array<i64: 2, 1>, scalar_prefetch = 0 : i64, scratch_operands = 0 : i64, tpu.core_type = #tpu.core_type<tc>, window_params = [{transform_indices = @transform_0, window_bounds = array<i64: 1, 32, 1024>}, {transform_indices = @transform_1, window_bounds = array<i64: 1, 1, 32, 128>}, {pipeline_mode = #tpu.pipeline_mode<synchronous>, transform_indices = @transform_2, window_bounds = array<i64: 48, 112>}, {pipeline_mode = #tpu.pipeline_mode<synchronous>, transform_indices = @transform_3, window_bounds = array<i64: 48, 1>}, {pipeline_mode = #tpu.pipeline_mode<synchronous>, transform_indices = @transform_4, window_bounds = array<i64: 16, 48>}, {pipeline_mode = #tpu.pipeline_mode<synchronous>, transform_indices = @transform_5, window_bounds = array<i64: 16, 1>}, {transform_indices = @transform_6, window_bounds = array<i64: 1, 16, 1024>}]} {
    %c0 = arith.constant 0 : index
    %c0_0 = arith.constant 0 : index
    %c0_1 = arith.constant 0 : index
    %0 = vector.load %arg2[%c0, %c0_0, %c0_1] : memref<1x32x1024xbf16, #tpu.memory_space<vmem>>, vector<1x32x1024xbf16>
    %1 = vector.shape_cast %0 : vector<1x32x1024xbf16> to vector<32x1024xbf16>
    %c0_2 = arith.constant 0 : index
    %c0_3 = arith.constant 0 : index
    %c0_4 = arith.constant 0 : index
    %c0_5 = arith.constant 0 : index
    %2 = vector.load %arg3[%c0_2, %c0_3, %c0_4, %c0_5] : memref<1x1x32x128xbf16, #tpu.memory_space<vmem>>, vector<1x1x32x128xbf16>
    %3 = vector.shape_cast %2 : vector<1x1x32x128xbf16> to vector<32x128xbf16>
    %4 = tpu.concatenate %1, %3 in 1 : vector<32x1024xbf16>, vector<32x128xbf16> -> vector<32x1152xbf16>
    %5 = vector.extract_strided_slice %4 {offsets = [0, 0], sizes = [16, 1024], strides = [1, 1]} : vector<32x1152xbf16> to vector<16x1024xbf16>
    %6 = vector.extract_strided_slice %4 {offsets = [16, 0], sizes = [16, 1024], strides = [1, 1]} : vector<32x1152xbf16> to vector<16x1024xbf16>
    %7 = vector.extract_strided_slice %4 {offsets = [0, 1], sizes = [16, 1024], strides = [1, 1]} : vector<32x1152xbf16> to vector<16x1024xbf16>
    %8 = vector.extract_strided_slice %4 {offsets = [16, 1], sizes = [16, 1024], strides = [1, 1]} : vector<32x1152xbf16> to vector<16x1024xbf16>
    %9 = vector.extract_strided_slice %4 {offsets = [0, 2], sizes = [16, 1024], strides = [1, 1]} : vector<32x1152xbf16> to vector<16x1024xbf16>
    %10 = vector.extract_strided_slice %4 {offsets = [16, 2], sizes = [16, 1024], strides = [1, 1]} : vector<32x1152xbf16> to vector<16x1024xbf16>
    %11 = vector.extract_strided_slice %4 {offsets = [0, 3], sizes = [16, 1024], strides = [1, 1]} : vector<32x1152xbf16> to vector<16x1024xbf16>
    %12 = tpu.concatenate %5, %6, %7, %8, %9, %10, %11 in 0 : vector<16x1024xbf16>, vector<16x1024xbf16>, vector<16x1024xbf16>, vector<16x1024xbf16>, vector<16x1024xbf16>, vector<16x1024xbf16>, vector<16x1024xbf16> -> vector<112x1024xbf16>
    %c0_6 = arith.constant 0 : index
    %c0_7 = arith.constant 0 : index
    %13 = vector.load %arg4[%c0_6, %c0_7] : memref<48x112xbf16, #tpu.memory_space<vmem>>, vector<48x112xbf16>
    %cst = arith.constant dense<0.000000e+00> : vector<48x1024xf32>
    %14 = tpu.matmul %13, %12, %cst {dimension_numbers = #tpu.dot_dimension_numbers<[1], [0], [0], [1], [0, 0, 1, 1], [], []>} : vector<48x112xbf16>, vector<112x1024xbf16>, vector<48x1024xf32> -> vector<48x1024xf32>
    %c0_8 = arith.constant 0 : index
    %c0_9 = arith.constant 0 : index
    %15 = vector.load %arg5[%c0_8, %c0_9] : memref<48x1xf32, #tpu.memory_space<vmem>>, vector<48x1xf32>
    %16 = vector.broadcast %15 : vector<48x1xf32> to vector<48x1024xf32>
    %17 = arith.addf %14, %16 : vector<48x1024xf32>
    %cst_10 = arith.constant 5.000000e-01 : f32
    %18 = vector.broadcast %cst_10 : f32 to vector<48x1024xf32>
    %19 = arith.mulf %18, %17 : vector<48x1024xf32>
    %cst_11 = arith.constant 4.471500e-02 : f32
    %20 = vector.broadcast %cst_11 : f32 to vector<48x1024xf32>
    %21 = arith.mulf %20, %17 : vector<48x1024xf32>
    %22 = arith.mulf %21, %17 : vector<48x1024xf32>
    %23 = arith.mulf %22, %17 : vector<48x1024xf32>
    %24 = arith.addf %17, %23 : vector<48x1024xf32>
    %cst_12 = arith.constant 0.797884583 : f32
    %25 = vector.broadcast %cst_12 : f32 to vector<48x1024xf32>
    %26 = arith.mulf %25, %24 : vector<48x1024xf32>
    %27 = math.tanh %26 : vector<48x1024xf32>
    %cst_13 = arith.constant 1.000000e+00 : f32
    %28 = vector.broadcast %cst_13 : f32 to vector<48x1024xf32>
    %29 = arith.addf %28, %27 : vector<48x1024xf32>
    %30 = arith.mulf %19, %29 : vector<48x1024xf32>
    %c0_14 = arith.constant 0 : index
    %c0_15 = arith.constant 0 : index
    %31 = vector.load %arg6[%c0_14, %c0_15] : memref<16x48xbf16, #tpu.memory_space<vmem>>, vector<16x48xbf16>
    %32 = arith.truncf %30 : vector<48x1024xf32> to vector<48x1024xbf16>
    %cst_16 = arith.constant dense<0.000000e+00> : vector<16x1024xf32>
    %33 = tpu.matmul %31, %32, %cst_16 {dimension_numbers = #tpu.dot_dimension_numbers<[1], [0], [0], [1], [0, 0, 1, 1], [], []>} : vector<16x48xbf16>, vector<48x1024xbf16>, vector<16x1024xf32> -> vector<16x1024xf32>
    %c0_17 = arith.constant 0 : index
    %c0_18 = arith.constant 0 : index
    %34 = vector.load %arg7[%c0_17, %c0_18] : memref<16x1xf32, #tpu.memory_space<vmem>>, vector<16x1xf32>
    %35 = vector.broadcast %34 : vector<16x1xf32> to vector<16x1024xf32>
    %36 = arith.addf %33, %35 : vector<16x1024xf32>
    %37 = arith.truncf %36 : vector<16x1024xf32> to vector<16x1024xbf16>
    %c0_19 = arith.constant 0 : index
    %c0_20 = arith.constant 0 : index
    %c0_21 = arith.constant 0 : index
    %38 = vector.load %arg8[%c0_19, %c0_20, %c0_21] : memref<1x16x1024xbf16, #tpu.memory_space<vmem>>, vector<1x16x1024xbf16>
    %39 = vector.shape_cast %38 : vector<1x16x1024xbf16> to vector<16x1024xbf16>
    %40 = vector.shape_cast %37 : vector<16x1024xbf16> to vector<1x16x1024xbf16>
    tpu.vector_store %arg8[%c0_19, %c0_20, %c0_21], %40 {strides = array<i32>} : memref<1x16x1024xbf16, #tpu.memory_space<vmem>>, vector<1x16x1024xbf16>,
    return
  }
  func.func @transform_0(%arg0: i32, %arg1: i32) -> (i32, i32, i32) {
    %c0_i32 = arith.constant 0 : i32
    %c0_i32_0 = arith.constant 0 : i32
    return %arg0, %c0_i32, %arg1 : i32, i32, i32
  }
  func.func @transform_1(%arg0: i32, %arg1: i32) -> (i32, i32, i32, i32) {
    %c0_i32 = arith.constant 0 : i32
    %c0_i32_0 = arith.constant 0 : i32
    %c0_i32_1 = arith.constant 0 : i32
    return %arg0, %arg1, %c0_i32, %c0_i32_0 : i32, i32, i32, i32
  }
  func.func @transform_2(%arg0: i32, %arg1: i32) -> (i32, i32) {
    %c0_i32 = arith.constant 0 : i32
    %c0_i32_0 = arith.constant 0 : i32
    %c0_i32_1 = arith.constant 0 : i32
    return %c0_i32, %c0_i32_0 : i32, i32
  }
  func.func @transform_3(%arg0: i32, %arg1: i32) -> (i32, i32) {
    %c0_i32 = arith.constant 0 : i32
    %c0_i32_0 = arith.constant 0 : i32
    %c0_i32_1 = arith.constant 0 : i32
    return %c0_i32, %c0_i32_0 : i32, i32
  }
  func.func @transform_4(%arg0: i32, %arg1: i32) -> (i32, i32) {
    %c0_i32 = arith.constant 0 : i32
    %c0_i32_0 = arith.constant 0 : i32
    %c0_i32_1 = arith.constant 0 : i32
    return %c0_i32, %c0_i32_0 : i32, i32
  }
  func.func @transform_5(%arg0: i32, %arg1: i32) -> (i32, i32) {
    %c0_i32 = arith.constant 0 : i32
    %c0_i32_0 = arith.constant 0 : i32
    %c0_i32_1 = arith.constant 0 : i32
    return %c0_i32, %c0_i32_0 : i32, i32
  }
  func.func @transform_6(%arg0: i32, %arg1: i32) -> (i32, i32, i32) {
    %c0_i32 = arith.constant 0 : i32
    %c0_i32_0 = arith.constant 0 : i32
    return %arg0, %c0_i32, %arg1 : i32, i32, i32
  }
}

module attributes {stable_mosaic.version = 11 : i64} {
  func.func @_msc_block_kernel(%arg0: i32, %arg1: i32, %arg2: memref<1x32x512xbf16, #tpu.memory_space<vmem>>, %arg3: memref<1x1x32x128xbf16, #tpu.memory_space<vmem>>, %arg4: memref<96x112xbf16, #tpu.memory_space<vmem>>, %arg5: memref<96x1xf32, #tpu.memory_space<vmem>>, %arg6: memref<32x96xbf16, #tpu.memory_space<vmem>>, %arg7: memref<32x1xf32, #tpu.memory_space<vmem>>, %arg8: memref<1x32x512xf32, #tpu.memory_space<vmem>>) attributes {dimension_semantics = [#tpu.dimension_semantics<parallel>, #tpu.dimension_semantics<parallel>], iteration_bounds = array<i64: 2, 1>, scalar_prefetch = 0 : i64, scratch_operands = 0 : i64, tpu.core_type = #tpu.core_type<tc>, window_params = [{transform_indices = @transform_0, window_bounds = array<i64: 1, 32, 512>}, {transform_indices = @transform_1, window_bounds = array<i64: 1, 1, 32, 128>}, {pipeline_mode = #tpu.pipeline_mode<synchronous>, transform_indices = @transform_2, window_bounds = array<i64: 96, 112>}, {pipeline_mode = #tpu.pipeline_mode<synchronous>, transform_indices = @transform_3, window_bounds = array<i64: 96, 1>}, {pipeline_mode = #tpu.pipeline_mode<synchronous>, transform_indices = @transform_4, window_bounds = array<i64: 32, 96>}, {pipeline_mode = #tpu.pipeline_mode<synchronous>, transform_indices = @transform_5, window_bounds = array<i64: 32, 1>}, {transform_indices = @transform_6, window_bounds = array<i64: 1, 32, 512>}]} {
    %c0 = arith.constant 0 : index
    %c0_0 = arith.constant 0 : index
    %c0_1 = arith.constant 0 : index
    %0 = vector.load %arg2[%c0, %c0_0, %c0_1] : memref<1x32x512xbf16, #tpu.memory_space<vmem>>, vector<1x32x512xbf16>
    %1 = vector.shape_cast %0 : vector<1x32x512xbf16> to vector<32x512xbf16>
    %c0_2 = arith.constant 0 : index
    %c0_3 = arith.constant 0 : index
    %c0_4 = arith.constant 0 : index
    %c0_5 = arith.constant 0 : index
    %2 = vector.load %arg3[%c0_2, %c0_3, %c0_4, %c0_5] : memref<1x1x32x128xbf16, #tpu.memory_space<vmem>>, vector<1x1x32x128xbf16>
    %3 = vector.shape_cast %2 : vector<1x1x32x128xbf16> to vector<32x128xbf16>
    %4 = tpu.concatenate %1, %3 in 1 : vector<32x512xbf16>, vector<32x128xbf16> -> vector<32x640xbf16>
    %5 = vector.extract_strided_slice %4 {offsets = [0, 0], sizes = [16, 512], strides = [1, 1]} : vector<32x640xbf16> to vector<16x512xbf16>
    %6 = vector.extract_strided_slice %4 {offsets = [16, 0], sizes = [16, 512], strides = [1, 1]} : vector<32x640xbf16> to vector<16x512xbf16>
    %7 = vector.extract_strided_slice %4 {offsets = [0, 1], sizes = [16, 512], strides = [1, 1]} : vector<32x640xbf16> to vector<16x512xbf16>
    %8 = vector.extract_strided_slice %4 {offsets = [16, 1], sizes = [16, 512], strides = [1, 1]} : vector<32x640xbf16> to vector<16x512xbf16>
    %9 = vector.extract_strided_slice %4 {offsets = [0, 2], sizes = [16, 512], strides = [1, 1]} : vector<32x640xbf16> to vector<16x512xbf16>
    %10 = vector.extract_strided_slice %4 {offsets = [16, 2], sizes = [16, 512], strides = [1, 1]} : vector<32x640xbf16> to vector<16x512xbf16>
    %11 = vector.extract_strided_slice %4 {offsets = [0, 3], sizes = [16, 512], strides = [1, 1]} : vector<32x640xbf16> to vector<16x512xbf16>
    %12 = tpu.concatenate %5, %6, %7, %8, %9, %10, %11 in 0 : vector<16x512xbf16>, vector<16x512xbf16>, vector<16x512xbf16>, vector<16x512xbf16>, vector<16x512xbf16>, vector<16x512xbf16>, vector<16x512xbf16> -> vector<112x512xbf16>
    %c0_6 = arith.constant 0 : index
    %c0_7 = arith.constant 0 : index
    %13 = vector.load %arg4[%c0_6, %c0_7] : memref<96x112xbf16, #tpu.memory_space<vmem>>, vector<96x112xbf16>
    %cst = arith.constant dense<0.000000e+00> : vector<96x512xf32>
    %14 = tpu.matmul %13, %12, %cst {dimension_numbers = #tpu.dot_dimension_numbers<[1], [0], [0], [1], [0, 0, 1, 1], [], []>} : vector<96x112xbf16>, vector<112x512xbf16>, vector<96x512xf32> -> vector<96x512xf32>
    %c0_8 = arith.constant 0 : index
    %c0_9 = arith.constant 0 : index
    %15 = vector.load %arg5[%c0_8, %c0_9] : memref<96x1xf32, #tpu.memory_space<vmem>>, vector<96x1xf32>
    %16 = vector.broadcast %15 : vector<96x1xf32> to vector<96x512xf32>
    %17 = arith.addf %14, %16 : vector<96x512xf32>
    %cst_10 = arith.constant 5.000000e-01 : f32
    %18 = vector.broadcast %cst_10 : f32 to vector<96x512xf32>
    %19 = arith.mulf %18, %17 : vector<96x512xf32>
    %cst_11 = arith.constant 4.471500e-02 : f32
    %20 = vector.broadcast %cst_11 : f32 to vector<96x512xf32>
    %21 = arith.mulf %20, %17 : vector<96x512xf32>
    %22 = arith.mulf %21, %17 : vector<96x512xf32>
    %23 = arith.mulf %22, %17 : vector<96x512xf32>
    %24 = arith.addf %17, %23 : vector<96x512xf32>
    %cst_12 = arith.constant 0.797884583 : f32
    %25 = vector.broadcast %cst_12 : f32 to vector<96x512xf32>
    %26 = arith.mulf %25, %24 : vector<96x512xf32>
    %27 = math.tanh %26 : vector<96x512xf32>
    %cst_13 = arith.constant 1.000000e+00 : f32
    %28 = vector.broadcast %cst_13 : f32 to vector<96x512xf32>
    %29 = arith.addf %28, %27 : vector<96x512xf32>
    %30 = arith.mulf %19, %29 : vector<96x512xf32>
    %c0_14 = arith.constant 0 : index
    %c0_15 = arith.constant 0 : index
    %31 = vector.load %arg6[%c0_14, %c0_15] : memref<32x96xbf16, #tpu.memory_space<vmem>>, vector<32x96xbf16>
    %32 = arith.truncf %30 : vector<96x512xf32> to vector<96x512xbf16>
    %cst_16 = arith.constant dense<0.000000e+00> : vector<32x512xf32>
    %33 = tpu.matmul %31, %32, %cst_16 {dimension_numbers = #tpu.dot_dimension_numbers<[1], [0], [0], [1], [0, 0, 1, 1], [], []>} : vector<32x96xbf16>, vector<96x512xbf16>, vector<32x512xf32> -> vector<32x512xf32>
    %c0_17 = arith.constant 0 : index
    %c0_18 = arith.constant 0 : index
    %34 = vector.load %arg7[%c0_17, %c0_18] : memref<32x1xf32, #tpu.memory_space<vmem>>, vector<32x1xf32>
    %35 = vector.broadcast %34 : vector<32x1xf32> to vector<32x512xf32>
    %36 = arith.addf %33, %35 : vector<32x512xf32>
    %c0_19 = arith.constant 0 : index
    %c0_20 = arith.constant 0 : index
    %c0_21 = arith.constant 0 : index
    %37 = vector.load %arg8[%c0_19, %c0_20, %c0_21] : memref<1x32x512xf32, #tpu.memory_space<vmem>>, vector<1x32x512xf32>
    %38 = vector.shape_cast %37 : vector<1x32x512xf32> to vector<32x512xf32>
    %39 = vector.shape_cast %36 : vector<32x512xf32> to vector<1x32x512xf32>
    tpu.vector_store %arg8[%c0_19, %c0_20, %c0_21], %39 {strides = array<i32>} : memref<1x32x512xf32, #tpu.memory_space<vmem>>, vector<1x32x512xf32>,
    return
  }
  func.func @transform_0(%arg0: i32, %arg1: i32) -> (i32, i32, i32) {
    %c0_i32 = arith.constant 0 : i32
    %c0_i32_0 = arith.constant 0 : i32
    return %arg0, %c0_i32, %arg1 : i32, i32, i32
  }
  func.func @transform_1(%arg0: i32, %arg1: i32) -> (i32, i32, i32, i32) {
    %c0_i32 = arith.constant 0 : i32
    %c0_i32_0 = arith.constant 0 : i32
    %c0_i32_1 = arith.constant 0 : i32
    return %arg0, %arg1, %c0_i32, %c0_i32_0 : i32, i32, i32, i32
  }
  func.func @transform_2(%arg0: i32, %arg1: i32) -> (i32, i32) {
    %c0_i32 = arith.constant 0 : i32
    %c0_i32_0 = arith.constant 0 : i32
    %c0_i32_1 = arith.constant 0 : i32
    return %c0_i32, %c0_i32_0 : i32, i32
  }
  func.func @transform_3(%arg0: i32, %arg1: i32) -> (i32, i32) {
    %c0_i32 = arith.constant 0 : i32
    %c0_i32_0 = arith.constant 0 : i32
    %c0_i32_1 = arith.constant 0 : i32
    return %c0_i32, %c0_i32_0 : i32, i32
  }
  func.func @transform_4(%arg0: i32, %arg1: i32) -> (i32, i32) {
    %c0_i32 = arith.constant 0 : i32
    %c0_i32_0 = arith.constant 0 : i32
    %c0_i32_1 = arith.constant 0 : i32
    return %c0_i32, %c0_i32_0 : i32, i32
  }
  func.func @transform_5(%arg0: i32, %arg1: i32) -> (i32, i32) {
    %c0_i32 = arith.constant 0 : i32
    %c0_i32_0 = arith.constant 0 : i32
    %c0_i32_1 = arith.constant 0 : i32
    return %c0_i32, %c0_i32_0 : i32, i32
  }
  func.func @transform_6(%arg0: i32, %arg1: i32) -> (i32, i32, i32) {
    %c0_i32 = arith.constant 0 : i32
    %c0_i32_0 = arith.constant 0 : i32
    return %arg0, %c0_i32, %arg1 : i32, i32, i32
  }
}

</mosaic_0001>

<bundles_post_ra>
// kernel: _lambda_.2
= control target key start
LH: loop header
LB: loop body
LE: loop exit
PB: predicated region body
PF: predicated region fallthrough
CT: control target
= control target key end

     0   :  { %s2630_s21 = smov 0   ;;  %s2632_s22 = smov 0   ;;  %s3592_s0 = inlined_call_operand.vmem [shape: bf16[2,32,1152], index: 0, kind: input, shape index: {}]   ;;  %s3593_s1 = inlined_call_operand.vmem [shape: bf16[2,1,32,128], index: 1, kind: input, shape index: {}]   ;;  %s3594_s2 = inlined_call_operand.vmem [shape: bf16[48,112], index: 2, kind: input, shape index: {}]   ;;  %s3595_s3 = inlined_call_operand.vmem [shape: f32[48,1], index: 3, kind: input, shape index: {}]   ;;  %s3596_s4 = inlined_call_operand.vmem [shape: bf16[16,48], index: 4, kind: input, shape index: {}]   ;;  %s3597_s5 = inlined_call_operand.vmem [shape: f32[16,1], index: 5, kind: input, shape index: {}]   ;;  %s3598_s6 = inlined_call_operand.vmem [shape: bf16[2,16,1024], index: 6, kind: output, shape index: {}]  }
   0x1   :  { %s2634_s23 = smov 0   ;;  %s2636_s24 = smov 0  }
   0x2   :  { %s2638_s25 = smov 0  }
   0x3 LB: > { %s28_s26 = sadd.s32 1, %s2569_s24  ;;  %p44_p1 = scmp.ne.s32.totalorder %s2561_s22, %s2557_s21  ;;  %s2573_s25 = sphi %s2638_s25, %s16_s25   ;;  %s2569_s24 = sphi %s2636_s24, %s3676_s24   ;;  %s2565_s23 = sphi %s2634_s23, %s3675_s23   ;;  %s2561_s22 = sphi %s2632_s22, %s3674_s22   ;;  %s2557_s21 = sphi %s2630_s21, %s3673_s21  }
   0x4   : > { %p30_p0 = scmp.ge.s32.totalorder %s28_s26, 2  ;;  %p45_p2 = scmp.eq.s32.totalorder %s2573_s25, 0 }
   0x5   : > { %s37_s28 = sadd.s32 1, %s2561_s22  ;;  %p2259_p5 = scmp.ge.s32.totalorder %s2573_s25, 2 }
   0x6   : > { %s3678_s26 = smov (%p30_p0, %s28_s26), 0  ;;  %p46_p3 = por %p45_p2, %p44_p1 }
   0x7   : > { %s32_s27 = ssub.s32 %s2569_s24, %s3678_s26  ;;  %222 = sbr.rel (%p2259_p5) target bundleno = 25 (0x19), region = 32 }
   0x8   : > { %p35_p4 = scmp.eq.s32.totalorder %s32_s27, 0 }
   0xa   : > { %s2665_s29 = scalar_select %p35_p4, %s2561_s22, %s37_s28  }
   0xc   : > { %225 = sbr.rel (!%p46_p3) target bundleno = 25 (0x19), region = 36  ;;  %s227_s30 = sand.u32 (%p46_p3), 1, %s2561_s22  }
   0xd   : > { %s2338_s7 = smul.u32 (%p46_p3), 144, %s2569_s24  ;;  %s2670_s8 = sshll.u32 (%p46_p3), %s227_s30, 7 }
   0xe   : > { %s229_s12 = scalar_lea.vmem (%p46_p3), [#allocation2], %s2670_s8   ;;  %s2685_s15 = smov (%p46_p3), 0  }
   0xf   : > { %s2675_s11 = scalar_lea.vmem (%p46_p3), %s3592_s0, %s2338_s7   ;;  %s3615_s13 = smov (%p46_p3), %s229_s12 }
  0x10   : > { %s3616_s14 = smov (%p46_p3), %s2675_s11  ;;  %s2587_s16 = smov (%p46_p3), 0  }
  0x11 LB: >> { %v442_v0 = vld [vmem:[%s2581_s14] sm:$0xff]  ;;  %v446_v2 = vld [vmem:[%s2581_s14 + $0x48] sm:$0xff]  ;;  %s450_s17 = sadd.s32 1, %s2585_s15  ;;  %s436_s16 = sadd.s32 1, %s2589_s16   ;;  %s2589_s16 = sphi %s2587_s16, %s436_s16   ;;  %s2585_s15 = sphi %s2685_s15, %s3617_s15   ;;  %s2581_s14 = sphi %s3616_s14, %s455_s14   ;;  %s2577_s13 = sphi %s3615_s13, %s456_s13  }
  0x12   : >> { %v444_v1 = vld [vmem:[%s2581_s14 + $0x24] sm:$0xff]  ;;  %443 = vst [vmem:[%s2577_s13] sm:$0xff] %v442_v0  ;;  %447 = vst [vmem:[%s2577_s13 + $0x40] sm:$0xff] %v446_v2  ;;  %v448_v3 = vld [vmem:[%s2581_s14 + $0x6c] sm:$0xff]  ;;  %p451_p6 = scmp.ge.s32.totalorder %s450_s17, 4  ;;  %p435_p7 = scmp.ge.s32.totalorder %s436_s16, 4 }
  0x13   : >> { %445 = vst [vmem:[%s2577_s13 + $0x20] sm:$0xff] %v444_v1  ;;  %449 = vst [vmem:[%s2577_s13 + $0x60] sm:$0xff] %v448_v3 }
  0x14   : >> { %s3680_s17 = smov (%p451_p6, %s450_s17), 0  ;;  %438 = sbr.rel (!%p435_p7) target bundleno = 17 (0x11), region = 177 }
  0x15   : >> { %s2264_s18 = sshll.u32 %s3680_s17, 3  ;;  %s3617_s15 = smov %s3680_s17 }
  0x16   : >> { %s455_s14 = scalar_lea.vmem %s2675_s11, %s2264_s18   ;;  %s456_s13 = scalar_lea.vmem %s229_s12, %s2264_s18 [#allocation2]  }
  0x19 PF: > { %p2274_p8 = scmp.ge.s32.totalorder %s2573_s25, 1  ;;  %p680_p9 = scmp.lt.s32.totalorder %s2573_s25, 3 }
  0x1b   : > { %p681_p10 = pnand %p2274_p8, %p680_p9 }
  0x1d   : > { %684 = sbr.rel (%p681_p10) target bundleno = 755 (0x2f3), region = 106 }
  0x22   : > { %s687_s19 = sand.u32 1, %s2557_s21   ;;  %p734_p11 = scmp.lt.s32.totalorder %s2565_s23, 1  ;;  %v3599_v27 = vmov 0   ;;  %v1047_v39 = vld [vmem:[%s3595_s3 + $0x20] sm:$0xff]  ;;  %v1048_v40 = vld [vmem:[%s3595_s3 + $0x28] sm:$0xff]  ;;  %v1045_v41 = vld [vmem:[%s3595_s3 + $0x10] sm:$0xff] }
  0x23   : > { %s2275_s20 = sshll.u32 %s687_s19, 7  ;;  %s2591_s21 = smov 125   ;;  %1199 = vmatprep.mubr.bf16.mxu1 %v3599_v27  ;;  %1136 = vmatprep.mubr.bf16.mxu0 %v3599_v27  ;;  %v1043_v42 = vld [vmem:[%s3595_s3] sm:$0xff]  ;;  %v1046_v43 = vld [vmem:[%s3595_s3 + $0x18] sm:$0xff]  ;;  %v1044_v47 = vld [vmem:[%s3595_s3 + $0x8] sm:$0xff]  ;;  %vm1020_vm0 = vcmask 1022976  }
  0x24   : > { %s2702_s27 = scalar_lea.vmem [#allocation2], %s2275_s20  ;;  %s3682_s23 = smov (!%p734_p11, %s2565_s23), 1  ;;  %2415 = vset.pattern.permute.xlu1 %v3599_v27  ;;  %2416 = vset.pattern.permute.xlu0 %v3599_v27  ;;  %v1814_v44 = vld [vmem:[%s3597_s5] sm:$0xff]  ;;  %v1815_v51 = vld [vmem:[%s3597_s5 + $0x8] sm:$0xff]  ;;  %vm951_vm1 = vcmask 1031168   ;;  %vm882_vm2 = vcmask 1039360  }
  0x25   : > { %v755_v4 = vld [vmem:[%s2702_s27 + $0x8] sm:$0xff]  ;;  %v754_v6 = vld [vmem:[%s2702_s27] sm:$0xff]  ;;  %v756_v9 = vld [vmem:[%s2702_s27 + $0x10] sm:$0xff]  ;;  %s2328_s28 = sshll.u32 %s3682_s23, 4  ;;  %s2592_s9 = smov 126   ;;  %vm1094_vm3 = vcmask 916480  }
  0x26   : > { %v759_v5 = vld [vmem:[%s2702_s27 + $0x28] sm:$0xff]  ;;  %v758_v8 = vld [vmem:[%s2702_s27 + $0x20] sm:$0xff]  ;;  %v760_v10 = vld [vmem:[%s2702_s27 + $0x30] sm:$0xff]  ;;  %s2732_s8 = scalar_lea.vmem %s3593_s1, %s2328_s28  ;;  %s2593_s10 = smov 127   ;;  %vm1831_vm4 = vcmask 392192  }
  0x27   : > { %v2708_v7 = vcombine.high %v755_v4, %v759_v5  ;;  %v2713_v11 = vcombine.high %v754_v6, %v758_v8  ;;  %v2720_v12 = vcombine.low %v756_v9, %v760_v10  ;;  %v2724_v13 = vcombine.low %v755_v4, %v759_v5  ;;  %v762_v14 = vld [vmem:[%s2702_s27 + $0x40] sm:$0xff]  ;;  %v763_v18 = vld [vmem:[%s2702_s27 + $0x48] sm:$0xff]  ;;  %v764_v22 = vld [vmem:[%s2702_s27 + $0x50] sm:$0xff]  ;;  %s2329_s17 = sshll.u32 %s3682_s23, 6 }
  0x28   : > { %v766_v15 = vld [vmem:[%s2702_s27 + $0x60] sm:$0xff]  ;;  %v2740_v17 = vcombine.low %v754_v6, %v758_v8  ;;  %v767_v19 = vld [vmem:[%s2702_s27 + $0x68] sm:$0xff]  ;;  %v768_v23 = vld [vmem:[%s2702_s27 + $0x70] sm:$0xff]  ;;  %v2792_v26 = vcombine.high %v756_v9, %v760_v10  ;;  %s3567_s20 = scalar_lea.vmem %s3598_s6, %s2329_s17 }
  0x29   : > { %1008 = vrot.lane.b32.xlu1 %v2708_v7, %s2591_s21  ;;  %1004 = vrot.lane.b32.xlu0 %v2713_v11, %s2591_s21  ;;  %v2736_v16 = vcombine.high %v762_v14, %v766_v15  ;;  %v2746_v20 = vcombine.high %v763_v18, %v767_v19  ;;  %v2750_v21 = vcombine.low %v763_v18, %v767_v19  ;;  %v757_v28 = vld [vmem:[%s2702_s27 + $0x18] sm:$0xff]  ;;  %v2417_v33 = vld [vmem:[%s2732_s8] sm:$0xff]  }
  0x2a   : > { %v2756_v24 = vcombine.low %v762_v14, %v766_v15  ;;  %v2760_v25 = vcombine.low %v764_v22, %v768_v23  ;;  %v761_v29 = vld [vmem:[%s2702_s27 + $0x38] sm:$0xff]  ;;  %v2812_v32 = vcombine.high %v764_v22, %v768_v23  ;;  %v2418_v38 = vld [vmem:[%s2732_s8 + $0x8] sm:$0xff]  }
  0x2b   : > { %v2804_v30 = vcombine.high %v757_v28, %v761_v29  ;;  %v2808_v31 = vcombine.low %v757_v28, %v761_v29  ;;  %v765_v34 = vld [vmem:[%s2702_s27 + $0x58] sm:$0xff] }
  0x2c   : > { %v769_v35 = vld [vmem:[%s2702_s27 + $0x78] sm:$0xff] }
  0x2d   : > { %1010 = vrot.lane.b32.xlu1 %v2720_v12, %s2591_s21  ;;  %1006 = vrot.lane.b32.xlu0 %v2724_v13, %s2591_s21  ;;  %v2821_v36 = vcombine.high %v765_v34, %v769_v35  ;;  %v2824_v37 = vcombine.low %v765_v34, %v769_v35 }
  0x31   : > { %970 = vrot.lane.b32.xlu1 %v2736_v16, %s2592_s9  ;;  %1002 = vrot.lane.b32.xlu0 %v2740_v17, %s2591_s21 }
  0x35   : > { %974 = vrot.lane.b32.xlu1 %v2746_v20, %s2592_s9  ;;  %972 = vrot.lane.b32.xlu0 %v2750_v21, %s2592_s9 }
  0x39   : > { %968 = vrot.lane.b32.xlu1 %v2756_v24, %s2592_s9  ;;  %976 = vrot.lane.b32.xlu0 %v2760_v25, %s2592_s9 }
  0x3d   : > { %937 = vrot.lane.b32.xlu1 %v2724_v13, %s2592_s9  ;;  %935 = vrot.lane.b32.xlu0 %v2713_v11, %s2592_s9 }
  0x41   : > { %941 = vrot.lane.b32.xlu1 %v2720_v12, %s2592_s9  ;;  %939 = vrot.lane.b32.xlu0 %v2708_v7, %s2592_s9 }
  0x45   : > { %901 = vrot.lane.b32.xlu1 %v2736_v16, %s2593_s10  ;;  %933 = vrot.lane.b32.xlu0 %v2740_v17, %s2592_s9 }
  0x49   : > { %905 = vrot.lane.b32.xlu1 %v2746_v20, %s2593_s10  ;;  %903 = vrot.lane.b32.xlu0 %v2750_v21, %s2593_s10 }
  0x4d   : > { %899 = vrot.lane.b32.xlu1 %v2756_v24, %s2593_s10  ;;  %907 = vrot.lane.b32.xlu0 %v2760_v25, %s2593_s10 }
  0x51   : > { %868 = vrot.lane.b32.xlu1 %v2724_v13, %s2593_s10  ;;  %866 = vrot.lane.b32.xlu0 %v2713_v11, %s2593_s10 }
  0x55   : > { %872 = vrot.lane.b32.xlu1 %v2720_v12, %s2593_s10  ;;  %870 = vrot.lane.b32.xlu0 %v2708_v7, %s2593_s10 }
  0x59   : > { %1012 = vrot.lane.b32.xlu1 %v2792_v26, %s2591_s21  ;;  %864 = vrot.lane.b32.xlu0 %v2740_v17, %s2593_s10 }
  0x5d   : > { %1016 = vrot.lane.b32.xlu1 %v2804_v30, %s2591_s21  ;;  %1014 = vrot.lane.b32.xlu0 %v2808_v31, %s2591_s21 }
  0x61   : > { %978 = vrot.lane.b32.xlu1 %v2812_v32, %s2592_s9  ;;  %1018 = vrot.lane.b32.xlu0 %v2417_v33, %s2591_s21 }
  0x65   : > { %982 = vrot.lane.b32.xlu1 %v2821_v36, %s2592_s9  ;;  %980 = vrot.lane.b32.xlu0 %v2824_v37, %s2592_s9 }
  0x69   : > { %943 = vrot.lane.b32.xlu1 %v2792_v26, %s2592_s9  ;;  %984 = vrot.lane.b32.xlu0 %v2418_v38, %s2592_s9 }
  0x6d   : > { %947 = vrot.lane.b32.xlu1 %v2804_v30, %s2592_s9  ;;  %945 = vrot.lane.b32.xlu0 %v2808_v31, %s2592_s9 }
  0x71   : > { %909 = vrot.lane.b32.xlu1 %v2812_v32, %s2593_s10  ;;  %949 = vrot.lane.b32.xlu0 %v2417_v33, %s2592_s9 }
  0x75   : > { %913 = vrot.lane.b32.xlu1 %v2821_v36, %s2593_s10  ;;  %911 = vrot.lane.b32.xlu0 %v2824_v37, %s2593_s10 }
  0x79   : > { %874 = vrot.lane.b32.xlu1 %v2792_v26, %s2593_s10  ;;  %915 = vrot.lane.b32.xlu0 %v2418_v38, %s2593_s10 }
  0x7d   : > { %878 = vrot.lane.b32.xlu1 %v2804_v30, %s2593_s10  ;;  %876 = vrot.lane.b32.xlu0 %v2808_v31, %s2593_s10 }
  0x81   : > { %880 = vrot.lane.b32.xlu0 %v2417_v33, %s2593_s10  ;;  %1071 = vperm.xlu1 %2415, %v1047_v39  }
  0x85   : > { %1076 = vperm.xlu0 %2416, %v1048_v40   ;;  %1061 = vperm.xlu1 %2415, %v1045_v41  }
  0x89   : > { %1051 = vperm.xlu0 %2416, %v1043_v42   ;;  %1066 = vperm.xlu1 %2415, %v1046_v43  }
  0x8d   : > { %1818 = vperm.xlu0 %2416, %v1814_v44   ;;  %1056 = vperm.xlu1 %2415, %v1044_v47  }
  0x91   : > { %1823 = vperm.xlu1 %2415, %v1815_v51   ;;  %v2939_v51 = vld [vmem:[%s3594_s2 + $0x8] sm:$0xff]  }
  0x9b   : > { %v1009_v45 = vpop.permute.xlu1 %1008  ;;  %v1005_v46 = vpop.permute.xlu0 %1004 }
  0x9f   : > { %v2874_v48 = vpop.permute.xlu1 %1010  ;;  %v1007_v49 = vpop.permute.xlu0 %1006 }
  0xa0   : > { %v1024_v50 = vsel %vm1020_vm0, %v1009_v45, %v2874_v48  ;;  %v1022_v52 = vsel %vm1020_vm0, %v1005_v46, %v1007_v49  ;;  %v1023_v53 = vsel %vm1020_vm0, %v1007_v49, %v1009_v45  ;;  %v2920_v49 = vld [vmem:[%s3594_s2] sm:$0xff]  }
  0xa1   : > { %1169 = vmatprep.subr.bf16.mxu1 %v1024_v50  ;;  %1106 = vmatprep.subr.bf16.mxu0 %v1022_v52 }
  0xa2   : > { %1170 = vmatpush1.bf16.msra.mxu1 %v1023_v53 }
  0xa3   : > { %v971_v54 = vpop.permute.xlu1 %970  ;;  %v1003_v55 = vpop.permute.xlu0 %1002 }
  0xa4   : > { %v1021_v56 = vsel %vm1020_vm0, %v1003_v55, %v1005_v46 }
  0xa5   : > { %1107 = vmatpush1.bf16.msra.mxu0 %v1021_v56 }
  0xa7   : > { %v975_v57 = vpop.permute.xlu1 %974  ;;  %v973_v58 = vpop.permute.xlu0 %972 }
  0xa8   : > { %v987_v59 = vsel %vm951_vm1, %v971_v54, %v973_v58  ;;  %v988_v0 = vsel %vm951_vm1, %v973_v58, %v975_v57 }
  0xa9   : > { %1108 = vmatprep.subr.bf16.mxu0 %v987_v59 }
  0xab   : > { %v969_v60 = vpop.permute.xlu1 %968  ;;  %v2885_v61 = vpop.permute.xlu0 %976 }
  0xac   : > { %v986_v62 = vsel %vm951_vm1, %v969_v60, %v971_v54  ;;  %v989_v63 = vsel %vm951_vm1, %v975_v57, %v2885_v61  ;;  %v2421_v60 = vld [vmem:[%s3594_s2 + $0x10] sm:$0xff]  }
  0xad   : > { %1109 = vmatpush1.bf16.msra.mxu0 %v986_v62  ;;  %1171 = vmatprep.subr.bf16.mxu1 %v989_v63 }
  0xae   : > { %1172 = vmatpush1.bf16.msra.mxu1 %v988_v0 }
  0xaf   : > { %v938_v1 = vpop.permute.xlu1 %937  ;;  %v936_v2 = vpop.permute.xlu0 %935 }
  0xb0   : > { %v953_v3 = vsel %vm951_vm1, %v936_v2, %v938_v1 }
  0xb1   : > { %1110 = vmatprep.subr.bf16.mxu0 %v953_v3 }
  0xb3   : > { %v2892_v4 = vpop.permute.xlu1 %941  ;;  %v940_v5 = vpop.permute.xlu0 %939 }
  0xb4   : > { %v955_v6 = vsel %vm951_vm1, %v940_v5, %v2892_v4  ;;  %v954_v8 = vsel %vm951_vm1, %v938_v1, %v940_v5 }
  0xb5   : > { %1173 = vmatprep.subr.bf16.mxu1 %v955_v6 }
  0xb6   : > { %1174 = vmatpush1.bf16.msra.mxu1 %v954_v8 }
  0xb7   : > { %v902_v9 = vpop.permute.xlu1 %901  ;;  %v934_v10 = vpop.permute.xlu0 %933 }
  0xb8   : > { %v952_v14 = vsel %vm951_vm1, %v934_v10, %v936_v2 }
  0xb9   : > { %1111 = vmatpush1.bf16.msra.mxu0 %v952_v14 }
  0xbb   : > { %v906_v15 = vpop.permute.xlu1 %905  ;;  %v904_v18 = vpop.permute.xlu0 %903 }
  0xbc   : > { %v918_v19 = vsel %vm882_vm2, %v902_v9, %v904_v18  ;;  %v919_v33 = vsel %vm882_vm2, %v904_v18, %v906_v15 }
  0xbd   : > { %1112 = vmatprep.subr.bf16.mxu0 %v918_v19 }
  0xbf   : > { %v900_v22 = vpop.permute.xlu1 %899  ;;  %v2899_v23 = vpop.permute.xlu0 %907 }
  0xc0   : > { %v917_v28 = vsel %vm882_vm2, %v900_v22, %v902_v9  ;;  %v920_v29 = vsel %vm882_vm2, %v906_v15, %v2899_v23 }
  0xc1   : > { %1113 = vmatpush1.bf16.msra.mxu0 %v917_v28  ;;  %1175 = vmatprep.subr.bf16.mxu1 %v920_v29 }
  0xc2   : > { %1176 = vmatpush1.bf16.msra.mxu1 %v919_v33 }
  0xc3   : > { %v869_v34 = vpop.permute.xlu1 %868  ;;  %v867_v35 = vpop.permute.xlu0 %866 }
  0xc4   : > { %v884_v38 = vsel %vm882_vm2, %v867_v35, %v869_v34 }
  0xc5   : > { %1114 = vmatprep.subr.bf16.mxu0 %v884_v38 }
  0xc7   : > { %v2906_v39 = vpop.permute.xlu1 %872  ;;  %v871_v40 = vpop.permute.xlu0 %870 }
  0xc8   : > { %v886_v41 = vsel %vm882_vm2, %v871_v40, %v2906_v39  ;;  %v885_v42 = vsel %vm882_vm2, %v869_v34, %v871_v40 }
  0xc9   : > { %1177 = vmatprep.subr.bf16.mxu1 %v886_v41 }
  0xca   : > { %1178 = vmatpush1.bf16.msra.mxu1 %v885_v42 }
  0xcb   : > { %v1013_v43 = vpop.permute.xlu1 %1012  ;;  %v865_v44 = vpop.permute.xlu0 %864  ;;  %1179 = vmatprep.subr.bf16.mxu1 %v2746_v20 }
  0xcc   : > { %v883_v45 = vsel %vm882_vm2, %v865_v44, %v867_v35 }
  0xcd   : > { %1115 = vmatpush1.bf16.msra.mxu0 %v883_v45 }
  0xce   : > { %1180 = vmatpush1.bf16.msra.mxu1 %v2750_v21  ;;  %1116 = vmatprep.subr.bf16.mxu0 %v2736_v16 }
  0xcf   : > { %v1017_v46 = vpop.permute.xlu1 %1016  ;;  %v1015_v47 = vpop.permute.xlu0 %1014  ;;  %1181 = vmatprep.subr.bf16.mxu1 %v2708_v7 }
  0xd0   : > { %v1026_v7 = vsel %vm1020_vm0, %v1013_v43, %v1015_v47  ;;  %v1027_v16 = vsel %vm1020_vm0, %v1015_v47, %v1017_v46 }
  0xd1   : > { %1117 = vmatpush1.bf16.msra.mxu0 %v2756_v24 }
  0xd2   : > { %1182 = vmatpush1.bf16.msra.mxu1 %v2724_v13  ;;  %1118 = vmatprep.subr.bf16.mxu0 %v2713_v11  ;;  %v1025_v11 = vsel %vm1020_vm0, %v2874_v48, %v1013_v43 }
  0xd3   : > { %v979_v20 = vpop.permute.xlu1 %978  ;;  %v1019_v21 = vpop.permute.xlu0 %1018 }
  0xd4   : > { %v1028_v50 = vsel %vm1020_vm0, %v1017_v46, %v1019_v21  ;;  %v990_v54 = vsel %vm951_vm1, %v2885_v61, %v979_v20 }
  0xd5   : > { %1119 = vmatpush1.bf16.msra.mxu0 %v2740_v17  ;;  %2304 = vmatmul.mubr.msk.bf16.vlgmr.msra.gmra.mxu1 %vm1094_vm3, %v2920_v49 }
  0xd6   : > { %1295 = vmatprep.subr.bf16.mxu1 %v1028_v50  ;;  %1232 = vmatprep.subr.bf16.mxu0 %v1026_v7 }
  0xd7   : > { %v983_v24 = vpop.permute.xlu1 %982  ;;  %1296 = vmatpush1.bf16.msra.mxu1 %v1027_v16  ;;  %v981_v13 = vpop.permute.xlu0 %980  ;;  %1209 = vmatprep.mubr.bf16.mxu1 %v3599_v27 }
  0xd8   : > { %2301 = vmatmul.mubr.msk.bf16.vlgmr.msra.gmra.mxu0 %vm1094_vm3, %v2920_v49  ;;  %v991_v17 = vsel %vm951_vm1, %v979_v20, %v981_v13  ;;  %v992_v55 = vsel %vm951_vm1, %v981_v13, %v983_v24 }
  0xd9   : > { %1233 = vmatpush1.bf16.msra.mxu0 %v1025_v11  ;;  %1146 = vmatprep.mubr.bf16.mxu0 %v3599_v27 }
  0xda   : > { %1234 = vmatprep.subr.bf16.mxu0 %v991_v17 }
  0xdb   : > { %v944_v52 = vpop.permute.xlu1 %943  ;;  %v985_v53 = vpop.permute.xlu0 %984 }
  0xdc   : > { %v993_v48 = vsel %vm951_vm1, %v983_v24, %v985_v53  ;;  %v956_v59 = vsel %vm951_vm1, %v2892_v4, %v944_v52 }
  0xdd   : > { %2305 = vmatmul.mubr.msk.bf16.gmra.mxu1 %vm1094_vm3, %v2939_v51  ;;  %1235 = vmatpush1.bf16.msra.mxu0 %v990_v54 }
  0xde   : > { %1297 = vmatprep.subr.bf16.mxu1 %v993_v48  ;;  %1219 = vmatprep.mubr.bf16.mxu1 %v3599_v27 }
  0xdf   : > { %v948_v56 = vpop.permute.xlu1 %947  ;;  %1298 = vmatpush1.bf16.msra.mxu1 %v992_v55  ;;  %v946_v57 = vpop.permute.xlu0 %945 }
  0xe0   : > { %2302 = vmatmul.mubr.msk.bf16.gmra.mxu0 %vm1094_vm3, %v2939_v51  ;;  %v957_v58 = vsel %vm951_vm1, %v944_v52, %v946_v57  ;;  %v958_v0 = vsel %vm951_vm1, %v946_v57, %v948_v56 }
  0xe1   : > { %1236 = vmatprep.subr.bf16.mxu0 %v957_v58  ;;  %1156 = vmatprep.mubr.bf16.mxu0 %v3599_v27 }
  0xe2   : > { %1237 = vmatpush1.bf16.msra.mxu0 %v956_v59 }
  0xe3   : > { %v910_v61 = vpop.permute.xlu1 %909  ;;  %v950_v62 = vpop.permute.xlu0 %949 }
  0xe4   : > { %v959_v63 = vsel %vm951_vm1, %v948_v56, %v950_v62  ;;  %v921_v4 = vsel %vm882_vm2, %v2899_v23, %v910_v61 }
  0xe5   : > { %2306 = vmatmul.mubr.msk.bf16.gmra.mxu1 %vm1094_vm3, %v2421_v60  ;;  %1299 = vmatprep.subr.bf16.mxu1 %v959_v63 }
  0xe6   : > { %1300 = vmatpush1.bf16.msra.mxu1 %v958_v0  ;;  %1325 = vmatprep.mubr.bf16.mxu1 %v3599_v27 }
  0xe7   : > { %v914_v1 = vpop.permute.xlu1 %913  ;;  %v912_v2 = vpop.permute.xlu0 %911 }
  0xe8   : > { %2303 = vmatmul.mubr.msk.bf16.gmra.mxu0 %vm1094_vm3, %v2421_v60  ;;  %v922_v3 = vsel %vm882_vm2, %v910_v61, %v912_v2  ;;  %v923_v9 = vsel %vm882_vm2, %v912_v2, %v914_v1 }
  0xe9   : > { %1238 = vmatprep.subr.bf16.mxu0 %v922_v3  ;;  %1262 = vmatprep.mubr.bf16.mxu0 %v3599_v27 }
  0xea   : > { %1239 = vmatpush1.bf16.msra.mxu0 %v921_v4 }
  0xeb   : > { %v916_v5 = vpop.permute.xlu0 %915  ;;  %v875_v6 = vpop.permute.xlu1 %874 }
  0xec   : > { %v924_v8 = vsel %vm882_vm2, %v914_v1, %v916_v5  ;;  %v887_v15 = vsel %vm882_vm2, %v2906_v39, %v875_v6 }
  0xed   : > { %1301 = vmatprep.subr.bf16.mxu1 %v924_v8 }
  0xee   : > { %1302 = vmatpush1.bf16.msra.mxu1 %v923_v9 }
  0xef   : > { %v877_v10 = vpop.permute.xlu0 %876  ;;  %v879_v18 = vpop.permute.xlu1 %878 }
  0xf0   : > { %v888_v14 = vsel %vm882_vm2, %v875_v6, %v877_v10  ;;  %v889_v23 = vsel %vm882_vm2, %v877_v10, %v879_v18 }
  0xf1   : > { %1240 = vmatprep.subr.bf16.mxu0 %v888_v14 }
  0xf2   : > { %1241 = vmatpush1.bf16.msra.mxu0 %v887_v15 }
  0xf3   : > { %v881_v19 = vpop.permute.xlu0 %880  ;;  %1242 = vmatprep.subr.bf16.mxu0 %v2812_v32 }
  0xf4   : > { %v890_v22 = vsel %vm882_vm2, %v879_v18, %v881_v19 }
  0xf5   : > { %1303 = vmatprep.subr.bf16.mxu1 %v890_v22 }
  0xf6   : > { %1243 = vmatpush1.bf16.msra.mxu0 %v2760_v25  ;;  %1304 = vmatpush1.bf16.msra.mxu1 %v889_v23 }
  0xf7   : > { %1244 = vmatprep.subr.bf16.mxu0 %v2792_v26  ;;  %1305 = vmatprep.subr.bf16.mxu1 %v2821_v36 }
  0xfa   : > { %1245 = vmatpush1.bf16.msra.mxu0 %v2720_v12  ;;  %1306 = vmatpush1.bf16.msra.mxu1 %v2824_v37 }
  0xfb   : > { %1307 = vmatprep.subr.bf16.mxu1 %v2804_v30 }
  0xfc   : > { %v2998_v12 = vpop.permute.xlu1 %1071 }
  0xfd   : > { %2307 = vmatmul.mubr.msk.bf16.vlgmr.msra.gmra.mxu0 %vm1094_vm3, %v2920_v49 }
  0xfe   : > { %1308 = vmatpush1.bf16.msra.mxu1 %v2808_v31  ;;  %1272 = vmatprep.mubr.bf16.mxu0 %v3599_v27 }
 0x100   : > { %v3000_v25 = vpop.permute.xlu1 %1061  ;;  %v3004_v30 = vpop.permute.xlu0 %1076 }
 0x101   : > { %2310 = vmatmul.mubr.msk.bf16.vlgmr.msra.gmra.mxu1 %vm1094_vm3, %v2920_v49 }
 0x102   : > { %1335 = vmatprep.mubr.bf16.mxu1 %v3599_v27 }
 0x104   : > { %v3002_v26 = vpop.permute.xlu1 %1066  ;;  %v3008_v37 = vpop.permute.xlu0 %1051 }
 0x105   : > { %2308 = vmatmul.mubr.msk.bf16.gmra.mxu0 %vm1094_vm3, %v2939_v51 }
 0x106   : > { %1282 = vmatprep.mubr.bf16.mxu0 %v3599_v27 }
 0x108   : > { %v3006_v36 = vpop.permute.xlu1 %1056 }
 0x109   : > { %2311 = vmatmul.mubr.msk.bf16.gmra.mxu1 %vm1094_vm3, %v2939_v51 }
 0x10a   : > { %1345 = vmatprep.mubr.bf16.mxu1 %v3599_v27 }
 0x10d   : > { %2309 = vmatmul.mubr.msk.bf16.gmra.mxu0 %vm1094_vm3, %v2421_v60 }
 0x10e   : > { %1867 = vmatprep.mubr.bf16.mxu0 %v3599_v27 }
 0x111   : > { %2312 = vmatmul.mubr.msk.bf16.gmra.mxu1 %vm1094_vm3, %v2421_v60 }
 0x112   : > { %1910 = vmatprep.mubr.bf16.mxu1 %v3599_v27 }
 0x195   : > { %v1201_v31 = vpop.f32.mrf.mxu1 }
 0x196   : > { %v3016_v44 = vadd.f32 %v1201_v31, %v3008_v37 }
 0x197   : > { %v1203_v32 = vpop.f32.mrf.mxu1 }
 0x198   : > { %v1138_v28 = vpop.f32.mrf.mxu0  ;;  %3619 = vst [vmem:[#allocation4_spill] sm:$0xff] %v3016_v44  ;;  %v3022_v47 = vadd.f32 %v1203_v32, %v3008_v37  ;;  %v1406_v51 = vmul.f32 0.044715, %v3016_v44  ;;  %v3043_v58 = vmul.f32 0.5, %v3016_v44 }
 0x199   : > { %v1139_v29 = vadd.f32 %v1138_v28, %v3008_v37  ;;  %v1205_v33 = vpop.f32.mrf.mxu1 }
 0x19a   : > { %v1206_v34 = vadd.f32 %v1205_v33, %v3006_v36  ;;  %v1140_v35 = vpop.f32.mrf.mxu0  ;;  %v1407_v52 = vmul.f32 0.044715, %v3022_v47  ;;  %3621 = vst [vmem:[#allocation6_spill] sm:$0xff] %v3043_v58  ;;  %v3049_v63 = vmul.f32 0.5, %v3022_v47  ;;  %v3059_v4 = vmul.f32 %v1406_v51, %v3016_v44 }
 0x19b   : > { %v1404_v38 = vmul.f32 0.044715, %v1139_v29  ;;  %v1207_v39 = vpop.f32.mrf.mxu1  ;;  %v3025_v7 = vadd.f32 %v1140_v35, %v3008_v37  ;;  %v3063_v10 = vmul.f32 0.5, %v1139_v29 }
 0x19c   : > { %v1414_v40 = vmul.f32 0.044715, %v1206_v34  ;;  %v1142_v41 = vpop.f32.mrf.mxu0  ;;  %v3028_v16 = vadd.f32 %v1207_v39, %v3006_v36  ;;  %3622 = vst [vmem:[#allocation7_spill] sm:$0xff] %v3049_v63  ;;  %3623 = vst [vmem:[#allocation8_spill] sm:$0xff] %v3059_v4  ;;  %v1455_v5 = vmul.f32 %v1407_v52, %v3022_v47  ;;  %v3075_v28 = vmul.f32 0.5, %v1206_v34 }
 0x19d   : > { %v3013_v42 = vadd.f32 %v1142_v41, %v3006_v36  ;;  %v1211_v43 = vpop.f32.mrf.mxu1  ;;  %v1452_v49 = vmul.f32 %v1404_v38, %v1139_v29  ;;  %v1405_v59 = vmul.f32 0.044715, %v3025_v7  ;;  %3624 = vst [vmem:[#allocation9_spill] sm:$0xff] %v3063_v10 }
 0x19e   : > { %v3019_v45 = vadd.f32 %v1211_v43, %v3000_v25  ;;  %v1144_v46 = vpop.f32.mrf.mxu0  ;;  %v1462_v21 = vmul.f32 %v1414_v40, %v1206_v34  ;;  %v1415_v60 = vmul.f32 0.044715, %v3028_v16  ;;  %3626 = vst [vmem:[#allocation11_spill] sm:$0xff] %v3075_v28  ;;  %v3082_v40 = vmul.f32 %v1455_v5, %v3022_v47 }
 0x19f   : > { %3618 = vst [vmem:[#allocation3_spill] sm:$0xff] %v3013_v42  ;;  %v1213_v20 = vpop.f32.mrf.mxu1  ;;  %v1412_v24 = vmul.f32 0.044715, %v3013_v42  ;;  %v1500_v53 = vmul.f32 %v1452_v49, %v1139_v29  ;;  %v3037_v54 = vadd.f32 %v1144_v46, %v3006_v36  ;;  %v1453_v23 = vmul.f32 %v1405_v59, %v3025_v7 }
 0x1a0   : > { %v1148_v50 = vpop.f32.mrf.mxu0  ;;  %v1422_v11 = vmul.f32 0.044715, %v3019_v45  ;;  %v1510_v55 = vmul.f32 %v1462_v21, %v1206_v34  ;;  %v3053_v1 = vadd.f32 %v1213_v20, %v3000_v25  ;;  %v1463_v31 = vmul.f32 %v1415_v60, %v3028_v16 }
 0x1a1   : > { %v1215_v13 = vpop.f32.mrf.mxu1  ;;  %v3040_v56 = vadd.f32 %v1148_v50, %v3000_v25  ;;  %v1460_v61 = vmul.f32 %v1412_v24, %v3013_v42  ;;  %v1548_v6 = vadd.f32 %v1500_v53, %v1139_v29  ;;  %v1413_v8 = vmul.f32 0.044715, %v3037_v54 }
 0x1a2   : > { %v3032_v17 = vpop.f32.mrf.mxu0  ;;  %v1470_v0 = vmul.f32 %v1422_v11, %v3019_v45  ;;  %v3056_v2 = vadd.f32 %v1215_v13, %v3002_v26  ;;  %v1558_v14 = vadd.f32 %v1510_v55, %v1206_v34  ;;  %v1423_v33 = vmul.f32 0.044715, %v3053_v1 }
 0x1a3   : > { %v1217_v48 = vpop.f32.mrf.mxu1  ;;  %3620 = vst [vmem:[#allocation5_spill] sm:$0xff] %v3040_v56  ;;  %v1420_v15 = vmul.f32 0.044715, %v3040_v56  ;;  %v1508_v32 = vmul.f32 %v1460_v61, %v3013_v42  ;;  %v1596_v41 = vmul.f32 0.7978846, %v1548_v6  ;;  %v1461_v43 = vmul.f32 %v1413_v8, %v3037_v54 }
 0x1a4   : > { %v1152_v57 = vpop.f32.mrf.mxu0  ;;  %v1518_v29 = vmul.f32 %v1470_v0, %v3019_v45  ;;  %v1430_v35 = vmul.f32 0.044715, %v3056_v2  ;;  %v3086_v49 = vmul.f32 0.5, %v3025_v7  ;;  %v1606_v34 = vmul.f32 0.7978846, %v1558_v14 }
 0x1a5   : > { %v1221_v62 = vpop.f32.mrf.mxu1  ;;  %v3067_v18 = vadd.f32 %v1152_v57, %v3002_v26  ;;  %v1468_v20 = vmul.f32 %v1420_v15, %v3040_v56  ;;  %v3094_v24 = vmul.f32 %v1453_v23, %v3025_v7  ;;  %v3097_v13 = vmul.f32 %v1463_v31, %v3028_v16 }
 0x1a6   : > { %v1154_v3 = vpop.f32.mrf.mxu0  ;;  %v3070_v19 = vadd.f32 %v1221_v62, %v2998_v12  ;;  %3627 = vst [vmem:[#allocation12_spill] sm:$0xff] %v3086_v49  ;;  %v1556_v11 = vadd.f32 %v1508_v32, %v3013_v42  ;;  %v1566_v53 = vadd.f32 %v1518_v29, %v3019_v45  ;;  %v1471_v55 = vmul.f32 %v1423_v33, %v3053_v1 }
 0x1a7   : > { %v1223_v9 = vpop.f32.mrf.mxu1  ;;  %3625 = vst [vmem:[#allocation10_spill] sm:$0xff] %v3067_v18  ;;  %v1428_v21 = vmul.f32 0.044715, %v3067_v18  ;;  %v1478_v57 = vmul.f32 %v1430_v35, %v3056_v2  ;;  %2423 = vtanh.f32 %v1596_v41  ;;  %v3106_v60 = vadd.f32 %v1217_v48, %v3002_v26 }
 0x1a8   : > { %v1158_v22 = vpop.f32.mrf.mxu0  ;;  %v1438_v38 = vmul.f32 0.044715, %v3070_v19  ;;  %v3091_v50 = vadd.f32 %v1223_v9, %v2998_v12  ;;  %2425 = vtanh.f32 %v1606_v34  ;;  %v3115_v5 = vmul.f32 %v1461_v43, %v3037_v54 }
 0x1a9   : > { %v1225_v46 = vpop.f32.mrf.mxu1  ;;  %v3109_v61 = vadd.f32 %v1158_v22, %v2998_v12  ;;  %v1516_v6 = vmul.f32 %v1468_v20, %v3040_v56  ;;  %v1476_v8 = vmul.f32 %v1428_v21, %v3067_v18  ;;  %v1604_v9 = vmul.f32 0.7978846, %v1556_v11 }
 0x1aa   : > { %v1160_v39 = vpop.f32.mrf.mxu0  ;;  %v1486_v51 = vmul.f32 %v1438_v38, %v3070_v19  ;;  %v1439_v59 = vmul.f32 0.044715, %v3091_v50  ;;  %v3112_v62 = vadd.f32 %v1225_v46, %v3004_v30  ;;  %3628 = vst [vmem:[#allocation13_spill] sm:$0xff] %v3115_v5  ;;  %v1614_v23 = vmul.f32 0.7978846, %v1566_v53 }
 0x1ab   : > { %v1227_v0 = vpop.f32.mrf.mxu1  ;;  %v1526_v31 = vmul.f32 %v1478_v57, %v3056_v2  ;;  %v3125_v32 = vadd.f32 %v3032_v17, %v3000_v25  ;;  %v1431_v33 = vmul.f32 0.044715, %v3106_v60  ;;  %v3132_v35 = vadd.f32 %v1154_v3, %v3002_v26 }
 0x1ac   : > { %v1162_v52 = vpop.f32.mrf.mxu0  ;;  %v1534_v14 = vmul.f32 %v1486_v51, %v3070_v19  ;;  %v1487_v48 = vmul.f32 %v1439_v59, %v3091_v50  ;;  %v1446_v15 = vmul.f32 0.044715, %v3112_v62  ;;  %v3128_v29 = vadd.f32 %v1227_v0, %v3004_v30 }
 0x1ad   : > { %v1436_v38 = vmul.f32 0.044715, %v3109_v61  ;;  %v3136_v41 = vadd.f32 %v1160_v39, %v2998_v12  ;;  %v1564_v43 = vadd.f32 %v1516_v6, %v3040_v56  ;;  %v1524_v46 = vmul.f32 %v1476_v8, %v3067_v18 }
 0x1ae   : > { %v1164_v22 = vpop.f32.mrf.mxu0  ;;  %v1447_v17 = vmul.f32 0.044715, %v3128_v29  ;;  %v1582_v20 = vadd.f32 %v1534_v14, %v3070_v19  ;;  %v1535_v21 = vmul.f32 %v1487_v48, %v3091_v50  ;;  %v1494_v3 = vmul.f32 %v1446_v15, %v3112_v62 }
 0x1af   : > { %v3142_v34 = vadd.f32 %v1164_v22, %v3004_v30  ;;  %v3148_v11 = vadd.f32 %v1162_v52, %v3004_v30  ;;  %2427 = vtanh.f32 %v1604_v9  ;;  %v1574_v39 = vadd.f32 %v1526_v31, %v3056_v2 }
 0x1b0   : > { %v1421_v51 = vmul.f32 0.044715, %v3125_v32  ;;  %v1495_v53 = vmul.f32 %v1447_v17, %v3128_v29  ;;  %v1479_v57 = vmul.f32 %v1431_v33, %v3106_v60  ;;  %v1429_v59 = vmul.f32 0.044715, %v3132_v35 }
 0x1b1   : > { %v1484_v0 = vmul.f32 %v1436_v38, %v3109_v61  ;;  %v1437_v6 = vmul.f32 0.044715, %v3136_v41  ;;  %v1612_v8 = vmul.f32 0.7978846, %v1564_v43  ;;  %v1572_v14 = vadd.f32 %v1524_v46, %v3067_v18 }
 0x1b2   : > { %v1543_v52 = vmul.f32 %v1495_v53, %v3128_v29  ;;  %v1445_v9 = vmul.f32 0.044715, %v3142_v34  ;;  %v1630_v48 = vmul.f32 0.7978846, %v1582_v20  ;;  %v1542_v15 = vmul.f32 %v1494_v3, %v3112_v62 }
 0x1b3   : > { %v1444_v22 = vmul.f32 0.044715, %v3148_v11  ;;  %v1583_v31 = vadd.f32 %v1535_v21, %v3091_v50  ;;  %2429 = vtanh.f32 %v1614_v23  ;;  %v1519_v33 = vmul.f32 %v1471_v55, %v3053_v1 }
 0x1b4   : > { %v1622_v38 = vmul.f32 0.7978846, %v1574_v39  ;;  %v1469_v17 = vmul.f32 %v1421_v51, %v3125_v32  ;;  %v1477_v43 = vmul.f32 %v1429_v59, %v3132_v35  ;;  %v1532_v46 = vmul.f32 %v1484_v0, %v3109_v61  ;;  %v3169_v27 = vpop.eup %2423 }
 0x1b5   : > { %v1485_v53 = vmul.f32 %v1437_v6, %v3136_v41  ;;  %v1591_v20 = vadd.f32 %v1543_v52, %v3128_v29  ;;  %3629 = vst [vmem:[#allocation14_spill] sm:$0xff] %v3169_v27  ;;  %2431 = vtanh.f32 %v1612_v8  ;;  %v1527_v3 = vmul.f32 %v1479_v57, %v3106_v60  ;;  %v3173_v55 = vpop.eup %2425 }
 0x1b6   : > { %v1620_v21 = vmul.f32 0.7978846, %v1572_v14  ;;  %v1493_v23 = vmul.f32 %v1445_v9, %v3142_v34  ;;  %3630 = vst [vmem:[#allocation15_spill] sm:$0xff] %v3173_v55  ;;  %2433 = vtanh.f32 %v1630_v48  ;;  %v1590_v39 = vadd.f32 %v1542_v15, %v3112_v62 }
 0x1b7   : > { %v1492_v51 = vmul.f32 %v1444_v22, %v3148_v11  ;;  %v1631_v0 = vmul.f32 0.7978846, %v1583_v31  ;;  %2435 = vtanh.f32 %v1622_v38  ;;  %v3178_v6 = vmul.f32 %v1469_v17, %v3125_v32 }
 0x1b8   : > { %v1567_v57 = vadd.f32 %v1519_v33, %v3053_v1  ;;  %v3185_v14 = vmul.f32 %v1477_v43, %v3132_v35  ;;  %v1580_v52 = vadd.f32 %v1532_v46, %v3109_v61  ;;  %v1533_v9 = vmul.f32 %v1485_v53, %v3136_v41 }
 0x1b9   : > { %v1639_v15 = vmul.f32 0.7978846, %v1591_v20  ;;  %2437 = vtanh.f32 %v1620_v21  ;;  %v1541_v22 = vmul.f32 %v1493_v23, %v3142_v34  ;;  %v1575_v38 = vadd.f32 %v1527_v3, %v3106_v60 }
 0x1ba   : > { %v1638_v17 = vmul.f32 0.7978846, %v1590_v39  ;;  %v3194_v43 = vmul.f32 0.5, %v3091_v50  ;;  %2439 = vtanh.f32 %v1631_v0  ;;  %v1615_v21 = vmul.f32 0.7978846, %v1567_v57 }
 0x1bb   : > { %v1628_v3 = vmul.f32 0.7978846, %v1580_v52  ;;  %v3206_v28 = vmul.f32 0.5, %v3128_v29  ;;  %2441 = vtanh.f32 %v1639_v15  ;;  %v1581_v50 = vadd.f32 %v1533_v9, %v3136_v41 }
 0x1bc   : > { %v3203_v23 = vpop.eup %2427  ;;  %2443 = vtanh.f32 %v1638_v17  ;;  %v3219_v15 = vmul.f32 0.5, %v3112_v62  ;;  %v3247_v27 = vmul.f32 0.5, %v3136_v41  ;;  %v3273_v56 = vmul.f32 0.5, %v3148_v11 }
 0x1bd   : > { %v1264_v59 = vpop.f32.mrf.mxu0  ;;  %3634 = vst [vmem:[#allocation19_spill] sm:$0xff] %v3203_v23  ;;  %2445 = vtanh.f32 %v1615_v21  ;;  %v1629_v62 = vmul.f32 0.7978846, %v1581_v50 }
 0x1be   : > { %v3181_v8 = vadd.f32 %v1264_v59, %v3008_v37  ;;  %v1540_v59 = vmul.f32 %v1492_v51, %v3148_v11  ;;  %2447 = vtanh.f32 %v1628_v3 }
 0x1bf   : > { %v1266_v48 = vpop.f32.mrf.mxu0 }
 0x1c0   : > { %3631 = vst [vmem:[#allocation16_spill] sm:$0xff] %v3181_v8  ;;  %v1408_v31 = vmul.f32 0.044715, %v3181_v8  ;;  %v1588_v57 = vadd.f32 %v1540_v59, %v3148_v11  ;;  %v3216_v52 = vadd.f32 %v1266_v48, %v3008_v37  ;;  %v3284_v11 = vmul.f32 0.5, %v3125_v32 }
 0x1c1   : > { %v1268_v33 = vpop.f32.mrf.mxu0  ;;  %v1327_v58 = vpop.f32.mrf.mxu1 }
 0x1c2   : > { %v1456_v46 = vmul.f32 %v1408_v31, %v3181_v8  ;;  %v3198_v53 = vadd.f32 %v1268_v33, %v3006_v36  ;;  %v3201_v20 = vadd.f32 %v1327_v58, %v3008_v37  ;;  %v3211_v31 = vmul.f32 0.5, %v3070_v19  ;;  %3635 = vst [vmem:[#allocation20_spill] sm:$0xff] %v3216_v52  ;;  %3641 = vst [vmem:[#allocation26_spill] sm:$0xff] %v3284_v11 }
 0x1c3   : > { %v1270_v39 = vpop.f32.mrf.mxu0  ;;  %v1329_v51 = vpop.f32.mrf.mxu1  ;;  %v1623_v33 = vmul.f32 0.7978846, %v1575_v38  ;;  %v1589_v58 = vadd.f32 %v1541_v22, %v3142_v34  ;;  %v1636_v3 = vmul.f32 0.7978846, %v1588_v57  ;;  %v3303_v11 = vadd.f32 %v3185_v14, %v3132_v35 }
 0x1c4   : > { %3632 = vst [vmem:[#allocation17_spill] sm:$0xff] %v3198_v53  ;;  %3633 = vst [vmem:[#allocation18_spill] sm:$0xff] %v3201_v20  ;;  %v1416_v0 = vmul.f32 0.044715, %v3198_v53  ;;  %v1504_v9 = vmul.f32 %v1456_v46, %v3181_v8  ;;  %v1410_v19 = vmul.f32 0.044715, %v3201_v20  ;;  %v3224_v38 = vpop.eup %2429  ;;  %v3227_v22 = vadd.f32 %v1270_v39, %v3006_v36 }
 0x1c5   : > { %v1274_v49 = vpop.f32.mrf.mxu0  ;;  %v1331_v29 = vpop.f32.mrf.mxu1  ;;  %2449 = vtanh.f32 %v1623_v33  ;;  %v1637_v21 = vmul.f32 0.7978846, %v1589_v58  ;;  %v1409_v39 = vmul.f32 0.044715, %v3216_v52  ;;  %v3253_v33 = vadd.f32 %v1329_v51, %v3008_v37 }
 0x1c6   : > { %v1464_v10 = vmul.f32 %v1416_v0, %v3198_v53  ;;  %3636 = vst [vmem:[#allocation21_spill] sm:$0xff] %v3227_v22  ;;  %v3230_v48 = vadd.f32 %v1274_v49, %v3000_v25  ;;  %v3235_v46 = vadd.f32 %v1331_v29, %v3006_v36  ;;  %v3238_v0 = vmul.f32 0.5, %v3053_v1  ;;  %v3240_v55 = vpop.eup %2431 }
 0x1c7   : > { %v1276_v17 = vpop.f32.mrf.mxu0  ;;  %v3232_v59 = vpop.f32.mrf.mxu1  ;;  %3639 = vst [vmem:[#allocation24_spill] sm:$0xff] %v3240_v55  ;;  %v3244_v49 = vmul.f32 0.5, %v3106_v60  ;;  %v1552_v29 = vadd.f32 %v1504_v9, %v3181_v8  ;;  %v1458_v1 = vmul.f32 %v1410_v19, %v3201_v20  ;;  %v1417_v60 = vmul.f32 0.044715, %v3227_v22 }
 0x1c8   : > { %3637 = vst [vmem:[#allocation22_spill] sm:$0xff] %v3230_v48  ;;  %3638 = vst [vmem:[#allocation23_spill] sm:$0xff] %v3235_v46  ;;  %v2434_v50 = vpop.eup %2433  ;;  %v1512_v42 = vmul.f32 %v1464_v10, %v3198_v53  ;;  %v1424_v63 = vmul.f32 0.044715, %v3230_v48  ;;  %v3260_v41 = vadd.f32 %v1276_v17, %v3000_v25  ;;  %2451 = vtanh.f32 %v1629_v62 }
 0x1c9   : > { %v1278_v58 = vpop.f32.mrf.mxu0  ;;  %v1337_v57 = vpop.f32.mrf.mxu1  ;;  %v1418_v9 = vmul.f32 0.044715, %v3235_v46  ;;  %v3264_v10 = vmul.f32 0.5, %v3142_v34  ;;  %2453 = vtanh.f32 %v1637_v21  ;;  %v3267_v37 = vmul.f32 0.5, %v3109_v61 }
 0x1ca   : > { %v3255_v23 = vpop.eup %2435  ;;  %2455 = vtanh.f32 %v1636_v3  ;;  %v1457_v19 = vmul.f32 %v1409_v39, %v3216_v52  ;;  %v1726_v8 = vadd.f32 1.0, %v2434_v50  ;;  %v1600_v62 = vmul.f32 0.7978846, %v1552_v29 }
 0x1cb   : > { %v3269_v51 = vpop.eup %2437  ;;  %v1560_v55 = vadd.f32 %v1512_v42, %v3198_v53  ;;  %v1506_v34 = vmul.f32 %v1458_v1, %v3201_v20  ;;  %v1411_v21 = vmul.f32 0.044715, %v3253_v33  ;;  %v1280_v18 = vpop.f32.mrf.mxu0  ;;  %v1472_v3 = vmul.f32 %v1424_v63, %v3230_v48 }
 0x1cc   : > { %3640 = vst [vmem:[#allocation25_spill] sm:$0xff] %v3269_v51  ;;  %v2440_v17 = vpop.eup %2439  ;;  %v3278_v61 = vpop.f32.mrf.mxu1  ;;  %v1465_v51 = vmul.f32 %v1417_v60, %v3227_v22  ;;  %v1425_v39 = vmul.f32 0.044715, %v3260_v41  ;;  %v1466_v29 = vmul.f32 %v1418_v9, %v3235_v46  ;;  %v3288_v42 = vadd.f32 %v1278_v58, %v3002_v26 }
 0x1cd   : > { %v2442_v50 = vpop.eup %2441  ;;  %v3291_v1 = vmul.f32 0.5, %v3132_v35  ;;  %v3295_v53 = vadd.f32 %v3178_v6, %v3125_v32  ;;  %v3298_v63 = vmul.f32 %v1457_v19, %v3216_v52  ;;  %v1727_v60 = vadd.f32 1.0, %v2440_v17  ;;  %v1284_v32 = vpop.f32.mrf.mxu0 }
 0x1ce   : > { %v1774_v4 = vmul.f32 %v1726_v8, %v3211_v31  ;;  %v2444_v9 = vpop.eup %2443  ;;  %2457 = vtanh.f32 %v1600_v62  ;;  %v1608_v58 = vmul.f32 0.7978846, %v1560_v55  ;;  %v1554_v44 = vadd.f32 %v1506_v34, %v3201_v20  ;;  %v1341_v6 = vpop.f32.mrf.mxu1 }
 0x1cf   : > { %3642 = vst [vmem:[#allocation27_spill] sm:$0xff] %v3291_v1  ;;  %3643 = vst [vmem:[#allocation28_spill] sm:$0xff] %v3298_v63  ;;  %v3307_v1 = vmul.f32 %v1411_v21, %v3253_v33  ;;  %v2446_v5 = vpop.eup %2445  ;;  %v3310_v19 = vmul.f32 %v1465_v51, %v3227_v22  ;;  %v1520_v8 = vmul.f32 %v1472_v3, %v3230_v48  ;;  %v1735_v35 = vadd.f32 1.0, %v2442_v50 }
 0x1d0   : > { %v1473_v31 = vmul.f32 %v1425_v39, %v3260_v41  ;;  %v2448_v14 = vpop.eup %2447  ;;  %v1514_v17 = vmul.f32 %v1466_v29, %v3235_v46  ;;  %v3317_v55 = vadd.f32 %v3232_v59, %v3006_v36  ;;  %v1432_v62 = vmul.f32 0.044715, %v3288_v42 }
 0x1d1   : > { %3644 = vst [vmem:[#allocation29_spill] sm:$0xff] %v3310_v19  ;;  %v3321_v34 = vadd.f32 %v1337_v57, %v3000_v25  ;;  %v1775_v51 = vmul.f32 %v1727_v60, %v3194_v43  ;;  %v1783_v3 = vmul.f32 %v1735_v35, %v3206_v28  ;;  %v3326_v39 = vadd.f32 %v1284_v32, %v2998_v12  ;;  %v3347_v35 = vpop.f32.mrf.mxu1 }
 0x1d2   : > { %v2450_v21 = vpop.eup %2449  ;;  %v3329_v50 = vadd.f32 %v1341_v6, %v3002_v26  ;;  %2459 = vtanh.f32 %v1608_v58  ;;  %v1602_v29 = vmul.f32 0.7978846, %v1554_v44  ;;  %v1734_v36 = vadd.f32 1.0, %v2444_v9  ;;  %v1286_v9 = vpop.f32.mrf.mxu0 }
 0x1d3   : > { %v1711_v59 = vadd.f32 1.0, %v2446_v5  ;;  %v1568_v20 = vadd.f32 %v1520_v8, %v3230_v48  ;;  %v3333_v57 = vmul.f32 %v1473_v31, %v3260_v41  ;;  %v3336_v19 = vadd.f32 %v1280_v18, %v3002_v26 }
 0x1d4   : > { %v1809_v43 = vpack.c.bf16 %v1783_v3, %v1775_v51  ;;  %v1562_v60 = vadd.f32 %v1514_v17, %v3235_v46  ;;  %v3340_v32 = vmul.f32 0.044715, %v3317_v55  ;;  %v1782_v58 = vmul.f32 %v1734_v36, %v3219_v15  ;;  %v1288_v52 = vpop.f32.mrf.mxu0 }
 0x1d5   : > { %v2452_v28 = vpop.eup %2451  ;;  %v1719_v44 = vadd.f32 1.0, %v2450_v21  ;;  %v1480_v6 = vmul.f32 %v1432_v62, %v3288_v42  ;;  %v1426_v8 = vmul.f32 0.044715, %v3321_v34  ;;  %v1440_v18 = vmul.f32 0.044715, %v3326_v39 }
 0x1d6   : > { %v2454_v5 = vpop.eup %2453  ;;  %1888 = vmatprep.subr.bf16.mxu1 %v1809_v43  ;;  %v1434_v31 = vmul.f32 0.044715, %v3329_v50  ;;  %2461 = vtanh.f32 %v1602_v29  ;;  %v1808_v51 = vpack.c.bf16 %v1782_v58, %v1774_v4  ;;  %v1759_v3 = vmul.f32 %v1711_v59, %v3238_v0  ;;  %v1347_v29 = vpop.f32.mrf.mxu1 }
 0x1d7   : > { %v2456_v17 = vpop.eup %2455  ;;  %v1767_v15 = vmul.f32 %v1719_v44, %v3244_v49  ;;  %v1616_v21 = vmul.f32 0.7978846, %v1568_v20  ;;  %v1433_v36 = vmul.f32 0.044715, %v3336_v19  ;;  %v3354_v62 = vadd.f32 %v3278_v61, %v3000_v25 }
 0x1d8   : > { %v1725_v43 = vadd.f32 1.0, %v2452_v28  ;;  %v1610_v46 = vmul.f32 0.7978846, %v1562_v60  ;;  %1889 = vmatpush1.bf16.msra.mxu1 %v1808_v51  ;;  %v1733_v22 = vadd.f32 1.0, %v2454_v5  ;;  %v1724_v63 = vadd.f32 1.0, %v2448_v14 }
 0x1d9   : > { %v1801_v48 = vpack.c.bf16 %v1767_v15, %v1759_v3  ;;  %v1528_v4 = vmul.f32 %v1480_v6, %v3288_v42  ;;  %v1474_v0 = vmul.f32 %v1426_v8, %v3321_v34  ;;  %v1488_v49 = vmul.f32 %v1440_v18, %v3326_v39  ;;  %v1349_v3 = vpop.f32.mrf.mxu1 }
 0x1da   : > { %v1482_v20 = vmul.f32 %v1434_v31, %v3329_v50  ;;  %v3361_v25 = vadd.f32 %v1286_v9, %v2998_v12  ;;  %v1773_v61 = vmul.f32 %v1725_v43, %v3247_v27  ;;  %v1781_v59 = vmul.f32 %v1733_v22, %v3264_v10 }
 0x1db   : > { %1890 = vmatprep.subr.bf16.mxu1 %v1801_v48  ;;  %v1732_v28 = vadd.f32 1.0, %v2456_v17  ;;  %v3365_v14 = vpop.eup %2457  ;;  %2463 = vtanh.f32 %v1616_v21  ;;  %v1481_v60 = vmul.f32 %v1433_v36, %v3336_v19  ;;  %v1427_v58 = vmul.f32 0.044715, %v3354_v62 }
 0x1dc   : > { %v3370_v44 = vadd.f32 %v1288_v52, %v3004_v30  ;;  %v1807_v5 = vpack.c.bf16 %v1781_v59, %v1773_v61  ;;  %v1772_v48 = vmul.f32 %v1724_v63, %v3267_v37  ;;  %v3375_v27 = vadd.f32 %v1347_v29, %v2998_v12 }
 0x1dd   : > { %v1780_v9 = vmul.f32 %v1732_v28, %v3273_v56  ;;  %v1576_v22 = vadd.f32 %v1528_v4, %v3288_v42  ;;  %v1613_v6 = vmul.f32 0.7978846, %v3295_v53  ;;  %v1621_v8 = vmul.f32 0.7978846, %v3303_v11  ;;  %v1290_v53 = vpop.f32.mrf.mxu0 }
 0x1de   : > { %v1448_v10 = vmul.f32 0.044715, %v3370_v44  ;;  %v1536_v18 = vmul.f32 %v1488_v49, %v3326_v39  ;;  %v1530_v52 = vmul.f32 %v1482_v20, %v3329_v50  ;;  %v1441_v31 = vmul.f32 0.044715, %v3361_v25  ;;  %1845 = vmatprep.subr.bf16.mxu0 %v1807_v5 }
 0x1df   : > { %v1806_v37 = vpack.c.bf16 %v1780_v9, %v1772_v48  ;;  %v3384_v56 = vpop.eup %2459  ;;  %v1442_v17 = vmul.f32 0.044715, %v3375_v27  ;;  %2465 = vtanh.f32 %v1613_v6  ;;  %v1710_v51 = vadd.f32 1.0, %v3224_v38 }
 0x1e0   : > { %v1496_v63 = vmul.f32 %v1448_v10, %v3370_v44  ;;  %2467 = vtanh.f32 %v1621_v8  ;;  %v1374_v11 = vmul.f32 0.5, %v3019_v45  ;;  %v1382_v15 = vmul.f32 0.5, %v3056_v2 }
 0x1e1   : > { %1846 = vmatpush1.bf16.msra.mxu0 %v1806_v37  ;;  %v1718_v21 = vadd.f32 1.0, %v3255_v23  ;;  %2469 = vtanh.f32 %v1610_v46  ;;  %v1624_v36 = vmul.f32 0.7978846, %v1576_v22  ;;  %v1551_v43 = vadd.f32 %v3082_v40, %v3022_v47  ;;  %v1351_v40 = vpop.f32.mrf.mxu1 }
 0x1e2   : > { %v1559_v4 = vadd.f32 %v3097_v13, %v3028_v16  ;;  %v1544_v38 = vmul.f32 %v1496_v63, %v3370_v44  ;;  %v1758_v49 = vmul.f32 %v1710_v51, %v1374_v11  ;;  %v3398_v29 = vadd.f32 %v1290_v53, %v3004_v30  ;;  %v3645_v63 = vld [vmem:[#allocation13_spill] sm:$0xff]  ;;  %v3647_v11 = vld [vmem:[#allocation8_spill] sm:$0xff] }
 0x1e3   : > { %v1766_v20 = vmul.f32 %v1718_v21, %v1382_v15  ;;  %v3400_v45 = vpop.eup %2461  ;;  %v1584_v2 = vadd.f32 %v1536_v18, %v3326_v39  ;;  %v3405_v23 = vadd.f32 %v3347_v35, %v3002_v26  ;;  %v1599_v46 = vmul.f32 0.7978846, %v1551_v43 }
 0x1e4   : > { %v1607_v47 = vmul.f32 0.7978846, %v1559_v4  ;;  %v1578_v13 = vadd.f32 %v1530_v52, %v3329_v50  ;;  %v1489_v61 = vmul.f32 %v1441_v31, %v3361_v25  ;;  %v1490_v59 = vmul.f32 %v1442_v17, %v3375_v27 }
 0x1e5   : > { %v1800_v28 = vpack.c.bf16 %v1766_v20, %v1758_v49  ;;  %v3412_v5 = vmul.f32 %v3340_v32, %v3317_v55  ;;  %v3415_v48 = vmul.f32 %v1474_v0, %v3321_v34  ;;  %2471 = vtanh.f32 %v1599_v46 }
 0x1e6   : > { %v3418_v26 = vadd.f32 %v1349_v3, %v2998_v12  ;;  %v3421_v35 = vmul.f32 %v1481_v60, %v3336_v19  ;;  %v1592_v9 = vadd.f32 %v1544_v38, %v3370_v44  ;;  %2473 = vtanh.f32 %v1607_v47  ;;  %v1353_v12 = vpop.f32.mrf.mxu1  ;;  %v3646_v3 = vld [vmem:[#allocation4_spill] sm:$0xff] }
 0x1e7   : > { %1891 = vmatpush1.bf16.msra.mxu1 %v1800_v28  ;;  %v1449_v22 = vmul.f32 0.044715, %v3398_v29  ;;  %2475 = vtanh.f32 %v1624_v36  ;;  %v3426_v32 = vmul.f32 %v1427_v58, %v3354_v62  ;;  %v3429_v0 = vmul.f32 0.044715, %v3405_v23  ;;  %v3648_v36 = vld [vmem:[#allocation25_spill] sm:$0xff] }
 0x1e8   : > { %v3432_v10 = vadd.f32 %v1351_v40, %v3004_v30  ;;  %v3434_v6 = vpop.eup %2463  ;;  %v1632_v60 = vmul.f32 0.7978846, %v1584_v2  ;;  %v1626_v8 = vmul.f32 0.7978846, %v1578_v13  ;;  %v1537_v18 = vmul.f32 %v1489_v61, %v3361_v25  ;;  %v3650_v2 = vld [vmem:[#allocation24_spill] sm:$0xff] }
 0x1e9   : > { %v1538_v52 = vmul.f32 %v1490_v59, %v3375_v27  ;;  %v1443_v31 = vmul.f32 0.044715, %v3418_v26  ;;  %v1549_v37 = vadd.f32 %v3094_v24, %v3025_v7  ;;  %v1557_v17 = vadd.f32 %v3645_v63, %v3037_v54  ;;  %v3649_v7 = vld [vmem:[#allocation10_spill] sm:$0xff] }
 0x1ea   : > { %v1450_v58 = vmul.f32 0.044715, %v3432_v10  ;;  %v1640_v51 = vmul.f32 0.7978846, %v1592_v9  ;;  %v1497_v53 = vmul.f32 %v1449_v22, %v3398_v29  ;;  %v1502_v15 = vmul.f32 %v3647_v11, %v3646_v3 }
 0x1eb   : > { %v3448_v21 = vadd.f32 %v1353_v12, %v3004_v30  ;;  %v1716_v43 = vadd.f32 1.0, %v3648_v36  ;;  %v1597_v38 = vmul.f32 0.7978846, %v1549_v37  ;;  %v1605_v49 = vmul.f32 0.7978846, %v1557_v17 }
 0x1ec   : > { %v1498_v4 = vmul.f32 %v1450_v58, %v3432_v10  ;;  %v2466_v20 = vpop.eup %2465  ;;  %v1380_v24 = vmul.f32 0.5, %v3649_v7  ;;  %v1708_v46 = vadd.f32 1.0, %v3650_v2  ;;  %v1550_v47 = vadd.f32 %v1502_v15, %v3646_v3  ;;  %v3651_v58 = vld [vmem:[#allocation5_spill] sm:$0xff]  ;;  %v3652_v3 = vld [vmem:[#allocation26_spill] sm:$0xff]  ;;  %v3653_v15 = vld [vmem:[#allocation27_spill] sm:$0xff] }
 0x1ed   : > { %v1451_v40 = vmul.f32 0.044715, %v3448_v21  ;;  %v2468_v13 = vpop.eup %2467  ;;  %v1709_v61 = vadd.f32 1.0, %v2466_v20  ;;  %v1491_v30 = vmul.f32 %v1443_v31, %v3418_v26  ;;  %2477 = vtanh.f32 %v1597_v38 }
 0x1ee   : > { %v1546_v59 = vmul.f32 %v1498_v4, %v3432_v10  ;;  %v3458_v28 = vpop.eup %2469  ;;  %v1717_v9 = vadd.f32 1.0, %v2468_v13  ;;  %v1545_v22 = vmul.f32 %v1497_v53, %v3398_v29  ;;  %2479 = vtanh.f32 %v1605_v49 }
 0x1ef   : > { %v1598_v12 = vmul.f32 0.7978846, %v1550_v47  ;;  %2481 = vtanh.f32 %v1640_v51  ;;  %v1372_v37 = vmul.f32 0.5, %v3651_v58  ;;  %v1764_v63 = vmul.f32 %v1716_v43, %v1380_v24  ;;  %v3655_v58 = vld [vmem:[#allocation19_spill] sm:$0xff] }
 0x1f0   : > { %v1594_v17 = vadd.f32 %v1546_v59, %v3432_v10  ;;  %v1757_v11 = vmul.f32 %v1709_v61, %v3652_v3  ;;  %v1765_v31 = vmul.f32 %v1717_v9, %v3653_v15  ;;  %v1499_v36 = vmul.f32 %v1451_v40, %v3448_v21  ;;  %v3656_v15 = vld [vmem:[#allocation3_spill] sm:$0xff] }
 0x1f1   : > { %2483 = vtanh.f32 %v1598_v12  ;;  %v1586_v4 = vadd.f32 %v1538_v52, %v3375_v27  ;;  %v1756_v38 = vmul.f32 %v1708_v46, %v1372_v37  ;;  %v1585_v53 = vadd.f32 %v1537_v18, %v3361_v25 }
 0x1f2   : > { %2485 = vtanh.f32 %v1632_v60  ;;  %v2472_v49 = vpop.eup %2471  ;;  %v1799_v51 = vpack.c.bf16 %v1765_v31, %v1757_v11  ;;  %v1539_v43 = vmul.f32 %v1491_v30, %v3418_v26  ;;  %v1593_v20 = vadd.f32 %v1545_v22, %v3398_v29  ;;  %v3654_v30 = vld [vmem:[#allocation7_spill] sm:$0xff] }
 0x1f3   : > { %2487 = vtanh.f32 %v1626_v8  ;;  %v2474_v7 = vpop.eup %2473  ;;  %v1695_v24 = vadd.f32 1.0, %v2472_v49  ;;  %v1798_v2 = vpack.c.bf16 %v1764_v63, %v1756_v38  ;;  %v1642_v47 = vmul.f32 0.7978846, %v1594_v17  ;;  %v3658_v38 = vld [vmem:[#allocation15_spill] sm:$0xff] }
 0x1f4   : > { %v1633_v13 = vmul.f32 0.7978846, %v1585_v53  ;;  %v3470_v61 = vpop.eup %2475  ;;  %1847 = vmatprep.subr.bf16.mxu0 %v1799_v51  ;;  %v1367_v60 = vmul.f32 0.5, %v3028_v16  ;;  %v1703_v52 = vadd.f32 1.0, %v2474_v7  ;;  %v1547_v18 = vmul.f32 %v1499_v36, %v3448_v21 }
 0x1f5   : > { %v1641_v46 = vmul.f32 0.7978846, %v1593_v20  ;;  %v1570_v8 = vadd.f32 %v3415_v48, %v3321_v34  ;;  %v1634_v40 = vmul.f32 0.7978846, %v1586_v4  ;;  %v1743_v59 = vmul.f32 %v1695_v24, %v3654_v30  ;;  %1848 = vmatpush1.bf16.msra.mxu0 %v1798_v2 }
 0x1f6   : > { %2489 = vtanh.f32 %v1633_v13  ;;  %v1751_v9 = vmul.f32 %v1703_v52, %v1367_v60  ;;  %v1569_v22 = vadd.f32 %v3333_v57, %v3260_v41  ;;  %v1577_v16 = vadd.f32 %v3421_v35, %v3336_v19  ;;  %v3657_v57 = vld [vmem:[#allocation14_spill] sm:$0xff] }
 0x1f7   : > { %2491 = vtanh.f32 %v1641_v46  ;;  %v1483_v12 = vmul.f32 %v3429_v0, %v3405_v23  ;;  %v1700_v37 = vadd.f32 1.0, %v3655_v58  ;;  %v1587_v48 = vadd.f32 %v1539_v43, %v3418_v26 }
 0x1f8   : > { %2493 = vtanh.f32 %v1642_v47  ;;  %v1793_v63 = vpack.c.bf16 %v1751_v9, %v1743_v59  ;;  %v1617_v17 = vmul.f32 0.7978846, %v1569_v22  ;;  %v1625_v3 = vmul.f32 0.7978846, %v1577_v16  ;;  %v3661_v22 = vld [vmem:[#allocation11_spill] sm:$0xff] }
 0x1f9   : > { %v1595_v11 = vadd.f32 %v1547_v18, %v3448_v21  ;;  %2495 = vtanh.f32 %v1634_v40  ;;  %v1364_v31 = vmul.f32 0.5, %v3656_v15  ;;  %v1692_v36 = vadd.f32 1.0, %v3657_v57  ;;  %v3659_v18 = vld [vmem:[#allocation9_spill] sm:$0xff]  ;;  %v3660_v40 = vld [vmem:[#allocation12_spill] sm:$0xff] }
 0x1fa   : > { %v1635_v4 = vmul.f32 0.7978846, %v1587_v48  ;;  %v2478_v35 = vpop.eup %2477  ;;  %v3490_v0 = vmul.f32 %v3307_v1, %v3253_v33  ;;  %1892 = vmatprep.subr.bf16.mxu1 %v1793_v63  ;;  %v1702_v53 = vadd.f32 1.0, %v3658_v38  ;;  %2497 = vtanh.f32 %v1617_v17  ;;  %v3663_v48 = vld [vmem:[#allocation28_spill] sm:$0xff]  ;;  %v3665_v17 = vld [vmem:[#allocation29_spill] sm:$0xff] }
 0x1fb   : > { %v1643_v49 = vmul.f32 0.7978846, %v1595_v11  ;;  %v2480_v51 = vpop.eup %2479  ;;  %v3495_v43 = vmul.f32 %v3412_v5, %v3317_v55  ;;  %v1693_v20 = vadd.f32 1.0, %v2478_v35  ;;  %v1748_v7 = vmul.f32 %v1700_v37, %v1364_v31  ;;  %v3662_v37 = vld [vmem:[#allocation20_spill] sm:$0xff]  ;;  %v3666_v11 = vld [vmem:[#allocation6_spill] sm:$0xff] }
 0x1fc   : > { %2499 = vtanh.f32 %v1625_v3  ;;  %v2482_v24 = vpop.eup %2481  ;;  %v1523_v2 = vmul.f32 %v3426_v32, %v3354_v62  ;;  %v1365_v1 = vmul.f32 0.5, %v3037_v54  ;;  %v1701_v47 = vadd.f32 1.0, %v2480_v51 }
 0x1fd   : > { %2501 = vtanh.f32 %v1635_v4  ;;  %v1618_v60 = vmul.f32 0.7978846, %v1570_v8  ;;  %v1531_v52 = vmul.f32 %v1483_v12, %v3405_v23  ;;  %v1740_v46 = vmul.f32 %v1692_v36, %v3659_v18  ;;  %v3664_v8 = vld [vmem:[#allocation21_spill] sm:$0xff] }
 0x1fe   : > { %v2484_v13 = vpop.eup %2483  ;;  %2503 = vtanh.f32 %v1643_v49  ;;  %v1741_v30 = vmul.f32 %v1693_v20, %v3660_v40  ;;  %v1749_v59 = vmul.f32 %v1701_v47, %v1365_v1  ;;  %v1750_v16 = vmul.f32 %v1702_v53, %v3661_v22 }
 0x1ff   : > { %v2486_v5 = vpop.eup %2485  ;;  %v1694_v9 = vadd.f32 1.0, %v2484_v13  ;;  %v1790_v54 = vpack.c.bf16 %v1748_v7, %v1740_v46  ;;  %v1736_v58 = vadd.f32 1.0, %v2482_v24  ;;  %v1553_v63 = vadd.f32 %v3663_v48, %v3662_v37 }
 0x200   : > { %v3504_v32 = vpop.eup %2487  ;;  %v1561_v12 = vadd.f32 %v3665_v17, %v3664_v8  ;;  %v1791_v3 = vpack.c.bf16 %v1749_v59, %v1741_v30  ;;  %v1400_v31 = vmul.f32 0.5, %v3370_v44  ;;  %v1571_v57 = vadd.f32 %v1523_v2, %v3354_v62  ;;  %v3518_v44 = vld [vmem:[%s3596_s4] sm:$0xff]  }
 0x201   : > { %v1742_v15 = vmul.f32 %v1694_v9, %v3666_v11  ;;  %v1728_v36 = vadd.f32 1.0, %v2486_v5  ;;  %v1601_v4 = vmul.f32 0.7978846, %v1553_v63  ;;  %v1579_v38 = vadd.f32 %v1531_v52, %v3405_v23 }
 0x202   : > { %v1609_v35 = vmul.f32 0.7978846, %v1561_v12  ;;  %2505 = vtanh.f32 %v1618_v60  ;;  %1849 = vmatprep.subr.bf16.mxu0 %v1791_v3  ;;  %v1392_v51 = vmul.f32 0.5, %v3326_v39  ;;  %v1619_v20 = vmul.f32 0.7978846, %v1571_v57  ;;  %v3668_v12 = vld [vmem:[#allocation22_spill] sm:$0xff] }
 0x203   : > { %v2490_v53 = vpop.eup %2489  ;;  %v1792_v49 = vpack.c.bf16 %v1750_v16, %v1742_v15  ;;  %1850 = vmatpush1.bf16.msra.mxu0 %v1790_v54  ;;  %v1784_v2 = vmul.f32 %v1736_v58, %v1400_v31  ;;  %2507 = vtanh.f32 %v1601_v4  ;;  %v1627_v1 = vmul.f32 0.7978846, %v1579_v38 }
 0x204   : > { %v2492_v7 = vpop.eup %2491  ;;  %v1729_v24 = vadd.f32 1.0, %v2490_v53  ;;  %v1393_v13 = vmul.f32 0.5, %v3361_v25  ;;  %v1401_v60 = vmul.f32 0.5, %v3398_v29  ;;  %2509 = vtanh.f32 %v1609_v35 }
 0x205   : > { %v2494_v47 = vpop.eup %2493  ;;  %1893 = vmatpush1.bf16.msra.mxu1 %v1792_v49  ;;  %v1737_v52 = vadd.f32 1.0, %v2492_v7  ;;  %v1776_v39 = vmul.f32 %v1728_v36, %v1392_v51  ;;  %v1377_v18 = vmul.f32 0.5, %v3260_v41  ;;  %v1385_v46 = vmul.f32 0.5, %v3336_v19 }
 0x206   : > { %2511 = vtanh.f32 %v1619_v20  ;;  %v2496_v5 = vpop.eup %2495  ;;  %2314 = vmatmul.mubr.msk.bf16.vlgmr.msra.gmra.mxu0 %vm1831_vm4, %v3518_v44  ;;  %v1777_v40 = vmul.f32 %v1729_v24, %v1393_v13  ;;  %v1720_v59 = vadd.f32 1.0, %v3470_v61  ;;  %v1395_v9 = vmul.f32 0.5, %v3418_v26 }
 0x207   : > { %v1785_v30 = vmul.f32 %v1737_v52, %v1401_v60  ;;  %2513 = vtanh.f32 %v1627_v1  ;;  %v2498_v25 = vpop.eup %2497  ;;  %v1810_v29 = vpack.c.bf16 %v1784_v2, %v1776_v39  ;;  %v1403_v41 = vmul.f32 0.5, %v3448_v21  ;;  %v3669_v39 = vld [vmem:[#allocation17_spill] sm:$0xff] }
 0x208   : > { %2315 = vmatmul.mubr.msk.bf16.vlgmr.msra.gmra.mxu1 %vm1831_vm4, %v3518_v44  ;;  %v1384_v19 = vmul.f32 0.5, %v3288_v42  ;;  %v3667_v22 = vmov 0   ;;  %v1713_v58 = vadd.f32 1.0, %v2498_v25  ;;  %v1712_v48 = vadd.f32 1.0, %v3434_v6  ;;  %v3670_v25 = vld [vmem:[#allocation16_spill] sm:$0xff] }
 0x209   : > { %1953 = vmatprep.mubr.bf16.mxu0 %v3667_v22  ;;  %v2500_v16 = vpop.eup %2499  ;;  %v1811_v54 = vpack.c.bf16 %v1785_v30, %v1777_v40  ;;  %v1738_v61 = vadd.f32 1.0, %v2494_v47  ;;  %1996 = vmatprep.mubr.bf16.mxu1 %v3667_v22  ;;  %v1376_v3 = vmul.f32 0.5, %v3668_v12  ;;  %v1402_v26 = vmul.f32 0.5, %v3432_v10 }
 0x20a   : > { %v2502_v63 = vpop.eup %2501  ;;  %v1721_v17 = vadd.f32 1.0, %v2500_v16  ;;  %v1555_v21 = vadd.f32 %v3490_v0, %v3253_v33  ;;  %v1768_v15 = vmul.f32 %v1720_v59, %v1384_v19  ;;  %v1730_v31 = vadd.f32 1.0, %v2496_v5 }
 0x20b   : > { %v2504_v42 = vpop.eup %2503  ;;  %1931 = vmatprep.subr.bf16.mxu0 %v1811_v54  ;;  %v1731_v11 = vadd.f32 1.0, %v2502_v63  ;;  %v1563_v6 = vadd.f32 %v3495_v43, %v3317_v55  ;;  %v1761_v57 = vmul.f32 %v1713_v58, %v1377_v18  ;;  %v1760_v38 = vmul.f32 %v1712_v48, %v1376_v3 }
 0x20c   : > { %1932 = vmatpush1.bf16.msra.mxu0 %v1810_v29  ;;  %v1769_v36 = vmul.f32 %v1721_v17, %v1385_v46  ;;  %v1739_v4 = vadd.f32 1.0, %v2504_v42  ;;  %v1603_v35 = vmul.f32 0.7978846, %v1555_v21  ;;  %v1394_v53 = vmul.f32 0.5, %v3375_v27 }
 0x20d   : > { %v1786_v10 = vmul.f32 %v1738_v61, %v1402_v26  ;;  %v1611_v49 = vmul.f32 0.7978846, %v1563_v6  ;;  %v1779_v0 = vmul.f32 %v1731_v11, %v1395_v9  ;;  %v1802_v7 = vpack.c.bf16 %v1768_v15, %v1760_v38  ;;  %v3671_v11 = vld [vmem:[#allocation23_spill] sm:$0xff] }
 0x20e   : > { %v1803_v51 = vpack.c.bf16 %v1769_v36, %v1761_v57  ;;  %v1787_v20 = vmul.f32 %v1739_v4, %v1403_v41  ;;  %2515 = vtanh.f32 %v1603_v35  ;;  %v1778_v24 = vmul.f32 %v1730_v31, %v1394_v53  ;;  %v3672_v36 = vld [vmem:[#allocation18_spill] sm:$0xff] }
 0x20f   : > { %2517 = vtanh.f32 %v1611_v49  ;;  %v2506_v2 = vpop.eup %2505  ;;  %v1704_v1 = vadd.f32 1.0, %v3384_v56  ;;  %v1361_v60 = vmul.f32 0.5, %v3662_v37  ;;  %v1368_v18 = vmul.f32 0.5, %v3669_v39 }
 0x210   : > { %1933 = vmatprep.subr.bf16.mxu0 %v1803_v51  ;;  %v1813_v43 = vpack.c.bf16 %v1787_v20, %v1779_v0  ;;  %v2508_v47 = vpop.eup %2507  ;;  %v1812_v13 = vpack.c.bf16 %v1786_v10, %v1778_v24  ;;  %v1696_v46 = vadd.f32 1.0, %v3365_v14  ;;  %v1722_v5 = vadd.f32 1.0, %v3504_v32 }
 0x211   : > { %1934 = vmatpush1.bf16.msra.mxu0 %v1802_v7  ;;  %v2510_v27 = vpop.eup %2509  ;;  %v1697_v52 = vadd.f32 1.0, %v2508_v47  ;;  %v1369_v30 = vmul.f32 0.5, %v3664_v8  ;;  %v1379_v56 = vmul.f32 0.5, %v3354_v62  ;;  %v1360_v29 = vmul.f32 0.5, %v3670_v25  ;;  %v1824_v47 = vpop.permute.xlu1 %1823 }
 0x212   : > { %1974 = vmatprep.subr.bf16.mxu1 %v1813_v43  ;;  %v1705_v59 = vadd.f32 1.0, %v2510_v27  ;;  %v1752_v41 = vmul.f32 %v1704_v1, %v1368_v18  ;;  %v1386_v19 = vmul.f32 0.5, %v3329_v50  ;;  %v1714_v22 = vadd.f32 1.0, %v2506_v2 }
 0x213   : > { %v2512_v40 = vpop.eup %2511  ;;  %1975 = vmatpush1.bf16.msra.mxu1 %v1812_v13  ;;  %v1745_v16 = vmul.f32 %v1697_v52, %v1361_v60  ;;  %v1387_v14 = vmul.f32 0.5, %v3405_v23  ;;  %v1744_v58 = vmul.f32 %v1696_v46, %v1360_v29  ;;  %v1378_v48 = vmul.f32 0.5, %v3321_v34 }
 0x214   : > { %v2514_v9 = vpop.eup %2513  ;;  %v1715_v37 = vadd.f32 1.0, %v2512_v40  ;;  %v1753_v54 = vmul.f32 %v1705_v59, %v1369_v30  ;;  %v1770_v8 = vmul.f32 %v1722_v5, %v1386_v19  ;;  %v1706_v50 = vadd.f32 1.0, %v3458_v28 }
 0x215   : > { %v1723_v32 = vadd.f32 1.0, %v2514_v9  ;;  %v1794_v17 = vpack.c.bf16 %v1752_v41, %v1744_v58  ;;  %v1762_v12 = vmul.f32 %v1714_v22, %v1378_v48  ;;  %v1370_v15 = vmul.f32 0.5, %v3671_v11 }
 0x216   : > { %v1795_v61 = vpack.c.bf16 %v1753_v54, %v1745_v16  ;;  %v1763_v63 = vmul.f32 %v1715_v37, %v1379_v56  ;;  %v1698_v34 = vadd.f32 1.0, %v3400_v45  ;;  %v1363_v31 = vmul.f32 0.5, %v3253_v33 }
 0x217   : > { %v1771_v62 = vmul.f32 %v1723_v32, %v1387_v14  ;;  %v1804_v26 = vpack.c.bf16 %v1770_v8, %v1762_v12  ;;  %v1371_v6 = vmul.f32 0.5, %v3317_v55  ;;  %v1362_v28 = vmul.f32 0.5, %v3672_v36  ;;  %v1819_v55 = vpop.permute.xlu0 %1818 }
 0x218   : > { %1935 = vmatprep.subr.bf16.mxu0 %v1795_v61  ;;  %v1754_v4 = vmul.f32 %v1706_v50, %v1370_v15 }
 0x219   : > { %v1805_v3 = vpack.c.bf16 %v1771_v62, %v1763_v63  ;;  %1936 = vmatpush1.bf16.msra.mxu0 %v1794_v17  ;;  %v1746_v53 = vmul.f32 %v1698_v34, %v1362_v28 }
 0x21b   : > { %v2516_v21 = vpop.eup %2515  ;;  %1976 = vmatprep.subr.bf16.mxu1 %v1805_v3  ;;  %v1796_v49 = vpack.c.bf16 %v1754_v4, %v1746_v53 }
 0x21c   : > { %v2518_v42 = vpop.eup %2517  ;;  %1977 = vmatpush1.bf16.msra.mxu1 %v1804_v26  ;;  %v1699_v23 = vadd.f32 1.0, %v2516_v21  ;;  %2316 = vmatmul.mubr.msk.bf16.vlgmr.msra.gmra.mxu0 %vm1831_vm4, %v3518_v44 }
 0x21d   : > { %v1707_v57 = vadd.f32 1.0, %v2518_v42 }
 0x21e   : > { %v1747_v35 = vmul.f32 %v1699_v23, %v1363_v31 }
 0x21f   : > { %v1755_v38 = vmul.f32 %v1707_v57, %v1371_v6 }
 0x221   : > { %v1797_v10 = vpack.c.bf16 %v1755_v38, %v1747_v35 }
 0x223   : > { %1978 = vmatprep.subr.bf16.mxu1 %v1797_v10 }
 0x224   : > { %1979 = vmatpush1.bf16.msra.mxu1 %v1796_v49 }
 0x227   : > { %2317 = vmatmul.mubr.msk.bf16.vlgmr.msra.gmra.mxu1 %vm1831_vm4, %v3518_v44 }
 0x2c6   : > { %v1869_v33 = vpop.f32.mrf.mxu0 }
 0x2c7   : > { %v1870_v20 = vadd.f32 %v1869_v33, %v1819_v55 }
 0x2c8   : > { %v1912_v45 = vpop.f32.mrf.mxu1  ;;  %v1871_v51 = vpop.f32.mrf.mxu0 }
 0x2c9   : > { %v1872_v7 = vadd.f32 %v1871_v51, %v1819_v55  ;;  %v1913_v24 = vadd.f32 %v1912_v45, %v1819_v55 }
 0x2ca   : > { %v1914_v0 = vpop.f32.mrf.mxu1  ;;  %v1873_v43 = vpop.f32.mrf.mxu0 }
 0x2cb   : > { %v1915_v2 = vadd.f32 %v1914_v0, %v1819_v55  ;;  %v2330_v1 = vpack.c.bf16 %v1872_v7, %v1870_v20  ;;  %v1874_v52 = vadd.f32 %v1873_v43, %v1824_v47 }
 0x2cc   : > { %v1916_v44 = vpop.f32.mrf.mxu1  ;;  %v1875_v60 = vpop.f32.mrf.mxu0 }
 0x2cd   : > { %v2331_v13 = vpack.c.bf16 %v1915_v2, %v1913_v24  ;;  %2055 = vst [vmem:[%s3567_s20] sm:$0xff] %v2330_v1  ;;  %v1876_v39 = vadd.f32 %v1875_v60, %v1824_v47  ;;  %v1917_v18 = vadd.f32 %v1916_v44, %v1824_v47 }
 0x2ce   : > { %v1918_v27 = vpop.f32.mrf.mxu1 }
 0x2cf   : > { %2056 = vst [vmem:[%s3567_s20 + $0x8] sm:$0xff] %v2331_v13  ;;  %v1919_v46 = vadd.f32 %v1918_v27, %v1824_v47  ;;  %v2334_v5 = vpack.c.bf16 %v1876_v39, %v1874_v52 }
 0x2d1   : > { %v2335_v40 = vpack.c.bf16 %v1919_v46, %v1917_v18  ;;  %2059 = vst [vmem:[%s3567_s20 + $0x20] sm:$0xff] %v2334_v5 }
 0x2d3   : > { %2060 = vst [vmem:[%s3567_s20 + $0x28] sm:$0xff] %v2335_v40 }
 0x2dc   : > { %v1955_v30 = vpop.f32.mrf.mxu0 }
 0x2dd   : > { %v1956_v56 = vadd.f32 %v1955_v30, %v1819_v55 }
 0x2de   : > { %v1957_v59 = vpop.f32.mrf.mxu0 }
 0x2df   : > { %v1958_v25 = vadd.f32 %v1957_v59, %v1819_v55 }
 0x2e0   : > { %v1959_v29 = vpop.f32.mrf.mxu0 }
 0x2e1   : > { %v2332_v9 = vpack.c.bf16 %v1958_v25, %v1956_v56  ;;  %v1960_v41 = vadd.f32 %v1959_v29, %v1824_v47 }
 0x2e2   : > { %v1961_v37 = vpop.f32.mrf.mxu0 }
 0x2e3   : > { %2057 = vst [vmem:[%s3567_s20 + $0x10] sm:$0xff] %v2332_v9  ;;  %v1962_v19 = vadd.f32 %v1961_v37, %v1824_v47 }
 0x2e5   : > { %v2336_v22 = vpack.c.bf16 %v1962_v19, %v1960_v41 }
 0x2e7   : > { %v1998_v16 = vpop.f32.mrf.mxu1  ;;  %2061 = vst [vmem:[%s3567_s20 + $0x30] sm:$0xff] %v2336_v22 }
 0x2e8   : > { %v1999_v14 = vadd.f32 %v1998_v16, %v1819_v55 }
 0x2e9   : > { %v2000_v54 = vpop.f32.mrf.mxu1 }
 0x2ea   : > { %v2001_v32 = vadd.f32 %v2000_v54, %v1819_v55 }
 0x2eb   : > { %v2002_v58 = vpop.f32.mrf.mxu1 }
 0x2ec   : > { %v2333_v48 = vpack.c.bf16 %v2001_v32, %v1999_v14  ;;  %v2003_v61 = vadd.f32 %v2002_v58, %v1824_v47 }
 0x2ed   : > { %v2004_v8 = vpop.f32.mrf.mxu1 }
 0x2ee   : > { %2058 = vst [vmem:[%s3567_s20 + $0x18] sm:$0xff] %v2333_v48  ;;  %v2005_v63 = vadd.f32 %v2004_v8, %v1824_v47 }
 0x2f0   : > { %v2337_v62 = vpack.c.bf16 %v2005_v63, %v2003_v61 }
 0x2f2   : > { %2062 = vst [vmem:[%s3567_s20 + $0x38] sm:$0xff] %v2337_v62 }
 0x2f3 PF: > { %s16_s25 = sadd.s32 1, %s2573_s25   ;;  %s3673_s21 = smov %s2561_s22 }
 0x2f4   : > { %p13_p12 = scmp.ge.s32.totalorder %s16_s25, 4   ;;  %s3674_s22 = smov %s2665_s29 }
 0x2f5   : > { %s3675_s23 = smov %s2569_s24  ;;  %s3676_s24 = smov %s3678_s26 }
 0x2f6   :  { %15 = sbr.rel (!%p13_p12) target bundleno = 3 (0x3), region = 210 }

// kernel: _lambda_.3
= control target key start
LH: loop header
LB: loop body
LE: loop exit
PB: predicated region body
PF: predicated region fallthrough
CT: control target
= control target key end

     0   :  { %11 = vsyncpa [#allocation4], 0  ;;  %s3369_s0 = inlined_call_operand.vmem [shape: bf16[2,32,640], index: 0, kind: input, shape index: {}]   ;;  %s3370_s1 = inlined_call_operand.vmem [shape: bf16[2,1,32,128], index: 1, kind: input, shape index: {}]   ;;  %s3371_s2 = inlined_call_operand.vmem [shape: bf16[96,112], index: 2, kind: input, shape index: {}]   ;;  %s3372_s3 = inlined_call_operand.vmem [shape: f32[96,1], index: 3, kind: input, shape index: {}]   ;;  %s3373_s4 = inlined_call_operand.vmem [shape: bf16[32,96], index: 4, kind: input, shape index: {}]   ;;  %s3374_s5 = inlined_call_operand.vmem [shape: f32[32,1], index: 5, kind: input, shape index: {}]   ;;  %s3375_s6 = inlined_call_operand.hbm [shape: f32[2,32,512], index: 6, kind: output, shape index: {}]  }
   0x1   :  { %13 = vsyncpa [#allocation4 + $0x1], 0  ;;  %s2472_s21 = smov 0   ;;  %s2474_s22 = smov 0  }
   0x2   :  { %s2476_s23 = smov 0   ;;  %s2478_s24 = smov 0  }
   0x3   :  { %s2480_s25 = smov 0   ;;  %s2482_s26 = smov 0  }
   0x4 LB: > { %s2042_s27 = sadd.s32 4294967295, %s2412_s26   ;;  %s2043_s28 = sadd.s32 4294967294, %s2412_s26   ;;  %s2412_s26 = sphi %s2482_s26, %s19_s26   ;;  %s2408_s25 = sphi %s2480_s25, %s3491_s25   ;;  %s2404_s24 = sphi %s2478_s24, %s3490_s24   ;;  %s2400_s23 = sphi %s2476_s23, %s3489_s23   ;;  %s2396_s22 = sphi %s2474_s22, %s3488_s22   ;;  %s2392_s21 = sphi %s2472_s21, %s3487_s21  }
   0x5   : > { %s31_s29 = sadd.s32 1, %s2408_s25  ;;  %s40_s30 = sadd.s32 1, %s2400_s23 }
   0x6   : > { %p33_p0 = scmp.ge.s32.totalorder %s31_s29, 2  ;;  %p47_p1 = scmp.ne.s32.totalorder %s2400_s23, %s2396_s22 }
   0x7   : > { %p48_p2 = scmp.eq.s32.totalorder %s2412_s26, 0  ;;  %p191_p3 = scmp.eq.s32.totalorder %s2042_s27, 1 }
   0x8   : > { %s3493_s29 = smov (%p33_p0, %s31_s29), 0  ;;  %p196_p6 = scmp.ne.s32.totalorder %s2396_s22, %s2392_s21 }
   0x9   : > { %p49_p4 = por %p48_p2, %p47_p1  ;;  %p2511_p5 = por %p191_p3, %p47_p1 }
   0xa   : > { %s35_s8 = ssub.s32 %s2408_s25, %s3493_s29  ;;  %p197_p8 = scmp.eq.s32.totalorder %s2043_s28, 1 }
   0xb   : > { %p38_p7 = scmp.eq.s32.totalorder %s35_s8, 0  ;;  %p2045_p10 = scmp.ge.s32.totalorder %s2412_s26, 2 }
   0xc   : > { %p2522_p9 = por %p197_p8, %p196_p6 }
   0xd   : > { %s2520_s9 = scalar_select %p38_p7, %s2400_s23, %s40_s30  }
   0xe   : > { %225 = sbr.rel (%p2045_p10) target bundleno = 32 (0x20), region = 32 }
  0x13   : > { %228 = sbr.rel (!%p49_p4) target bundleno = 32 (0x20), region = 36  ;;  %s230_s11 = sand.u32 (%p49_p4), 1, %s2400_s23  }
  0x14   : > { %s2106_s12 = smul.u32 (%p49_p4), 80, %s2408_s25  ;;  %s2531_s13 = sshll.u32 (%p49_p4), %s230_s11, 6 }
  0x15   : > { %s232_s17 = scalar_lea.vmem (%p49_p4), [#allocation2], %s2531_s13   ;;  %s2546_s20 = smov (%p49_p4), 0  }
  0x16   : > { %s2536_s16 = scalar_lea.vmem (%p49_p4), %s3369_s0, %s2106_s12   ;;  %s3407_s18 = smov (%p49_p4), %s232_s17 }
  0x17   : > { %s3408_s19 = smov (%p49_p4), %s2536_s16  ;;  %s2426_s27 = smov (%p49_p4), 0  }
  0x18 LB: >> { %v445_v0 = vld [vmem:[%s2420_s19] sm:$0xff]  ;;  %v447_v1 = vld [vmem:[%s2420_s19 + $0x14] sm:$0xff]  ;;  %v449_v2 = vld [vmem:[%s2420_s19 + $0x28] sm:$0xff]  ;;  %s453_s28 = sadd.s32 1, %s2424_s20  ;;  %s439_s27 = sadd.s32 1, %s2428_s27   ;;  %s2428_s27 = sphi %s2426_s27, %s439_s27   ;;  %s2424_s20 = sphi %s2546_s20, %s3409_s20   ;;  %s2420_s19 = sphi %s3408_s19, %s458_s19   ;;  %s2416_s18 = sphi %s3407_s18, %s459_s18  }
  0x19   : >> { %446 = vst [vmem:[%s2416_s18] sm:$0xff] %v445_v0  ;;  %448 = vst [vmem:[%s2416_s18 + $0x10] sm:$0xff] %v447_v1  ;;  %v451_v3 = vld [vmem:[%s2420_s19 + $0x3c] sm:$0xff]  ;;  %p454_p11 = scmp.ge.s32.totalorder %s453_s28, 2  ;;  %p438_p12 = scmp.ge.s32.totalorder %s439_s27, 2 }
  0x1a   : >> { %450 = vst [vmem:[%s2416_s18 + $0x20] sm:$0xff] %v449_v2  ;;  %452 = vst [vmem:[%s2416_s18 + $0x30] sm:$0xff] %v451_v3 }
  0x1b   : >> { %s3495_s28 = smov (%p454_p11, %s453_s28), 0  ;;  %441 = sbr.rel (!%p438_p12) target bundleno = 24 (0x18), region = 182 }
  0x1c   : >> { %s2050_s30 = sshll.u32 %s3495_s28, 3  ;;  %s3409_s20 = smov %s3495_s28 }
  0x1d   : >> { %s458_s19 = scalar_lea.vmem %s2536_s16, %s2050_s30   ;;  %s459_s18 = scalar_lea.vmem %s232_s17, %s2050_s30 [#allocation2]  }
  0x20 PF: > { %p2060_p13 = scmp.ge.s32.totalorder %s2412_s26, 1  ;;  %p683_p0 = scmp.lt.s32.totalorder %s2412_s26, 3 }
  0x22   : > { %p684_p1 = pnand %p2060_p13, %p683_p0 }
  0x24   : > { %687 = sbr.rel (%p684_p1) target bundleno = 778 (0x30a), region = 106 }
  0x29   : > { %s2563_s8 = sand.u32 1, %s2396_s22   ;;  %p733_p2 = scmp.lt.s32.totalorder %s2404_s24, 1  ;;  %v3376_v14 = vmov 0   ;;  %v921_v15 = vld [vmem:[%s3372_s3 + $0x50] sm:$0xff]  ;;  %v922_v16 = vld [vmem:[%s3372_s3 + $0x58] sm:$0xff]  ;;  %v919_v17 = vld [vmem:[%s3372_s3 + $0x40] sm:$0xff] }
  0x2a   : > { %s2061_s11 = sshll.u32 %s2563_s8, 6  ;;  %s2430_s13 = smov 125   ;;  %1157 = vmatprep.mubr.bf16.mxu1 %v3376_v14  ;;  %1064 = vmatprep.mubr.bf16.mxu0 %v3376_v14  ;;  %v917_v18 = vld [vmem:[%s3372_s3 + $0x30] sm:$0xff]  ;;  %v920_v19 = vld [vmem:[%s3372_s3 + $0x48] sm:$0xff]  ;;  %v915_v20 = vld [vmem:[%s3372_s3 + $0x20] sm:$0xff]  ;;  %vm890_vm0 = vcmask 1022976  }
  0x2b   : > { %s692_s12 = scalar_lea.vmem [#allocation2], %s2061_s11  ;;  %s2431_s16 = smov 126   ;;  %2201 = vset.pattern.permute.xlu0 %v3376_v14  ;;  %2200 = vset.pattern.permute.xlu1 %v3376_v14  ;;  %v918_v21 = vld [vmem:[%s3372_s3 + $0x38] sm:$0xff]  ;;  %v913_v22 = vld [vmem:[%s3372_s3 + $0x10] sm:$0xff]  ;;  %v916_v23 = vld [vmem:[%s3372_s3 + $0x28] sm:$0xff]  ;;  %vm853_vm1 = vcmask 1031168  }
  0x2c   : > { %v2566_v4 = vld [vmem:[%s692_s12 + $0xc] ss:$16 sps:$4 sm:$0xff]   ;;  %v2568_v5 = vld [vmem:[%s692_s12 + $0x4] ss:$16 sps:$4 sm:$0xff]   ;;  %v2575_v7 = vld [vmem:[%s692_s12 + $0x8] ss:$16 sps:$4 sm:$0xff]  }
  0x2d   : > { %886 = vrot.lane.b32.xlu1 %v2566_v4, %s2430_s13  ;;  %v2572_v6 = vld [vmem:[%s692_s12 + $0x24] ss:$16 sps:$4 sm:$0xff]   ;;  %882 = vrot.lane.b32.xlu0 %v2568_v5, %s2430_s13  ;;  %s734_s14 = scalar_select %p733_p2, %s2404_s24, 1  ;;  %v2578_v8 = vld [vmem:[%s692_s12] ss:$16 sps:$4 sm:$0xff]   ;;  %vm816_vm2 = vcmask 1039360  }
  0x2e   : > { %v2585_v10 = vld [vmem:[%s692_s12 + $0x2c] ss:$16 sps:$4 sm:$0xff]   ;;  %v2588_v11 = vld [vmem:[%s692_s12 + $0x28] ss:$16 sps:$4 sm:$0xff]   ;;  %v2591_v12 = vld [vmem:[%s692_s12 + $0x20] ss:$16 sps:$4 sm:$0xff]  }
  0x2f   : > { %s2104_s15 = sshll.u32 %s734_s14, 4  ;;  %s2432_s20 = smov 127   ;;  %v911_v24 = vld [vmem:[%s3372_s3] sm:$0xff]  ;;  %v914_v25 = vld [vmem:[%s3372_s3 + $0x18] sm:$0xff]  ;;  %v912_v27 = vld [vmem:[%s3372_s3 + $0x8] sm:$0xff]  ;;  %vm1013_vm3 = vcmask 916480  }
  0x30   : > { %s741_s19 = scalar_lea.vmem %s3370_s1, %s2104_s15  ;;  %v1678_v26 = vld [vmem:[%s3374_s5] sm:$0xff]  ;;  %v1680_v28 = vld [vmem:[%s3374_s5 + $0x10] sm:$0xff]  ;;  %v1679_v30 = vld [vmem:[%s3374_s5 + $0x8] sm:$0xff]  ;;  %vm1712_vm4 = vcmask 785408   ;;  %s2062_s17 = sshll.u32 %s2563_s8, 7 }
  0x31   : > { %864 = vrot.lane.b32.xlu1 %v2572_v6, %s2431_s16  ;;  %884 = vrot.lane.b32.xlu0 %v2575_v7, %s2430_s13  ;;  %v2209_v9 = vld [vmem:[%s741_s19] sm:$0xff]   ;;  %v2215_v13 = vld [vmem:[%s741_s19 + $0x8] sm:$0xff]   ;;  %s3296_s18 = scalar_lea.vmem [#allocation3], %s2062_s17  ;;  %s2105_s19 = sshll.u32 %s2404_s24, 11 }
  0x32   : > { %v1681_v33 = vld [vmem:[%s3374_s5 + $0x18] sm:$0xff]  ;;  %s3316_s30 = scalar_lea.hbm %s3375_s6, %s2105_s19  ;;  %s1842_s24 = scalar_lea.sflag [#allocation4], %s2563_s8 }
  0x33   : > { %s2434_s12 = smov [#allocation3]  }
  0x35   : > { %888 = vrot.lane.b32.xlu1 %v2209_v9, %s2430_s13  ;;  %880 = vrot.lane.b32.xlu0 %v2578_v8, %s2430_s13  ;;  %s2324_s13 = sshll.u32 %s2434_s12, 4  ;;  %s2325_s13 = int_to_ptr.vmem [resolvable:$false] %s2324_s13 }
  0x36   : > { %s2326_s14 = scalar_lea.vmem %s2325_s13, 4096 }
  0x39   : > { %868 = vrot.lane.b32.xlu1 %v2585_v10, %s2431_s16  ;;  %866 = vrot.lane.b32.xlu0 %v2588_v11, %s2431_s16 }
  0x3d   : > { %862 = vrot.lane.b32.xlu1 %v2591_v12, %s2431_s16  ;;  %870 = vrot.lane.b32.xlu0 %v2215_v13, %s2431_s16 }
  0x41   : > { %847 = vrot.lane.b32.xlu1 %v2575_v7, %s2431_s16  ;;  %845 = vrot.lane.b32.xlu0 %v2568_v5, %s2431_s16 }
  0x45   : > { %851 = vrot.lane.b32.xlu1 %v2209_v9, %s2431_s16  ;;  %849 = vrot.lane.b32.xlu0 %v2566_v4, %s2431_s16 }
  0x49   : > { %827 = vrot.lane.b32.xlu1 %v2572_v6, %s2432_s20  ;;  %843 = vrot.lane.b32.xlu0 %v2578_v8, %s2431_s16 }
  0x4d   : > { %831 = vrot.lane.b32.xlu1 %v2585_v10, %s2432_s20  ;;  %829 = vrot.lane.b32.xlu0 %v2588_v11, %s2432_s20 }
  0x51   : > { %825 = vrot.lane.b32.xlu1 %v2591_v12, %s2432_s20  ;;  %833 = vrot.lane.b32.xlu0 %v2215_v13, %s2432_s20 }
  0x55   : > { %810 = vrot.lane.b32.xlu1 %v2575_v7, %s2432_s20  ;;  %808 = vrot.lane.b32.xlu0 %v2568_v5, %s2432_s20 }
  0x59   : > { %814 = vrot.lane.b32.xlu1 %v2209_v9, %s2432_s20  ;;  %812 = vrot.lane.b32.xlu0 %v2566_v4, %s2432_s20 }
  0x5d   : > { %806 = vrot.lane.b32.xlu0 %v2578_v8, %s2432_s20  ;;  %975 = vperm.xlu1 %2200, %v921_v15   ;;  %s1857_s20 = sshll.u32 %s3296_s18, 4  ;;  %s3318_s20 = int_to_ptr.vmem [resolvable:$true] %s1857_s20 }
  0x5e   : > { %s2320_s11 = scalar_lea.vmem %s3318_s20, 2048  ;;  %p2327_p7 = scmp.lt.s32.totalorder %s3318_s20, %s2325_s13 }
  0x5f   : > { %p2321_p3 = scmp.ne.s32.totalorder %s3318_s20, %s2320_s11  ;;  %p2328_p8 = scmp.lt.s32.totalorder %s2326_s14, %s2320_s11 }
  0x61   : > { %980 = vperm.xlu0 %2201, %v922_v16   ;;  %965 = vperm.xlu1 %2200, %v919_v17   ;;  %p2322_p4 = pnand %p2321_p3, %p2511_p5  ;;  %p2329_p11 = por %p2328_p8, %p2327_p7 }
  0x63   : > { %p2323_p6 = pneg %p2322_p4 }
  0x65   : > { %955 = vperm.xlu0 %2201, %v917_v18   ;;  %970 = vperm.xlu1 %2200, %v920_v19   ;;  %p2330_p12 = pnand %p2329_p11, %p2323_p6 }
  0x69   : > { %945 = vperm.xlu0 %2201, %v915_v20   ;;  %960 = vperm.xlu1 %2200, %v918_v21   ;;  %v2216_v21 = vld [vmem:[%s3371_s2] sm:$0xff]  }
  0x6d   : > { %935 = vperm.xlu0 %2201, %v913_v22   ;;  %950 = vperm.xlu1 %2200, %v916_v23  }
  0x71   : > { %925 = vperm.xlu0 %2201, %v911_v24   ;;  %940 = vperm.xlu1 %2200, %v914_v25  }
  0x75   : > { %1684 = vperm.xlu0 %2201, %v1678_v26   ;;  %930 = vperm.xlu1 %2200, %v912_v27  }
  0x79   : > { %1694 = vperm.xlu0 %2201, %v1680_v28   ;;  %1689 = vperm.xlu1 %2200, %v1679_v30  }
  0x7d   : > { %1699 = vperm.xlu1 %2200, %v1681_v33  }
  0x9f   : > { %v887_v29 = vpop.permute.xlu1 %886  ;;  %v883_v31 = vpop.permute.xlu0 %882 }
  0xa3   : > { %v865_v32 = vpop.permute.xlu1 %864  ;;  %v885_v34 = vpop.permute.xlu0 %884 }
  0xa4   : > { %v892_v35 = vsel %vm890_vm0, %v883_v31, %v885_v34  ;;  %v893_v40 = vsel %vm890_vm0, %v885_v34, %v887_v29 }
  0xa5   : > { %1034 = vmatprep.subr.bf16.mxu0 %v892_v35 }
  0xa7   : > { %v889_v36 = vpop.permute.xlu1 %888  ;;  %v881_v37 = vpop.permute.xlu0 %880 }
  0xa8   : > { %v894_v38 = vsel %vm890_vm0, %v887_v29, %v889_v36  ;;  %v891_v39 = vsel %vm890_vm0, %v881_v37, %v883_v31 }
  0xa9   : > { %1127 = vmatprep.subr.bf16.mxu1 %v894_v38  ;;  %1035 = vmatpush1.bf16.msra.mxu0 %v891_v39 }
  0xaa   : > { %1128 = vmatpush1.bf16.msra.mxu1 %v893_v40 }
  0xab   : > { %v869_v41 = vpop.permute.xlu1 %868  ;;  %v867_v42 = vpop.permute.xlu0 %866 }
  0xac   : > { %v873_v43 = vsel %vm853_vm1, %v865_v32, %v867_v42  ;;  %v874_v48 = vsel %vm853_vm1, %v867_v42, %v869_v41 }
  0xad   : > { %1036 = vmatprep.subr.bf16.mxu0 %v873_v43 }
  0xaf   : > { %v863_v44 = vpop.permute.xlu1 %862  ;;  %v871_v45 = vpop.permute.xlu0 %870 }
  0xb0   : > { %v872_v46 = vsel %vm853_vm1, %v863_v44, %v865_v32  ;;  %v875_v47 = vsel %vm853_vm1, %v869_v41, %v871_v45 }
  0xb1   : > { %1037 = vmatpush1.bf16.msra.mxu0 %v872_v46  ;;  %1129 = vmatprep.subr.bf16.mxu1 %v875_v47 }
  0xb2   : > { %1130 = vmatpush1.bf16.msra.mxu1 %v874_v48 }
  0xb3   : > { %v848_v49 = vpop.permute.xlu1 %847  ;;  %v846_v50 = vpop.permute.xlu0 %845 }
  0xb4   : > { %v855_v51 = vsel %vm853_vm1, %v846_v50, %v848_v49 }
  0xb5   : > { %1038 = vmatprep.subr.bf16.mxu0 %v855_v51 }
  0xb7   : > { %v852_v52 = vpop.permute.xlu1 %851  ;;  %v850_v53 = vpop.permute.xlu0 %849 }
  0xb8   : > { %v857_v54 = vsel %vm853_vm1, %v850_v53, %v852_v52  ;;  %v856_v55 = vsel %vm853_vm1, %v848_v49, %v850_v53 }
  0xb9   : > { %1131 = vmatprep.subr.bf16.mxu1 %v857_v54 }
  0xba   : > { %1132 = vmatpush1.bf16.msra.mxu1 %v856_v55 }
  0xbb   : > { %v828_v56 = vpop.permute.xlu1 %827  ;;  %v844_v57 = vpop.permute.xlu0 %843 }
  0xbc   : > { %v854_v58 = vsel %vm853_vm1, %v844_v57, %v846_v50 }
  0xbd   : > { %1039 = vmatpush1.bf16.msra.mxu0 %v854_v58 }
  0xbf   : > { %v832_v59 = vpop.permute.xlu1 %831  ;;  %v830_v60 = vpop.permute.xlu0 %829 }
  0xc0   : > { %v836_v61 = vsel %vm816_vm2, %v828_v56, %v830_v60  ;;  %v837_v2 = vsel %vm816_vm2, %v830_v60, %v832_v59 }
  0xc1   : > { %1040 = vmatprep.subr.bf16.mxu0 %v836_v61 }
  0xc3   : > { %v826_v62 = vpop.permute.xlu1 %825  ;;  %v834_v63 = vpop.permute.xlu0 %833 }
  0xc4   : > { %v835_v0 = vsel %vm816_vm2, %v826_v62, %v828_v56  ;;  %v838_v1 = vsel %vm816_vm2, %v832_v59, %v834_v63 }
  0xc5   : > { %1041 = vmatpush1.bf16.msra.mxu0 %v835_v0  ;;  %1133 = vmatprep.subr.bf16.mxu1 %v838_v1 }
  0xc6   : > { %1134 = vmatpush1.bf16.msra.mxu1 %v837_v2 }
  0xc7   : > { %v811_v3 = vpop.permute.xlu1 %810  ;;  %v809_v9 = vpop.permute.xlu0 %808 }
  0xc8   : > { %v818_v13 = vsel %vm816_vm2, %v809_v9, %v811_v3 }
  0xc9   : > { %1042 = vmatprep.subr.bf16.mxu0 %v818_v13 }
  0xcb   : > { %v815_v15 = vpop.permute.xlu1 %814  ;;  %v813_v16 = vpop.permute.xlu0 %812 }
  0xcc   : > { %v820_v17 = vsel %vm816_vm2, %v813_v16, %v815_v15  ;;  %v819_v18 = vsel %vm816_vm2, %v811_v3, %v813_v16 }
  0xcd   : > { %1135 = vmatprep.subr.bf16.mxu1 %v820_v17 }
  0xce   : > { %1136 = vmatpush1.bf16.msra.mxu1 %v819_v18 }
  0xcf   : > { %v807_v19 = vpop.permute.xlu0 %806  ;;  %1137 = vmatprep.subr.bf16.mxu1 %v2585_v10 }
  0xd0   : > { %v817_v20 = vsel %vm816_vm2, %v807_v19, %v809_v9 }
  0xd1   : > { %1043 = vmatpush1.bf16.msra.mxu0 %v817_v20 }
  0xd2   : > { %1138 = vmatpush1.bf16.msra.mxu1 %v2588_v11  ;;  %1044 = vmatprep.subr.bf16.mxu0 %v2572_v6  ;;  %v2219_v6 = vld [vmem:[%s3371_s2 + $0x18] sm:$0xff]  }
  0xd3   : > { %1139 = vmatprep.subr.bf16.mxu1 %v2566_v4  ;;  %v2217_v4 = vld [vmem:[%s3371_s2 + $0x8] sm:$0xff]  }
  0xd5   : > { %1045 = vmatpush1.bf16.msra.mxu0 %v2591_v12 }
  0xd6   : > { %1140 = vmatpush1.bf16.msra.mxu1 %v2575_v7  ;;  %1046 = vmatprep.subr.bf16.mxu0 %v2568_v5  ;;  %v2218_v5 = vld [vmem:[%s3371_s2 + $0x10] sm:$0xff]   ;;  %v2220_v7 = vld [vmem:[%s3371_s2 + $0x20] sm:$0xff]  }
  0xd8   : > { %v2725_v10 = vpop.permute.xlu1 %975 }
  0xd9   : > { %1047 = vmatpush1.bf16.msra.mxu0 %v2578_v8  ;;  %2087 = vmatmul.mubr.msk.bf16.vlgmr.msra.gmra.mxu1 %vm1013_vm3, %v2216_v21  ;;  %v2221_v8 = vld [vmem:[%s3371_s2 + $0x28] sm:$0xff]  }
  0xda   : > { %1167 = vmatprep.mubr.bf16.mxu1 %v3376_v14 }
  0xdc   : > { %2081 = vmatmul.mubr.msk.bf16.vlgmr.msra.gmra.mxu0 %vm1013_vm3, %v2216_v21  ;;  %v2727_v11 = vpop.permute.xlu1 %965  ;;  %v2729_v12 = vpop.permute.xlu0 %980 }
  0xdd   : > { %1074 = vmatprep.mubr.bf16.mxu0 %v3376_v14 }
  0xe0   : > { %v2731_v22 = vpop.permute.xlu1 %970  ;;  %v2733_v23 = vpop.permute.xlu0 %955 }
  0xe1   : > { %2088 = vmatmul.mubr.msk.bf16.gmra.mxu1 %vm1013_vm3, %v2217_v4 }
  0xe2   : > { %1177 = vmatprep.mubr.bf16.mxu1 %v3376_v14 }
  0xe4   : > { %2082 = vmatmul.mubr.msk.bf16.gmra.mxu0 %vm1013_vm3, %v2217_v4  ;;  %v2735_v24 = vpop.permute.xlu1 %960  ;;  %v2737_v25 = vpop.permute.xlu0 %945 }
  0xe5   : > { %1084 = vmatprep.mubr.bf16.mxu0 %v3376_v14 }
  0xe8   : > { %v2739_v26 = vpop.permute.xlu1 %950  ;;  %v2741_v27 = vpop.permute.xlu0 %935 }
  0xe9   : > { %2089 = vmatmul.mubr.msk.bf16.gmra.mxu1 %vm1013_vm3, %v2218_v5 }
  0xea   : > { %1187 = vmatprep.mubr.bf16.mxu1 %v3376_v14 }
  0xec   : > { %2083 = vmatmul.mubr.msk.bf16.gmra.mxu0 %vm1013_vm3, %v2218_v5  ;;  %v2743_v28 = vpop.permute.xlu1 %940  ;;  %v926_v30 = vpop.permute.xlu0 %925 }
  0xed   : > { %1094 = vmatprep.mubr.bf16.mxu0 %v3376_v14 }
  0xf0   : > { %v931_v32 = vpop.permute.xlu1 %930 }
  0xf1   : > { %2090 = vmatmul.mubr.msk.bf16.gmra.mxu1 %vm1013_vm3, %v2219_v6 }
  0xf2   : > { %1197 = vmatprep.mubr.bf16.mxu1 %v3376_v14 }
  0xf4   : > { %2084 = vmatmul.mubr.msk.bf16.gmra.mxu0 %vm1013_vm3, %v2219_v6 }
  0xf5   : > { %1104 = vmatprep.mubr.bf16.mxu0 %v3376_v14 }
  0xf9   : > { %2091 = vmatmul.mubr.msk.bf16.gmra.mxu1 %vm1013_vm3, %v2220_v7 }
  0xfa   : > { %1207 = vmatprep.mubr.bf16.mxu1 %v3376_v14 }
  0xfc   : > { %2085 = vmatmul.mubr.msk.bf16.gmra.mxu0 %vm1013_vm3, %v2220_v7 }
  0xfd   : > { %1114 = vmatprep.mubr.bf16.mxu0 %v3376_v14 }
 0x101   : > { %2092 = vmatmul.mubr.msk.bf16.gmra.mxu1 %vm1013_vm3, %v2221_v8 }
 0x102   : > { %1804 = vmatprep.mubr.bf16.mxu1 %v3376_v14 }
 0x104   : > { %2086 = vmatmul.mubr.msk.bf16.gmra.mxu0 %vm1013_vm3, %v2221_v8 }
 0x105   : > { %1751 = vmatprep.mubr.bf16.mxu0 %v3376_v14 }
 0x199   : > { %v1159_v29 = vpop.f32.mrf.mxu1 }
 0x19a   : > { %v2749_v39 = vadd.f32 %v1159_v29, %v926_v30 }
 0x19b   : > { %v1161_v31 = vpop.f32.mrf.mxu1 }
 0x19c   : > { %v2745_v33 = vadd.f32 %v1161_v31, %v926_v30  ;;  %v1066_v34 = vpop.f32.mrf.mxu0  ;;  %3412 = vst [vmem:[#allocation8_spill] sm:$0xff] %v2749_v39  ;;  %v1268_v54 = vmul.f32 0.044715, %v2749_v39 }
 0x19d   : > { %v1067_v35 = vadd.f32 %v1066_v34, %v926_v30  ;;  %v1163_v36 = vpop.f32.mrf.mxu1 }
 0x19e   : > { %3410 = vst [vmem:[#allocation6_spill] sm:$0xff] %v2745_v33  ;;  %v2747_v37 = vadd.f32 %v1163_v36, %v931_v32  ;;  %v1068_v38 = vpop.f32.mrf.mxu0  ;;  %v1269_v43 = vmul.f32 0.044715, %v2745_v33  ;;  %v2779_v16 = vmul.f32 %v1268_v54, %v2749_v39 }
 0x19f   : > { %v1266_v40 = vmul.f32 0.044715, %v1067_v35  ;;  %v2751_v41 = vadd.f32 %v1068_v38, %v926_v30  ;;  %v1165_v42 = vpop.f32.mrf.mxu1  ;;  %v2785_v20 = vmul.f32 0.5, %v1067_v35 }
 0x1a0   : > { %3411 = vst [vmem:[#allocation7_spill] sm:$0xff] %v2747_v37  ;;  %v1272_v44 = vmul.f32 0.044715, %v2747_v37  ;;  %v1070_v45 = vpop.f32.mrf.mxu0  ;;  %v2755_v47 = vadd.f32 %v1165_v42, %v931_v32  ;;  %v1317_v58 = vmul.f32 %v1269_v43, %v2745_v33  ;;  %3419 = vst [vmem:[#allocation15_spill] sm:$0xff] %v2779_v16 }
 0x1a1   : > { %3413 = vst [vmem:[#allocation9_spill] sm:$0xff] %v2751_v41  ;;  %v1314_v46 = vmul.f32 %v1266_v40, %v1067_v35  ;;  %v2757_v48 = vadd.f32 %v1070_v45, %v931_v32  ;;  %v1169_v49 = vpop.f32.mrf.mxu1  ;;  %v1267_v51 = vmul.f32 0.044715, %v2751_v41  ;;  %3421 = vst [vmem:[#allocation17_spill] sm:$0xff] %v2785_v20 }
 0x1a2   : > { %3414 = vst [vmem:[#allocation10_spill] sm:$0xff] %v2755_v47  ;;  %v1320_v50 = vmul.f32 %v1272_v44, %v2747_v37  ;;  %v2762_v52 = vadd.f32 %v1169_v49, %v2741_v27  ;;  %v1072_v53 = vpop.f32.mrf.mxu0  ;;  %v1273_v63 = vmul.f32 0.044715, %v2755_v47  ;;  %v2788_v21 = vmul.f32 %v1317_v58, %v2745_v33 }
 0x1a3   : > { %3415 = vst [vmem:[#allocation11_spill] sm:$0xff] %v2757_v48  ;;  %v1362_v55 = vmul.f32 %v1314_v46, %v1067_v35  ;;  %v1270_v56 = vmul.f32 0.044715, %v2757_v48  ;;  %v1171_v57 = vpop.f32.mrf.mxu1  ;;  %v2768_v60 = vadd.f32 %v1072_v53, %v931_v32  ;;  %v1315_v9 = vmul.f32 %v1267_v51, %v2751_v41 }
 0x1a4   : > { %3416 = vst [vmem:[#allocation12_spill] sm:$0xff] %v2762_v52  ;;  %v1276_v59 = vmul.f32 0.044715, %v2762_v52  ;;  %v1076_v61 = vpop.f32.mrf.mxu0  ;;  %v1368_v62 = vmul.f32 %v1320_v50, %v2747_v37  ;;  %v2774_v1 = vadd.f32 %v1171_v57, %v2741_v27  ;;  %3422 = vst [vmem:[#allocation18_spill] sm:$0xff] %v2788_v21  ;;  %v1321_v29 = vmul.f32 %v1273_v63, %v2755_v47 }
 0x1a5   : > { %3417 = vst [vmem:[#allocation13_spill] sm:$0xff] %v2768_v60  ;;  %v1318_v0 = vmul.f32 %v1270_v56, %v2757_v48  ;;  %v1173_v2 = vpop.f32.mrf.mxu1  ;;  %v1410_v3 = vadd.f32 %v1362_v55, %v1067_v35  ;;  %v2783_v18 = vadd.f32 %v1076_v61, %v2741_v27  ;;  %v1271_v5 = vmul.f32 0.044715, %v2768_v60 }
 0x1a6   : > { %3418 = vst [vmem:[#allocation14_spill] sm:$0xff] %v2774_v1  ;;  %v1324_v13 = vmul.f32 %v1276_v59, %v2762_v52  ;;  %v1078_v15 = vpop.f32.mrf.mxu0  ;;  %v2793_v6 = vadd.f32 %v1173_v2, %v2743_v28  ;;  %v1416_v8 = vadd.f32 %v1368_v62, %v2747_v37  ;;  %v1277_v30 = vmul.f32 0.044715, %v2774_v1 }
 0x1a7   : > { %v1366_v17 = vmul.f32 %v1318_v0, %v2757_v48  ;;  %3420 = vst [vmem:[#allocation16_spill] sm:$0xff] %v2783_v18  ;;  %v1175_v19 = vpop.f32.mrf.mxu1  ;;  %v1274_v31 = vmul.f32 0.044715, %v2783_v18  ;;  %v1458_v34 = vmul.f32 0.7978846, %v1410_v3  ;;  %v2800_v35 = vmul.f32 %v1315_v9, %v2751_v41 }
 0x1a8   : > { %v1372_v4 = vmul.f32 %v1324_v13, %v2762_v52  ;;  %3423 = vst [vmem:[#allocation19_spill] sm:$0xff] %v2793_v6  ;;  %v1080_v7 = vpop.f32.mrf.mxu0  ;;  %v1280_v38 = vmul.f32 0.044715, %v2793_v6  ;;  %v2807_v44 = vadd.f32 %v1078_v15, %v2741_v27  ;;  %v2810_v45 = vadd.f32 %v1175_v19, %v2743_v28 }
 0x1a9   : > { %v1179_v32 = vpop.f32.mrf.mxu1  ;;  %3424 = vst [vmem:[#allocation20_spill] sm:$0xff] %v2800_v35  ;;  %v1414_v36 = vadd.f32 %v1366_v17, %v2757_v48  ;;  %v1322_v43 = vmul.f32 %v1274_v31, %v2783_v18  ;;  %v1319_v49 = vmul.f32 %v1271_v5, %v2768_v60  ;;  %v2815_v51 = vadd.f32 %v1080_v7, %v2743_v28 }
 0x1aa   : > { %v1082_v40 = vpop.f32.mrf.mxu0  ;;  %v1420_v42 = vadd.f32 %v1372_v4, %v2762_v52  ;;  %3425 = vst [vmem:[#allocation21_spill] sm:$0xff] %v2807_v44  ;;  %3426 = vst [vmem:[#allocation22_spill] sm:$0xff] %v2810_v45  ;;  %v1328_v50 = vmul.f32 %v1280_v38, %v2793_v6  ;;  %v2818_v53 = vadd.f32 %v1179_v32, %v2737_v25  ;;  %v1464_v55 = vmul.f32 0.7978846, %v1416_v8 }
 0x1ab   : > { %v1181_v46 = vpop.f32.mrf.mxu1  ;;  %3427 = vst [vmem:[#allocation23_spill] sm:$0xff] %v2815_v51  ;;  %v1325_v56 = vmul.f32 %v1277_v30, %v2774_v1  ;;  %v1370_v27 = vmul.f32 %v1322_v43, %v2783_v18  ;;  %v1275_v57 = vmul.f32 0.044715, %v2807_v44  ;;  %2224 = vtanh.f32 %v1458_v34 }
 0x1ac   : > { %3428 = vst [vmem:[#allocation24_spill] sm:$0xff] %v2818_v53  ;;  %v1086_v54 = vpop.f32.mrf.mxu0  ;;  %v1376_v59 = vmul.f32 %v1328_v50, %v2793_v6  ;;  %v1278_v61 = vmul.f32 0.044715, %v2815_v51  ;;  %v1284_v62 = vmul.f32 0.044715, %v2818_v53  ;;  %v2828_v9 = vadd.f32 %v1082_v40, %v2743_v28 }
 0x1ad   : > { %v1183_v58 = vpop.f32.mrf.mxu1  ;;  %v1462_v0 = vmul.f32 0.7978846, %v1414_v36  ;;  %v1468_v2 = vmul.f32 0.7978846, %v1420_v42  ;;  %v1281_v3 = vmul.f32 0.044715, %v2810_v45  ;;  %v1418_v15 = vadd.f32 %v1370_v27, %v2783_v18 }
 0x1ae   : > { %v1088_v63 = vpop.f32.mrf.mxu0  ;;  %3429 = vst [vmem:[#allocation25_spill] sm:$0xff] %v2828_v9  ;;  %v1326_v17 = vmul.f32 %v1278_v61, %v2815_v51  ;;  %v1332_v19 = vmul.f32 %v1284_v62, %v2818_v53  ;;  %v2834_v4 = vadd.f32 %v1181_v46, %v2737_v25  ;;  %2226 = vtanh.f32 %v1464_v55 }
 0x1af   : > { %v1185_v13 = vpop.f32.mrf.mxu1  ;;  %v2837_v7 = vmul.f32 %v1321_v29, %v2755_v47  ;;  %v1424_v8 = vadd.f32 %v1376_v59, %v2793_v6  ;;  %v1323_v28 = vmul.f32 %v1275_v57, %v2807_v44  ;;  %v1279_v34 = vmul.f32 0.044715, %v2828_v9 }
 0x1b0   : > { %v1090_v5 = vpop.f32.mrf.mxu0  ;;  %v1374_v31 = vmul.f32 %v1326_v17, %v2815_v51  ;;  %v1380_v32 = vmul.f32 %v1332_v19, %v2818_v53  ;;  %v1285_v36 = vmul.f32 0.044715, %v2834_v4  ;;  %2228 = vtanh.f32 %v1462_v0 }
 0x1b1   : > { %3430 = vst [vmem:[#allocation26_spill] sm:$0xff] %v2837_v7  ;;  %v1189_v30 = vpop.f32.mrf.mxu1  ;;  %v2846_v40 = vmul.f32 %v1319_v49, %v2768_v60  ;;  %v2849_v29 = vadd.f32 %v1086_v54, %v2737_v25  ;;  %v2852_v42 = vadd.f32 %v1183_v58, %v2739_v26  ;;  %2230 = vtanh.f32 %v1468_v2 }
 0x1b2   : > { %v1092_v38 = vpop.f32.mrf.mxu0  ;;  %v2855_v46 = vmul.f32 %v1325_v56, %v2774_v1  ;;  %v1466_v50 = vmul.f32 0.7978846, %v1418_v15  ;;  %v1329_v55 = vmul.f32 %v1281_v3, %v2810_v45  ;;  %v1472_v57 = vmul.f32 0.7978846, %v1424_v8 }
 0x1b3   : > { %3431 = vst [vmem:[#allocation27_spill] sm:$0xff] %v2846_v40  ;;  %3432 = vst [vmem:[#allocation28_spill] sm:$0xff] %v2849_v29  ;;  %v1191_v43 = vpop.f32.mrf.mxu1  ;;  %v2859_v59 = vmul.f32 %v1323_v28, %v2807_v44  ;;  %v1282_v49 = vmul.f32 0.044715, %v2849_v29  ;;  %v1288_v54 = vmul.f32 0.044715, %v2852_v42  ;;  %v1422_v58 = vadd.f32 %v1374_v31, %v2815_v51 }
 0x1b4   : > { %3433 = vst [vmem:[#allocation29_spill] sm:$0xff] %v2855_v46  ;;  %v1096_v27 = vpop.f32.mrf.mxu0  ;;  %v1428_v62 = vadd.f32 %v1380_v32, %v2818_v53  ;;  %v1327_v56 = vmul.f32 %v1279_v34, %v2828_v9  ;;  %v1333_v0 = vmul.f32 %v1285_v36, %v2834_v4  ;;  %v2870_v17 = vadd.f32 %v1088_v63, %v2737_v25 }
 0x1b5   : > { %3434 = vst [vmem:[#allocation30_spill] sm:$0xff] %v2859_v59  ;;  %v1193_v61 = vpop.f32.mrf.mxu1  ;;  %v1330_v3 = vmul.f32 %v1282_v49, %v2849_v29  ;;  %v1336_v15 = vmul.f32 %v1288_v54, %v2852_v42  ;;  %v2873_v19 = vadd.f32 %v1090_v5, %v2739_v26  ;;  %2232 = vtanh.f32 %v1466_v50 }
 0x1b6   : > { %v1098_v2 = vpop.f32.mrf.mxu0  ;;  %v2876_v28 = vmul.f32 %v1329_v55, %v2810_v45  ;;  %v2879_v31 = vadd.f32 %v1185_v13, %v2739_v26  ;;  %v2882_v32 = vadd.f32 %v1189_v30, %v2733_v23  ;;  %2234 = vtanh.f32 %v1472_v57 }
 0x1b7   : > { %3435 = vst [vmem:[#allocation31_spill] sm:$0xff] %v2873_v19  ;;  %v1195_v8 = vpop.f32.mrf.mxu1  ;;  %v1378_v36 = vmul.f32 %v1330_v3, %v2849_v29  ;;  %v1384_v25 = vmul.f32 %v1336_v15, %v2852_v42  ;;  %v2887_v63 = vadd.f32 %v1092_v38, %v2739_v26  ;;  %v1470_v50 = vmul.f32 0.7978846, %v1422_v58 }
 0x1b8   : > { %3436 = vst [vmem:[#allocation32_spill] sm:$0xff] %v2876_v28  ;;  %v1100_v34 = vpop.f32.mrf.mxu0  ;;  %v2890_v55 = vmul.f32 %v1327_v56, %v2828_v9  ;;  %v1286_v13 = vmul.f32 0.044715, %v2873_v19  ;;  %v1292_v49 = vmul.f32 0.044715, %v2882_v32  ;;  %v2896_v54 = vpop.eup %2224  ;;  %v2899_v3 = vmul.f32 %v1333_v0, %v2834_v4 }
 0x1b9   : > { %v1199_v5 = vpop.f32.mrf.mxu1  ;;  %3438 = vst [vmem:[#allocation34_spill] sm:$0xff] %v2896_v54  ;;  %v1476_v57 = vmul.f32 0.7978846, %v1428_v62  ;;  %v1283_v26 = vmul.f32 0.044715, %v2870_v17  ;;  %v2903_v38 = vadd.f32 %v1191_v43, %v2733_v23  ;;  %v1426_v58 = vadd.f32 %v1378_v36, %v2849_v29 }
 0x1ba   : > { %3437 = vst [vmem:[#allocation33_spill] sm:$0xff] %v2890_v55  ;;  %v2894_v30 = vpop.f32.mrf.mxu0  ;;  %v1289_v56 = vmul.f32 0.044715, %v2879_v31  ;;  %v1334_v15 = vmul.f32 %v1286_v13, %v2873_v19  ;;  %v1340_v14 = vmul.f32 %v1292_v49, %v2882_v32  ;;  %v1432_v62 = vadd.f32 %v1384_v25, %v2852_v42 }
 0x1bb   : > { %v1201_v37 = vpop.f32.mrf.mxu1  ;;  %v1287_v0 = vmul.f32 0.044715, %v2887_v63  ;;  %v1293_v48 = vmul.f32 0.044715, %v2903_v38  ;;  %v2913_v54 = vadd.f32 %v1096_v27, %v2733_v23  ;;  %v2915_v43 = vpop.eup %2226  ;;  %2236 = vtanh.f32 %v1470_v50 }
 0x1bc   : > { %v1106_v20 = vpop.f32.mrf.mxu0  ;;  %3439 = vst [vmem:[#allocation35_spill] sm:$0xff] %v2915_v43  ;;  %v1382_v36 = vmul.f32 %v1334_v15, %v2873_v19  ;;  %v1388_v13 = vmul.f32 %v1340_v14, %v2882_v32  ;;  %v2920_v49 = vadd.f32 %v1193_v61, %v2735_v24  ;;  %2238 = vtanh.f32 %v1476_v57 }
 0x1bd   : > { %v1331_v25 = vmul.f32 %v1283_v26, %v2870_v17  ;;  %v1290_v29 = vmul.f32 0.044715, %v2913_v54  ;;  %v2925_v16 = vadd.f32 %v1098_v2, %v2733_v23  ;;  %v2927_v39 = vpop.eup %2228  ;;  %v1474_v43 = vmul.f32 0.7978846, %v1426_v58  ;;  %v1203_v61 = vpop.f32.mrf.mxu1 }
 0x1be   : > { %v1108_v27 = vpop.f32.mrf.mxu0  ;;  %3440 = vst [vmem:[#allocation36_spill] sm:$0xff] %v2927_v39  ;;  %v1337_v50 = vmul.f32 %v1289_v56, %v2879_v31  ;;  %v1430_v15 = vadd.f32 %v1382_v36, %v2873_v19  ;;  %v1296_v14 = vmul.f32 0.044715, %v2920_v49  ;;  %v2932_v40 = vpop.eup %2230  ;;  %v1480_v57 = vmul.f32 0.7978846, %v1432_v62 }
 0x1bf   : > { %3441 = vst [vmem:[#allocation37_spill] sm:$0xff] %v2932_v40  ;;  %v1335_v26 = vmul.f32 %v1287_v0, %v2887_v63  ;;  %v1341_v60 = vmul.f32 %v1293_v48, %v2903_v38  ;;  %v1338_v23 = vmul.f32 %v1290_v29, %v2913_v54  ;;  %v1436_v2 = vadd.f32 %v1388_v13, %v2882_v32 }
 0x1c0   : > { %v1344_v58 = vmul.f32 %v1296_v14, %v2920_v49  ;;  %v1291_v56 = vmul.f32 0.044715, %v2925_v16  ;;  %v2941_v36 = vadd.f32 %v1100_v34, %v2735_v24  ;;  %v2944_v39 = vmul.f32 %v1331_v25, %v2870_v17  ;;  %v1110_v29 = vpop.f32.mrf.mxu0  ;;  %v1205_v34 = vpop.f32.mrf.mxu1 }
 0x1c1   : > { %v1386_v62 = vmul.f32 %v1338_v23, %v2913_v54  ;;  %v2948_v0 = vadd.f32 %v1195_v8, %v2735_v24  ;;  %v2951_v48 = vadd.f32 %v1199_v5, %v2727_v11  ;;  %2240 = vtanh.f32 %v1474_v43 }
 0x1c2   : > { %v1478_v13 = vmul.f32 0.7978846, %v1430_v15  ;;  %v1392_v14 = vmul.f32 %v1344_v58, %v2920_v49  ;;  %v1294_v35 = vmul.f32 0.044715, %v2941_v36  ;;  %v2955_v41 = vpop.eup %2232  ;;  %2242 = vtanh.f32 %v1480_v57  ;;  %v1209_v18 = vpop.f32.mrf.mxu1 }
 0x1c3   : > { %3442 = vst [vmem:[#allocation38_spill] sm:$0xff] %v2955_v41  ;;  %v2958_v25 = vmul.f32 %v1337_v50, %v2879_v31  ;;  %v2961_v8 = vmul.f32 %v1335_v26, %v2887_v63  ;;  %v2964_v5 = vmul.f32 %v1341_v60, %v2903_v38  ;;  %v2966_v23 = vpop.eup %2234  ;;  %v1484_v43 = vmul.f32 0.7978846, %v1436_v2  ;;  %v1112_v60 = vpop.f32.mrf.mxu0 }
 0x1c4   : > { %3443 = vst [vmem:[#allocation39_spill] sm:$0xff] %v2966_v23  ;;  %v1339_v15 = vmul.f32 %v1291_v56, %v2925_v16  ;;  %v1342_v58 = vmul.f32 %v1294_v35, %v2941_v36  ;;  %v1300_v51 = vmul.f32 0.044715, %v2951_v48  ;;  %v1434_v57 = vadd.f32 %v1386_v62, %v2913_v54 }
 0x1c5   : > { %v1297_v50 = vmul.f32 0.044715, %v2948_v0  ;;  %v2974_v41 = vadd.f32 %v1201_v37, %v2727_v11  ;;  %v2977_v26 = vadd.f32 %v1106_v20, %v2727_v11  ;;  %2244 = vtanh.f32 %v1478_v13 }
 0x1c6   : > { %v1440_v2 = vadd.f32 %v1392_v14, %v2920_v49  ;;  %v1390_v56 = vmul.f32 %v1342_v58, %v2941_v36  ;;  %v1348_v35 = vmul.f32 %v1300_v51, %v2951_v48  ;;  %v2984_v62 = vadd.f32 %v2894_v30, %v2735_v24 }
 0x1c7   : > { %v1301_v7 = vmul.f32 0.044715, %v2974_v41  ;;  %v1298_v37 = vmul.f32 0.044715, %v2977_v26  ;;  %v2989_v20 = vadd.f32 %v1203_v61, %v2731_v22  ;;  %2246 = vtanh.f32 %v1484_v43  ;;  %v1116_v61 = vpop.f32.mrf.mxu0 }
 0x1c8   : > { %v2992_v13 = vmul.f32 %v1339_v15, %v2925_v16  ;;  %v1438_v14 = vadd.f32 %v1390_v56, %v2941_v36  ;;  %v1396_v51 = vmul.f32 %v1348_v35, %v2951_v48  ;;  %v2996_v58 = vpop.eup %2236  ;;  %v1482_v47 = vmul.f32 0.7978846, %v1434_v57 }
 0x1c9   : > { %3444 = vst [vmem:[#allocation40_spill] sm:$0xff] %v2996_v58  ;;  %v1346_v24 = vmul.f32 %v1298_v37, %v2977_v26  ;;  %v1304_v30 = vmul.f32 0.044715, %v2989_v20  ;;  %v3001_v21 = vadd.f32 %v1108_v27, %v2727_v11  ;;  %v3003_v33 = vpop.eup %2238  ;;  %v1488_v43 = vmul.f32 0.7978846, %v1440_v2  ;;  %v1211_v58 = vpop.f32.mrf.mxu1 }
 0x1ca   : > { %3445 = vst [vmem:[#allocation41_spill] sm:$0xff] %v3003_v33  ;;  %v1444_v15 = vadd.f32 %v1396_v51, %v2951_v48  ;;  %v1349_v56 = vmul.f32 %v1301_v7, %v2974_v41  ;;  %v3008_v35 = vadd.f32 %v1110_v29, %v2731_v22  ;;  %v1486_v57 = vmul.f32 0.7978846, %v1438_v14 }
 0x1cb   : > { %v1394_v37 = vmul.f32 %v1346_v24, %v2977_v26  ;;  %v1352_v23 = vmul.f32 %v1304_v30, %v2989_v20  ;;  %v3013_v11 = vadd.f32 %v1205_v34, %v2731_v22  ;;  %v3016_v27 = vmul.f32 %v1297_v50, %v2948_v0  ;;  %v1118_v30 = vpop.f32.mrf.mxu0  ;;  %v1213_v6 = vpop.f32.mrf.mxu1 }
 0x1cc   : > { %v3019_v2 = vmul.f32 0.044715, %v2984_v62  ;;  %v1299_v7 = vmul.f32 0.044715, %v3001_v21  ;;  %v1302_v29 = vmul.f32 0.044715, %v3008_v35  ;;  %2248 = vtanh.f32 %v1482_v47 }
 0x1cd   : > { %v1492_v51 = vmul.f32 0.7978846, %v1444_v15  ;;  %v1400_v14 = vmul.f32 %v1352_v23, %v2989_v20  ;;  %v3025_v24 = vadd.f32 %v1209_v18, %v2725_v10  ;;  %2250 = vtanh.f32 %v1488_v43  ;;  %v1120_v55 = vpop.f32.mrf.mxu0 }
 0x1ce   : > { %v3028_v34 = vmul.f32 %v1349_v56, %v2974_v41  ;;  %v1442_v50 = vadd.f32 %v1394_v37, %v2977_v26  ;;  %v1350_v40 = vmul.f32 %v1302_v29, %v3008_v35  ;;  %v3032_v52 = vpop.eup %2240  ;;  %2252 = vtanh.f32 %v1486_v57 }
 0x1cf   : > { %3446 = vst [vmem:[#allocation42_spill] sm:$0xff] %v3032_v52  ;;  %v1448_v47 = vadd.f32 %v1400_v14, %v2989_v20  ;;  %v1305_v23 = vmul.f32 0.044715, %v3013_v11  ;;  %v1308_v18 = vmul.f32 0.044715, %v3025_v24  ;;  %v3037_v15 = vpop.eup %2242  ;;  %v3040_v43 = vmul.f32 %v1299_v7, %v3001_v21  ;;  %v1122_v19 = vpop.f32.mrf.mxu0 }
 0x1d0   : > { %v1398_v56 = vmul.f32 %v1350_v40, %v3008_v35  ;;  %v3044_v37 = vadd.f32 %v1112_v60, %v2731_v22  ;;  %v3047_v29 = vadd.f32 %v1211_v58, %v2725_v10  ;;  %2254 = vtanh.f32 %v1492_v51  ;;  %v1215_v22 = vpop.f32.mrf.mxu1 }
 0x1d1   : > { %v1496_v57 = vmul.f32 0.7978846, %v1448_v47  ;;  %v1356_v14 = vmul.f32 %v1308_v18, %v3025_v24  ;;  %v3051_v52 = vadd.f32 %v1116_v61, %v2725_v10  ;;  %v1490_v9 = vmul.f32 0.7978846, %v1442_v50 }
 0x1d2   : > { %v1446_v7 = vadd.f32 %v1398_v56, %v3008_v35  ;;  %v1309_v59 = vmul.f32 0.044715, %v3047_v29  ;;  %v3056_v40 = vadd.f32 %v1213_v6, %v2729_v12  ;;  %v3058_v60 = vpop.eup %2244  ;;  %v1353_v58 = vmul.f32 %v1305_v23, %v3013_v11 }
 0x1d3   : > { %3447 = vst [vmem:[#allocation43_spill] sm:$0xff] %v3058_v60  ;;  %v1404_v51 = vmul.f32 %v1356_v14, %v3025_v24  ;;  %v1306_v47 = vmul.f32 0.044715, %v3051_v52  ;;  %v3064_v61 = vadd.f32 %v1118_v30, %v2725_v10  ;;  %2256 = vtanh.f32 %v1496_v57 }
 0x1d4   : > { %v1303_v50 = vmul.f32 0.044715, %v3044_v37  ;;  %v1357_v18 = vmul.f32 %v1309_v59, %v3047_v29  ;;  %v1312_v6 = vmul.f32 0.044715, %v3056_v40  ;;  %v3069_v56 = vpop.eup %2246  ;;  %v1216_v44 = vadd.f32 %v1215_v22, %v2729_v12 }
 0x1d5   : > { %v1452_v60 = vadd.f32 %v1404_v51, %v3025_v24  ;;  %v1354_v23 = vmul.f32 %v1306_v47, %v3051_v52  ;;  %v1307_v14 = vmul.f32 0.044715, %v3064_v61  ;;  %2258 = vtanh.f32 %v1490_v9 }
 0x1d6   : > { %v1494_v10 = vmul.f32 0.7978846, %v1446_v7  ;;  %v1360_v30 = vmul.f32 %v1312_v6, %v3056_v40  ;;  %v3077_v57 = vadd.f32 %v1120_v55, %v2729_v12  ;;  %v1405_v28 = vmul.f32 %v1357_v18, %v3047_v29 }
 0x1d7   : > { %v1500_v59 = vmul.f32 0.7978846, %v1452_v60  ;;  %v1402_v45 = vmul.f32 %v1354_v23, %v3051_v52  ;;  %v1313_v51 = vmul.f32 0.044715, %v1216_v44  ;;  %v1355_v46 = vmul.f32 %v1307_v14, %v3064_v61 }
 0x1d8   : > { %v1408_v47 = vmul.f32 %v1360_v30, %v3056_v40  ;;  %v1310_v22 = vmul.f32 0.044715, %v3077_v57  ;;  %v3085_v9 = vadd.f32 %v1122_v19, %v2729_v12  ;;  %v1401_v7 = vmul.f32 %v1353_v58, %v3013_v11 }
 0x1d9   : > { %2260 = vtanh.f32 %v1500_v59  ;;  %v1450_v55 = vadd.f32 %v1402_v45, %v3051_v52  ;;  %v1361_v60 = vmul.f32 %v1313_v51, %v1216_v44  ;;  %v3089_v6 = vpop.eup %2248  ;;  %v1351_v18 = vmul.f32 %v1303_v50, %v3044_v37 }
 0x1da   : > { %v1456_v23 = vadd.f32 %v1408_v47, %v3056_v40  ;;  %v1358_v30 = vmul.f32 %v1310_v22, %v3077_v57  ;;  %v1311_v14 = vmul.f32 0.044715, %v3085_v9  ;;  %v3095_v1 = vpop.eup %2250  ;;  %2262 = vtanh.f32 %v1494_v10 }
 0x1db   : > { %v1498_v12 = vmul.f32 0.7978846, %v1450_v55  ;;  %v1409_v19 = vmul.f32 %v1361_v60, %v1216_v44  ;;  %v1453_v58 = vadd.f32 %v1405_v28, %v3047_v29  ;;  %v3098_v59 = vpop.eup %2252  ;;  %v1403_v51 = vmul.f32 %v1355_v46, %v3064_v61 }
 0x1dc   : > { %v1504_v45 = vmul.f32 0.7978846, %v1456_v23  ;;  %v1406_v50 = vmul.f32 %v1358_v30, %v3077_v57  ;;  %v1359_v47 = vmul.f32 %v1311_v14, %v3085_v9  ;;  %v1393_v22 = vmul.f32 %v3016_v27, %v2948_v0 }
 0x1dd   : > { %2264 = vtanh.f32 %v1498_v12  ;;  %v1457_v53 = vadd.f32 %v1409_v19, %v1216_v44  ;;  %v1501_v33 = vmul.f32 0.7978846, %v1453_v58  ;;  %v2255_v10 = vpop.eup %2254  ;;  %v1343_v55 = vmul.f32 %v3019_v2, %v2984_v62 }
 0x1de   : > { %2266 = vtanh.f32 %v1504_v45  ;;  %v1454_v28 = vadd.f32 %v1406_v50, %v3077_v57  ;;  %v1407_v60 = vmul.f32 %v1359_v47, %v3085_v9  ;;  %v1445_v23 = vadd.f32 %v3028_v34, %v2974_v41 }
 0x1df   : > { %v1505_v46 = vmul.f32 0.7978846, %v1457_v53  ;;  %2268 = vtanh.f32 %v1501_v33  ;;  %v1449_v30 = vadd.f32 %v1401_v7, %v3013_v11  ;;  %v1395_v27 = vmul.f32 %v3040_v43, %v3001_v21 }
 0x1e0   : > { %v1399_v14 = vmul.f32 %v1351_v18, %v3044_v37  ;;  %v1502_v12 = vmul.f32 0.7978846, %v1454_v28  ;;  %v1451_v2 = vadd.f32 %v1403_v51, %v3064_v61  ;;  %v2257_v19 = vpop.eup %2256  ;;  %v1493_v58 = vmul.f32 0.7978846, %v1445_v23 }
 0x1e1   : > { %2270 = vtanh.f32 %v1505_v46  ;;  %v1497_v45 = vmul.f32 0.7978846, %v1449_v30  ;;  %v1455_v53 = vadd.f32 %v1407_v60, %v3085_v9  ;;  %v1391_v33 = vmul.f32 %v1343_v55, %v2984_v62 }
 0x1e2   : > { %2272 = vtanh.f32 %v1502_v12  ;;  %v3119_v34 = vmul.f32 0.5, %v3047_v29  ;;  %v1499_v7 = vmul.f32 0.7978846, %v1451_v2  ;;  %v2259_v50 = vpop.eup %2258  ;;  %v3121_v43 = vmul.f32 0.5, %v1216_v44 }
 0x1e3   : > { %v1260_v18 = vmul.f32 0.5, %v3025_v24  ;;  %2274 = vtanh.f32 %v1493_v58  ;;  %v1503_v51 = vmul.f32 0.7978846, %v1455_v53  ;;  %v1264_v47 = vmul.f32 0.5, %v3056_v40 }
 0x1e4   : > { %2276 = vtanh.f32 %v1497_v45  ;;  %v1443_v28 = vadd.f32 %v1395_v27, %v3001_v21  ;;  %v1447_v60 = vadd.f32 %v1399_v14, %v3044_v37  ;;  %v3128_v55 = vmul.f32 0.5, %v2974_v41 }
 0x1e5   : > { %v3131_v29 = vmul.f32 0.5, %v3013_v11  ;;  %2278 = vtanh.f32 %v1499_v7  ;;  %v1592_v44 = vadd.f32 1.0, %v2257_v19  ;;  %v3134_v24 = vmul.f32 0.5, %v3064_v61 }
 0x1e6   : > { %v2261_v46 = vpop.eup %2260  ;;  %2280 = vtanh.f32 %v1503_v51  ;;  %v1491_v23 = vmul.f32 0.7978846, %v1443_v28  ;;  %v1495_v40 = vmul.f32 0.7978846, %v1447_v60  ;;  %v3137_v30 = vmul.f32 0.5, %v3085_v9 }
 0x1e7   : > { %v3140_v27 = vmul.f32 0.5, %v3051_v52  ;;  %v1256_v41 = vmul.f32 0.5, %v2989_v20  ;;  %v1588_v14 = vadd.f32 1.0, %v2255_v10  ;;  %v2263_v11 = vpop.eup %2262  ;;  %v1596_v12 = vadd.f32 1.0, %v2261_v46 }
 0x1e8   : > { %2282 = vtanh.f32 %v1491_v23  ;;  %v1437_v2 = vadd.f32 %v2964_v5, %v2903_v38  ;;  %v1441_v61 = vadd.f32 %v1393_v22, %v2948_v0  ;;  %v1262_v19 = vmul.f32 0.5, %v3077_v57 }
 0x1e9   : > { %2284 = vtanh.f32 %v1495_v40  ;;  %v1252_v9 = vmul.f32 0.5, %v2951_v48  ;;  %v3148_v58 = vmul.f32 %v1592_v44, %v1256_v41  ;;  %v3151_v45 = vmul.f32 0.5, %v3001_v21 }
 0x1ea   : > { %v2265_v52 = vpop.eup %2264  ;;  %v3154_v20 = vmul.f32 0.5, %v3044_v37  ;;  %v1485_v10 = vmul.f32 0.7978846, %v1437_v2  ;;  %v1489_v53 = vmul.f32 0.7978846, %v1441_v61  ;;  %v3159_v22 = vmul.f32 0.5, %v2903_v38 }
 0x1eb   : > { %v2267_v7 = vpop.eup %2266  ;;  %v3156_v5 = vmul.f32 %v1588_v14, %v1252_v9  ;;  %v3162_v57 = vmul.f32 0.5, %v2948_v0  ;;  %v1435_v48 = vadd.f32 %v2992_v13, %v2925_v16  ;;  %v1644_v28 = vmul.f32 %v1596_v12, %v1260_v18 }
 0x1ec   : > { %v2269_v51 = vpop.eup %2268  ;;  %v1600_v21 = vadd.f32 1.0, %v2267_v7  ;;  %2286 = vtanh.f32 %v1485_v10  ;;  %v1250_v37 = vmul.f32 0.5, %v2977_v26  ;;  %v1439_v38 = vadd.f32 %v1391_v33, %v2984_v62 }
 0x1ed   : > { %v1597_v60 = vadd.f32 1.0, %v2269_v51  ;;  %v1672_v44 = vpack.c.bf16 %v3148_v58, %v3156_v5  ;;  %2288 = vtanh.f32 %v1489_v53  ;;  %v1254_v0 = vmul.f32 0.5, %v3008_v35 }
 0x1ee   : > { %v2271_v46 = vpop.eup %2270  ;;  %v1586_v23 = vadd.f32 1.0, %v2259_v50  ;;  %v1590_v40 = vadd.f32 1.0, %v2263_v11  ;;  %v1483_v41 = vmul.f32 0.7978846, %v1435_v48  ;;  %v1648_v2 = vmul.f32 %v1600_v21, %v1264_v47 }
 0x1ef   : > { %v2273_v13 = vpop.eup %2272  ;;  %v1601_v14 = vadd.f32 1.0, %v2271_v46  ;;  %v1594_v18 = vadd.f32 1.0, %v2265_v52  ;;  %v1487_v12 = vmul.f32 0.7978846, %v1439_v38  ;;  %v1645_v26 = vmul.f32 %v1597_v60, %v3119_v34 }
 0x1f0   : > { %v2275_v61 = vpop.eup %2274  ;;  %v3173_v9 = vmul.f32 0.5, %v2925_v16  ;;  %v3176_v10 = vmul.f32 0.5, %v2984_v62  ;;  %2290 = vtanh.f32 %v1483_v41  ;;  %v1598_v11 = vadd.f32 1.0, %v2273_v13 }
 0x1f1   : > { %v2277_v33 = vpop.eup %2276  ;;  %v1649_v35 = vmul.f32 %v1601_v14, %v3121_v43  ;;  %v1589_v50 = vadd.f32 1.0, %v2275_v61  ;;  %2292 = vtanh.f32 %v1487_v12  ;;  %v3179_v52 = vmul.f32 %v1586_v23, %v1250_v37 }
 0x1f2   : > { %v2279_v53 = vpop.eup %2278  ;;  %v1593_v47 = vadd.f32 1.0, %v2277_v33  ;;  %v3181_v7 = vmul.f32 %v1590_v40, %v1254_v0  ;;  %v1244_v34 = vmul.f32 0.5, %v2882_v32  ;;  %v1676_v51 = vpack.c.bf16 %v1648_v2, %v1644_v28 }
 0x1f3   : > { %v2281_v16 = vpop.eup %2280  ;;  %v1677_v48 = vpack.c.bf16 %v1649_v35, %v1645_v26  ;;  %v1595_v62 = vadd.f32 1.0, %v2279_v53  ;;  %v1580_v21 = vadd.f32 1.0, %v3069_v56  ;;  %v1637_v60 = vmul.f32 %v1589_v50, %v3128_v55 }
 0x1f4   : > { %v1641_v43 = vmul.f32 %v1593_v47, %v3131_v29  ;;  %v1599_v38 = vadd.f32 1.0, %v2281_v16  ;;  %v1584_v46 = vadd.f32 1.0, %v3095_v1  ;;  %v1646_v37 = vmul.f32 %v1598_v11, %v1262_v19 }
 0x1f5   : > { %v2283_v41 = vpop.eup %2282  ;;  %1776 = vmatprep.subr.bf16.mxu1 %v1677_v48  ;;  %v1248_v0 = vmul.f32 0.5, %v2920_v49  ;;  %v1429_v32 = vadd.f32 %v2899_v3, %v2834_v4  ;;  %v1433_v28 = vadd.f32 %v2958_v25, %v2879_v31  ;;  %v1643_v55 = vmul.f32 %v1595_v62, %v3134_v24 }
 0x1f6   : > { %v2285_v23 = vpop.eup %2284  ;;  %1777 = vmatpush1.bf16.msra.mxu1 %v1676_v51  ;;  %v1673_v56 = vpack.c.bf16 %v1641_v43, %v1637_v60  ;;  %v1647_v29 = vmul.f32 %v1599_v38, %v3137_v30  ;;  %v1587_v40 = vadd.f32 1.0, %v2283_v41  ;;  %v1642_v1 = vmul.f32 %v1594_v18, %v3140_v27 }
 0x1f7   : > { %v1591_v13 = vadd.f32 1.0, %v2285_v23  ;;  %v1477_v19 = vmul.f32 0.7978846, %v1429_v32  ;;  %v1481_v14 = vmul.f32 0.7978846, %v1433_v28  ;;  %v1670_v3 = vpack.c.bf16 %v3181_v7, %v3179_v52 }
 0x1f8   : > { %1778 = vmatprep.subr.bf16.mxu1 %v1673_v56  ;;  %v1675_v49 = vpack.c.bf16 %v1647_v29, %v1643_v55  ;;  %v1628_v2 = vmul.f32 %v1580_v21, %v1244_v34  ;;  %v1632_v25 = vmul.f32 %v1584_v46, %v1248_v0  ;;  %v1674_v61 = vpack.c.bf16 %v1646_v37, %v1642_v1  ;;  %v3451_v21 = vld [vmem:[#allocation29_spill] sm:$0xff]  ;;  %v3453_v46 = vld [vmem:[#allocation32_spill] sm:$0xff] }
 0x1f9   : > { %v2287_v12 = vpop.eup %2286  ;;  %v1635_v26 = vmul.f32 %v1587_v40, %v3151_v45  ;;  %v1639_v24 = vmul.f32 %v1591_v13, %v3154_v20  ;;  %2294 = vtanh.f32 %v1477_v19  ;;  %v3204_v18 = vmul.f32 0.5, %v2834_v4  ;;  %v3455_v1 = vld [vmem:[#allocation21_spill] sm:$0xff]  ;;  %v3456_v13 = vld [vmem:[#allocation30_spill] sm:$0xff] }
 0x1fa   : > { %v2289_v30 = vpop.eup %2288  ;;  %1723 = vmatprep.subr.bf16.mxu0 %v1675_v49  ;;  %1779 = vmatpush1.bf16.msra.mxu1 %v1672_v44  ;;  %v1581_v27 = vadd.f32 1.0, %v2287_v12  ;;  %2296 = vtanh.f32 %v1481_v14  ;;  %v1582_v33 = vadd.f32 1.0, %v3098_v59  ;;  %v1427_v45 = vadd.f32 %v2944_v39, %v2870_v17  ;;  %v3459_v49 = vld [vmem:[#allocation12_spill] sm:$0xff]  ;;  %v3460_v12 = vld [vmem:[#allocation19_spill] sm:$0xff] }
 0x1fb   : > { %1724 = vmatpush1.bf16.msra.mxu0 %v1674_v61  ;;  %v1671_v35 = vpack.c.bf16 %v1639_v24, %v1635_v26  ;;  %v1585_v50 = vadd.f32 1.0, %v2289_v30  ;;  %v1431_v20 = vadd.f32 %v2961_v8, %v2887_v63  ;;  %v1668_v11 = vpack.c.bf16 %v1632_v25, %v1628_v2  ;;  %v3461_v26 = vld [vmem:[#allocation37_spill] sm:$0xff]  ;;  %v3462_v30 = vld [vmem:[#allocation39_spill] sm:$0xff] }
 0x1fc   : > { %v1242_v58 = vmul.f32 0.5, %v2913_v54  ;;  %v1246_v5 = vmul.f32 0.5, %v2941_v36  ;;  %v1578_v4 = vadd.f32 1.0, %v3089_v6  ;;  %v1629_v59 = vmul.f32 %v1581_v27, %v3159_v22  ;;  %v3448_v6 = vld [vmem:[#allocation41_spill] sm:$0xff]  ;;  %v3449_v22 = vld [vmem:[#allocation24_spill] sm:$0xff] }
 0x1fd   : > { %v2291_v44 = vpop.eup %2290  ;;  %1725 = vmatprep.subr.bf16.mxu0 %v1671_v35  ;;  %v1633_v53 = vmul.f32 %v1585_v50, %v3162_v57  ;;  %v1475_v47 = vmul.f32 0.7978846, %v1427_v45  ;;  %v1479_v52 = vmul.f32 0.7978846, %v1431_v20  ;;  %v1240_v8 = vmul.f32 0.5, %v2852_v42  ;;  %v3450_v57 = vld [vmem:[#allocation14_spill] sm:$0xff] }
 0x1fe   : > { %v2293_v7 = vpop.eup %2292  ;;  %v1579_v39 = vadd.f32 1.0, %v2291_v44  ;;  %v1630_v34 = vmul.f32 %v1582_v33, %v1246_v5  ;;  %v1576_v16 = vadd.f32 1.0, %v3037_v15  ;;  %v1572_v48 = vadd.f32 1.0, %v3448_v6  ;;  %v3452_v15 = vld [vmem:[#allocation22_spill] sm:$0xff]  ;;  %v3463_v50 = vld [vmem:[#allocation43_spill] sm:$0xff] }
 0x1ff   : > { %v1669_v54 = vpack.c.bf16 %v1633_v53, %v1629_v59  ;;  %1726 = vmatpush1.bf16.msra.mxu0 %v1670_v3  ;;  %v1583_v36 = vadd.f32 1.0, %v2293_v7  ;;  %2298 = vtanh.f32 %v1475_v47  ;;  %v1626_v51 = vmul.f32 %v1578_v4, %v1242_v58  ;;  %v3465_v58 = vld [vmem:[#allocation18_spill] sm:$0xff] }
 0x200   : > { %2300 = vtanh.f32 %v1479_v52  ;;  %v1236_v62 = vmul.f32 0.5, %v3449_v22  ;;  %v1421_v60 = vadd.f32 %v3451_v21, %v3450_v57  ;;  %v1627_v43 = vmul.f32 %v1579_v39, %v3173_v9  ;;  %v3466_v47 = vld [vmem:[#allocation10_spill] sm:$0xff] }
 0x201   : > { %1780 = vmatprep.subr.bf16.mxu1 %v1669_v54  ;;  %v1631_v42 = vmul.f32 %v1583_v36, %v3176_v10  ;;  %v3224_v38 = vmul.f32 %v1576_v16, %v1240_v8  ;;  %v1425_v41 = vadd.f32 %v3453_v46, %v3452_v15  ;;  %v1241_v37 = vmul.f32 0.5, %v2879_v31  ;;  %v3454_v10 = vld [vmem:[#allocation31_spill] sm:$0xff]  ;;  %v3467_v52 = vld [vmem:[#allocation26_spill] sm:$0xff]  ;;  %v3468_v16 = vld [vmem:[#allocation16_spill] sm:$0xff] }
 0x202   : > { %1781 = vmatpush1.bf16.msra.mxu1 %v1668_v11  ;;  %v1235_v0 = vmul.f32 0.5, %v2870_v17  ;;  %v1239_v32 = vmul.f32 0.5, %v2887_v63  ;;  %v1469_v28 = vmul.f32 0.7978846, %v1421_v60  ;;  %v1666_v56 = vpack.c.bf16 %v1630_v34, %v1626_v51  ;;  %v3457_v17 = vld [vmem:[#allocation25_spill] sm:$0xff]  ;;  %v3464_v11 = vld [vmem:[#allocation6_spill] sm:$0xff] }
 0x203   : > { %v1667_v23 = vpack.c.bf16 %v1631_v42, %v1627_v43  ;;  %v1620_v55 = vmul.f32 %v1572_v48, %v1236_v62  ;;  %v1473_v29 = vmul.f32 0.7978846, %v1425_v41  ;;  %v3232_v9 = vmul.f32 0.5, %v3450_v57  ;;  %v3458_v63 = vld [vmem:[#allocation33_spill] sm:$0xff]  ;;  %v3469_v36 = vld [vmem:[#allocation23_spill] sm:$0xff]  ;;  %v3470_v51 = vld [vmem:[#allocation38_spill] sm:$0xff] }
 0x204   : > { %2302 = vtanh.f32 %v1469_v28  ;;  %v1238_v40 = vmul.f32 0.5, %v3454_v10  ;;  %v1419_v19 = vadd.f32 %v3456_v13, %v3455_v1  ;;  %v1423_v14 = vadd.f32 %v3458_v63, %v3457_v17  ;;  %v3471_v62 = vld [vmem:[#allocation40_spill] sm:$0xff]  ;;  %v3472_v60 = vld [vmem:[#allocation42_spill] sm:$0xff]  ;;  %v3473_v42 = vld [vmem:[#allocation9_spill] sm:$0xff] }
 0x205   : > { %1727 = vmatprep.subr.bf16.mxu0 %v1667_v23  ;;  %v1664_v31 = vpack.c.bf16 %v3224_v38, %v1620_v55  ;;  %2304 = vtanh.f32 %v1473_v29  ;;  %v1228_v3 = vmul.f32 0.5, %v3459_v49  ;;  %v1232_v61 = vmul.f32 0.5, %v3460_v12  ;;  %v3474_v38 = vld [vmem:[#allocation20_spill] sm:$0xff]  ;;  %v3475_v41 = vld [vmem:[#allocation13_spill] sm:$0xff] }
 0x206   : > { %v2295_v2 = vpop.eup %2294  ;;  %1728 = vmatpush1.bf16.msra.mxu0 %v1666_v56  ;;  %v1467_v25 = vmul.f32 0.7978846, %v1419_v19  ;;  %v1564_v24 = vadd.f32 1.0, %v3461_v26  ;;  %v1568_v27 = vadd.f32 1.0, %v3462_v30  ;;  %v1574_v45 = vadd.f32 1.0, %v3463_v50  ;;  %v3477_v63 = vld [vmem:[#allocation8_spill] sm:$0xff] }
 0x207   : > { %v2297_v33 = vpop.eup %2296  ;;  %v1573_v35 = vadd.f32 1.0, %v2295_v2  ;;  %v1471_v20 = vmul.f32 0.7978846, %v1423_v14  ;;  %v1413_v5 = vadd.f32 %v3465_v58, %v3464_v11  ;;  %v1417_v7 = vadd.f32 %v3467_v52, %v3466_v47  ;;  %v3478_v14 = vld [vmem:[#allocation15_spill] sm:$0xff]  ;;  %v3479_v2 = vld [vmem:[#allocation28_spill] sm:$0xff]  ;;  %v3480_v30 = vld [vmem:[#allocation34_spill] sm:$0xff] }
 0x208   : > { %v1577_v4 = vadd.f32 1.0, %v2297_v33  ;;  %2306 = vtanh.f32 %v1467_v25  ;;  %v3247_v44 = vmul.f32 %v1564_v24, %v1228_v3  ;;  %v3249_v59 = vmul.f32 %v1568_v27, %v1232_v61  ;;  %v3481_v50 = vld [vmem:[#allocation11_spill] sm:$0xff]  ;;  %v3482_v58 = vld [vmem:[#allocation36_spill] sm:$0xff]  ;;  %v3483_v52 = vld [vmem:[#allocation17_spill] sm:$0xff] }
 0x209   : > { %v1621_v53 = vmul.f32 %v1573_v35, %v3204_v18  ;;  %2308 = vtanh.f32 %v1471_v20  ;;  %v1461_v39 = vmul.f32 0.7978846, %v1413_v5  ;;  %v1226_v54 = vmul.f32 0.5, %v3468_v16 }
 0x20a   : > { %v1625_v34 = vmul.f32 %v1577_v4, %v1241_v37  ;;  %v1660_v8 = vpack.c.bf16 %v3249_v59, %v3247_v44  ;;  %v1230_v6 = vmul.f32 0.5, %v3469_v36  ;;  %v1465_v48 = vmul.f32 0.7978846, %v1417_v7  ;;  %v3476_v37 = vld [vmem:[#allocation27_spill] sm:$0xff] }
 0x20b   : > { %2310 = vtanh.f32 %v1461_v39  ;;  %v1562_v22 = vadd.f32 1.0, %v3470_v51  ;;  %v1566_v57 = vadd.f32 1.0, %v3471_v62  ;;  %v1570_v43 = vadd.f32 1.0, %v3472_v60 }
 0x20c   : > { %v2299_v18 = vpop.eup %2298  ;;  %v1665_v21 = vpack.c.bf16 %v1625_v34, %v1621_v53  ;;  %v1411_v46 = vadd.f32 %v3474_v38, %v3473_v42  ;;  %v1415_v28 = vadd.f32 %v3476_v37, %v3475_v41  ;;  %2312 = vtanh.f32 %v1465_v48 }
 0x20d   : > { %v2301_v23 = vpop.eup %2300  ;;  %v1571_v56 = vadd.f32 1.0, %v2299_v18  ;;  %v1610_v55 = vmul.f32 %v1562_v22, %v1226_v54  ;;  %v1614_v29 = vmul.f32 %v1566_v57, %v1230_v6  ;;  %v1364_v49 = vmul.f32 %v3478_v14, %v3477_v63 }
 0x20e   : > { %1782 = vmatprep.subr.bf16.mxu1 %v1665_v21  ;;  %v1575_v10 = vadd.f32 1.0, %v2301_v23  ;;  %v1459_v13 = vmul.f32 0.7978846, %v1411_v46  ;;  %v1463_v19 = vmul.f32 0.7978846, %v1415_v28  ;;  %v1234_v25 = vmul.f32 0.5, %v3479_v2 }
 0x20f   : > { %v1619_v3 = vmul.f32 %v1571_v56, %v1235_v0  ;;  %1783 = vmatpush1.bf16.msra.mxu1 %v1664_v31  ;;  %v1622_v12 = vmul.f32 %v1574_v45, %v1238_v40  ;;  %v1658_v61 = vpack.c.bf16 %v1614_v29, %v1610_v55  ;;  %v1412_v24 = vadd.f32 %v1364_v49, %v3477_v63  ;;  %v3484_v55 = vld [vmem:[#allocation35_spill] sm:$0xff] }
 0x210   : > { %v1623_v26 = vmul.f32 %v1575_v10, %v1239_v32  ;;  %2314 = vtanh.f32 %v1459_v13  ;;  %v1554_v27 = vadd.f32 1.0, %v3480_v30  ;;  %v1618_v35 = vmul.f32 %v1570_v43, %v1234_v25 }
 0x211   : > { %v2303_v33 = vpop.eup %2302  ;;  %2316 = vtanh.f32 %v1463_v19  ;;  %v1222_v20 = vmul.f32 0.5, %v3481_v50  ;;  %v1558_v5 = vadd.f32 1.0, %v3482_v58  ;;  %v1233_v31 = vmul.f32 0.5, %v3452_v15 }
 0x212   : > { %v2305_v4 = vpop.eup %2304  ;;  %v1663_v0 = vpack.c.bf16 %v1623_v26, %v1619_v3  ;;  %v1565_v53 = vadd.f32 1.0, %v2303_v33  ;;  %v1460_v40 = vmul.f32 0.7978846, %v1412_v24  ;;  %v1662_v32 = vpack.c.bf16 %v1622_v12, %v1618_v35  ;;  %v1685_v26 = vpop.permute.xlu0 %1684 }
 0x213   : > { %v1569_v45 = vadd.f32 1.0, %v2305_v4  ;;  %v1602_v7 = vmul.f32 %v1554_v27, %v3483_v52  ;;  %v1606_v39 = vmul.f32 %v1558_v5, %v1222_v20  ;;  %v1227_v15 = vmul.f32 0.5, %v3455_v1  ;;  %v1690_v35 = vpop.permute.xlu1 %1689 }
 0x214   : > { %1729 = vmatprep.subr.bf16.mxu0 %v1663_v0  ;;  %2318 = vtanh.f32 %v1460_v40  ;;  %v1613_v16 = vmul.f32 %v1565_v53, %v3232_v9  ;;  %v1231_v22 = vmul.f32 0.5, %v3457_v17  ;;  %v1221_v38 = vmul.f32 0.5, %v3464_v11 }
 0x215   : > { %v2307_v34 = vpop.eup %2306  ;;  %v1617_v54 = vmul.f32 %v1569_v45, %v1233_v31  ;;  %1730 = vmatpush1.bf16.msra.mxu0 %v1662_v32  ;;  %v1654_v36 = vpack.c.bf16 %v1606_v39, %v1602_v7  ;;  %v1225_v46 = vmul.f32 0.5, %v3466_v47  ;;  %v1560_v29 = vadd.f32 1.0, %v3484_v55 }
 0x216   : > { %v2309_v6 = vpop.eup %2308  ;;  %v1563_v48 = vadd.f32 1.0, %v2307_v34  ;;  %v1219_v13 = vmul.f32 0.5, %v3473_v42  ;;  %v1223_v44 = vmul.f32 0.5, %v3475_v41  ;;  %v1220_v49 = vmul.f32 0.5, %v3477_v63  ;;  %v2222_v42 = vld [vmem:[%s3373_s4] sm:$0xff]   ;;  %v2223_v63 = vld [vmem:[%s3373_s4 + $0x8] sm:$0xff]   ;;  %v1695_v40 = vpop.permute.xlu0 %1694 }
 0x217   : > { %v1661_v51 = vpack.c.bf16 %v1617_v54, %v1613_v16  ;;  %v1567_v62 = vadd.f32 1.0, %v2309_v6  ;;  %v3486_v41 = vmov 0  }
 0x218   : > { %v2311_v57 = vpop.eup %2310  ;;  %v1611_v18 = vmul.f32 %v1563_v48, %v1227_v15 }
 0x219   : > { %1784 = vmatprep.subr.bf16.mxu1 %v1661_v51  ;;  %v1615_v21 = vmul.f32 %v1567_v62, %v1231_v22  ;;  %v1557_v60 = vadd.f32 1.0, %v2311_v57  ;;  %v2313_v43 = vpop.eup %2312 }
 0x21a   : > { %1785 = vmatpush1.bf16.msra.mxu1 %v1660_v8  ;;  %v1561_v37 = vadd.f32 1.0, %v2313_v43  ;;  %v3485_v8 = vld [vmem:[#allocation7_spill] sm:$0xff] }
 0x21b   : > { %v1659_v9 = vpack.c.bf16 %v1615_v21, %v1611_v18  ;;  %v1605_v17 = vmul.f32 %v1557_v60, %v1221_v38  ;;  %v1224_v11 = vmul.f32 0.5, %v3485_v8 }
 0x21c   : > { %v1609_v28 = vmul.f32 %v1561_v37, %v1225_v46 }
 0x21d   : > { %v2315_v1 = vpop.eup %2314  ;;  %1731 = vmatprep.subr.bf16.mxu0 %v1659_v9  ;;  %v1608_v2 = vmul.f32 %v1560_v29, %v1224_v11 }
 0x21e   : > { %v2317_v23 = vpop.eup %2316  ;;  %1732 = vmatpush1.bf16.msra.mxu0 %v1658_v61  ;;  %v1555_v56 = vadd.f32 1.0, %v2315_v1  ;;  %v1657_v10 = vpack.c.bf16 %v1609_v28, %v1605_v17 }
 0x21f   : > { %v1559_v59 = vadd.f32 1.0, %v2317_v23 }
 0x220   : > { %1786 = vmatprep.subr.bf16.mxu1 %v1657_v10  ;;  %v1603_v47 = vmul.f32 %v1555_v56, %v1219_v13 }
 0x221   : > { %v2319_v19 = vpop.eup %2318  ;;  %v1607_v14 = vmul.f32 %v1559_v59, %v1223_v44 }
 0x222   : > { %v1556_v3 = vadd.f32 1.0, %v2319_v19 }
 0x223   : > { %v1655_v25 = vpack.c.bf16 %v1607_v14, %v1603_v47 }
 0x224   : > { %v1604_v12 = vmul.f32 %v1556_v3, %v1220_v49 }
 0x225   : > { %1733 = vmatprep.subr.bf16.mxu0 %v1655_v25 }
 0x226   : > { %v1656_v61 = vpack.c.bf16 %v1608_v2, %v1604_v12  ;;  %1734 = vmatpush1.bf16.msra.mxu0 %v1654_v36  ;;  %v1700_v36 = vpop.permute.xlu1 %1699 }
 0x228   : > { %1787 = vmatpush1.bf16.msra.mxu1 %v1656_v61 }
 0x229   : > { %2095 = vmatmul.mubr.msk.bf16.vlgmr.msra.gmra.mxu0 %vm1712_vm4, %v2222_v42 }
 0x22a   : > { %1761 = vmatprep.mubr.bf16.mxu0 %v3486_v41 }
 0x22b   : > { %2097 = vmatmul.mubr.msk.bf16.vlgmr.msra.gmra.mxu1 %vm1712_vm4, %v2222_v42 }
 0x22c   : > { %1814 = vmatprep.mubr.bf16.mxu1 %v3486_v41 }
 0x231   : > { %2096 = vmatmul.mubr.msk.bf16.gmra.mxu0 %vm1712_vm4, %v2223_v63 }
 0x233   : > { %2098 = vmatmul.mubr.msk.bf16.gmra.mxu1 %vm1712_vm4, %v2223_v63 }
 0x2e9   : > { %v1753_v24 = vpop.f32.mrf.mxu0 }
 0x2ea   : > { %v1754_v30 = vadd.f32 %v1753_v24, %v1685_v26 }
 0x2eb   : > { %v1806_v27 = vpop.f32.mrf.mxu1  ;;  %v1755_v33 = vpop.f32.mrf.mxu0 }
 0x2ec   : > { %v1807_v50 = vadd.f32 %v1806_v27, %v1685_v26  ;;  %1825 = vst [vmem:[%s3296_s18] sm:$0xff] %v1754_v30  ;;  %v1756_v20 = vadd.f32 %v1755_v33, %v1685_v26 }
 0x2ed   : > { %v1808_v58 = vpop.f32.mrf.mxu1  ;;  %v1757_v5 = vpop.f32.mrf.mxu0 }
 0x2ee   : > { %1827 = vst [vmem:[%s3296_s18 + $0x10] sm:$0xff] %v1807_v50  ;;  %v1809_v4 = vadd.f32 %v1808_v58, %v1685_v26  ;;  %1826 = vst [vmem:[%s3296_s18 + $0x8] sm:$0xff] %v1756_v20  ;;  %v1758_v0 = vadd.f32 %v1757_v5, %v1690_v35 }
 0x2ef   : > { %v1810_v31 = vpop.f32.mrf.mxu1  ;;  %v1759_v53 = vpop.f32.mrf.mxu0 }
 0x2f0   : > { %1828 = vst [vmem:[%s3296_s18 + $0x18] sm:$0xff] %v1809_v4  ;;  %v1811_v45 = vadd.f32 %v1810_v31, %v1690_v35  ;;  %1829 = vst [vmem:[%s3296_s18 + $0x20] sm:$0xff] %v1758_v0  ;;  %v1760_v32 = vadd.f32 %v1759_v53, %v1690_v35 }
 0x2f1   : > { %v1812_v52 = vpop.f32.mrf.mxu1  ;;  %v1763_v7 = vpop.f32.mrf.mxu0 }
 0x2f2   : > { %1831 = vst [vmem:[%s3296_s18 + $0x30] sm:$0xff] %v1811_v45  ;;  %v1813_v39 = vadd.f32 %v1812_v52, %v1690_v35  ;;  %1830 = vst [vmem:[%s3296_s18 + $0x28] sm:$0xff] %v1760_v32  ;;  %v1764_v34 = vadd.f32 %v1763_v7, %v1695_v40 }
 0x2f3   : > { %v1816_v16 = vpop.f32.mrf.mxu1  ;;  %v1765_v54 = vpop.f32.mrf.mxu0 }
 0x2f4   : > { %1832 = vst [vmem:[%s3296_s18 + $0x38] sm:$0xff] %v1813_v39  ;;  %v1817_v6 = vadd.f32 %v1816_v16, %v1695_v40  ;;  %1833 = vst [vmem:[%s3296_s18 + $0x40] sm:$0xff] %v1764_v34  ;;  %v1766_v48 = vadd.f32 %v1765_v54, %v1695_v40 }
 0x2f5   : > { %v1818_v51 = vpop.f32.mrf.mxu1  ;;  %v1767_v15 = vpop.f32.mrf.mxu0 }
 0x2f6   : > { %1835 = vst [vmem:[%s3296_s18 + $0x50] sm:$0xff] %v1817_v6  ;;  %v1819_v22 = vadd.f32 %v1818_v51, %v1695_v40  ;;  %1834 = vst [vmem:[%s3296_s18 + $0x48] sm:$0xff] %v1766_v48  ;;  %v1768_v62 = vadd.f32 %v1767_v15, %v1700_v36 }
 0x2f7   : > { %v1820_v57 = vpop.f32.mrf.mxu1  ;;  %v1769_v18 = vpop.f32.mrf.mxu0 }
 0x2f8   : > { %1836 = vst [vmem:[%s3296_s18 + $0x58] sm:$0xff] %v1819_v22  ;;  %v1821_v21 = vadd.f32 %v1820_v57, %v1700_v36  ;;  %1837 = vst [vmem:[%s3296_s18 + $0x60] sm:$0xff] %v1768_v62  ;;  %v1770_v60 = vadd.f32 %v1769_v18, %v1700_v36 }
 0x2f9   : > { %v1822_v43 = vpop.f32.mrf.mxu1 }
 0x2fa   : > { %1839 = vst [vmem:[%s3296_s18 + $0x70] sm:$0xff] %v1821_v21  ;;  %v1823_v9 = vadd.f32 %v1822_v43, %v1700_v36  ;;  %1838 = vst [vmem:[%s3296_s18 + $0x68] sm:$0xff] %v1770_v60 }
 0x2fc   : > { %1840 = vst [vmem:[%s3296_s18 + $0x78] sm:$0xff] %v1823_v9 }
 0x2fd   : > { %2333 = shalt.err (!%p2330_p12)
}
 0x2fe   : > { %s2334_s15 = scalar_lea.hbm %s3316_s30, 2048  ;;  %s2338_s18 = scalar_lea.hbm %s3375_s6, 4096 }
 0x2ff   : > { %p2335_p13 = scmp.ne.s32.totalorder %s3316_s30, %s2334_s15  ;;  %p2339_p2 = scmp.lt.s32.totalorder %s3316_s30, %s3375_s6 }
 0x300   : > { %p2340_p3 = scmp.lt.s32.totalorder %s2338_s18, %s2334_s15 }
 0x301   : > { %p2336_p0 = pnand %p2335_p13, %p2511_p5 }
 0x302   : > { %p2341_p4 = por %p2340_p3, %p2339_p2 }
 0x303   : > { %p2337_p1 = pneg %p2336_p0 }
 0x305   : > { %p2342_p6 = pnand %p2341_p4, %p2337_p1 }
 0x307   : > { %2345 = shalt.err (!%p2342_p6)
}
 0x308   : > { %s2435_s28 = smov 512   ;;  %s2436_s11 = smov 32  }
 0x309   : > { %2107 = dma.vmem_to_hbm [thread:$0]  (%p2511_p5), %s3318_s20, 2048, %s3316_s30, %s1842_s24, %s2435_s28, %s2435_s28, %s2436_s11  }
 0x30a PF: > { %s1872_s12 = sand.u32 1, %s2392_s21   ;;  %p2110_p7 = pnand %p2045_p10, %p2522_p9 }
 0x30b   : > { %s1873_s13 = scalar_lea.sflag [#allocation4], %s1872_s12 }
 0x30c   : > { %p2111_p8 = pneg %p2110_p7 }
 0x30e   : > { %2387 = dma.done.wait (%p2111_p8), %s1873_s13, 2048  }
 0x30f   : > { %2389 = vsyncadd (%p2111_p8), %s1873_s13, 4294965248  ;;  %s19_s26 = sadd.s32 1, %s2412_s26   ;;  %s3487_s21 = smov %s2396_s22 }
 0x310   : > { %p16_p11 = scmp.ge.s32.totalorder %s19_s26, 4   ;;  %s3488_s22 = smov %s2400_s23 }
 0x311   : > { %s3489_s23 = smov %s2520_s9  ;;  %s3490_s24 = smov %s2408_s25 }
 0x312   : > { %s3491_s25 = smov %s3493_s29  ;;  %18 = sbr.rel (!%p16_p11) target bundleno = 4 (0x4), region = 215 }
 0x317   :  { %1878 = vsyncpa [#allocation4], 1 }
 0x318   :  { %1880 = vsyncpa [#allocation4 + $0x1], 1 }

</bundles_post_ra>
